<compile_context>
chip_gen: v5e
topology: v5e:2x2
jax: 0.10.0
libtpu: 0.0.40
codegen_flags: <defaults>
</compile_context>

<pallas_src>
import functools
import math

import numpy as np
import jax
import jax.numpy as jnp
from jax.experimental import pallas as pl
from jax.experimental.pallas import tpu as pltpu


# ---------------------------------------------------------------------------------
# Pallas kernel: fused DoubleConv (3x3 conv + folded-BN + ReLU, twice) per batch elem
# ---------------------------------------------------------------------------------
def _double_conv_kernel(x_ref, w1_ref, b1_ref, w2_ref, b2_ref, mask_ref,
                        o_ref, h_scr, *, taps, m, wp):
    """x_ref   : (Rp, Cin)    bf16  spatially padded, flattened input (skip||upsample)
       w1_ref  : (9, Cin, Cm) bf16  conv1 weights, BN1 scale pre-folded
       b1_ref  : (1, Cm)      f32   folded BN1 bias
       w2_ref  : (9, Cm, Co)  bf16  conv2 weights, BN2 scale pre-folded
       b2_ref  : (1, Co)      f32   folded BN2 bias
       mask_ref: (m, 1)       f32   1.0 on real output columns, 0.0 on junk columns
       o_ref   : (m, Co)      f32   conv2 output, padded-width row layout
       h_scr   : (Rp, Cm)     bf16  VMEM-resident padded intermediate (never in HBM)
    """
    # ---- conv1 + BN + ReLU: 9 shifted-window MXU matmuls, register accumulation ----
    acc = jnp.dot(x_ref[taps[0]:taps[0] + m, :], w1_ref[0],
                  preferred_element_type=jnp.float32)
    for t in range(1, 9):
        off = taps[t]
        acc += jnp.dot(x_ref[off:off + m, :], w1_ref[t],
                       preferred_element_type=jnp.float32)
    # Bias + ReLU; multiply by the column mask so the 2 junk (padded-width)
    # columns per row become exact zeros -> they double as conv2's zero padding.
    h = jnp.maximum(acc + b1_ref[...], 0.0) * mask_ref[...]

    # ---- stash h into the (H+3, W+2)-padded flat layout so conv2 reuses the taps ----
    s0 = wp + 1                       # one padded row + one left-pad column in
    s1 = s0 + m
    rp = h_scr.shape[0]
    cm = h_scr.shape[1]
    h_scr[0:s0, :] = jnp.zeros((s0, cm), h_scr.dtype)        # top padding rows/col
    h_scr[s1:rp, :] = jnp.zeros((rp - s1, cm), h_scr.dtype)  # bottom padding rows
    h_scr[s0:s1, :] = h.astype(h_scr.dtype)                  # interior (+ masked junk)

    # ---- conv2 + BN + ReLU ----
    acc2 = jnp.dot(h_scr[taps[0]:taps[0] + m, :], w2_ref[0],
                   preferred_element_type=jnp.float32)
    for t in range(1, 9):
        off = taps[t]
        acc2 += jnp.dot(h_scr[off:off + m, :], w2_ref[t],
                        preferred_element_type=jnp.float32)
    o_ref[...] = jnp.maximum(acc2 + b2_ref[...], 0.0).astype(o_ref.dtype)


# ---------------------------------------------------------------------------------
# Wrapper: DoubleConv on NHWC input, intermediate kept in VMEM
# ---------------------------------------------------------------------------------
def double_conv(x, w1, b1, w2, b2, out_dtype=jnp.float32):
    """x: (B, H, W, Cin) f32 NHWC.  w*: (9, C, C') bf16.  b*: (1, C') f32."""
    B, H, W, Cin = x.shape
    Cm = w1.shape[-1]
    Co = w2.shape[-1]
    Wp = W + 2
    # pad=1 on each side + one extra bottom row so the padded-width "junk column"
    # reads of the last output row never run past the buffer.
    xp = jnp.pad(x.astype(jnp.bfloat16), ((0, 0), (1, 2), (1, 1), (0, 0)))
    Rp = (H + 3) * Wp
    xf = xp.reshape(B, Rp, Cin)

    M = H * Wp                                      # output rows incl. 2 junk cols/row
    taps = tuple(di * Wp + dj for di in range(3) for dj in range(3))
    mask = jnp.asarray((np.arange(M) % Wp < W).astype(np.float32).reshape(M, 1))

    kernel = functools.partial(_double_conv_kernel, taps=taps, m=M, wp=Wp)
    yf = pl.pallas_call(
        kernel,
        out_shape=jax.ShapeDtypeStruct((B, M, Co), out_dtype),
        grid=(B,),
        in_specs=[
            pl.BlockSpec((None, Rp, Cin), lambda b: (b, 0, 0)),
            pl.BlockSpec((9, Cin, Cm), lambda b: (0, 0, 0)),
            pl.BlockSpec((1, Cm), lambda b: (0, 0)),
            pl.BlockSpec((9, Cm, Co), lambda b: (0, 0, 0)),
            pl.BlockSpec((1, Co), lambda b: (0, 0)),
            pl.BlockSpec((M, 1), lambda b: (0, 0)),
        ],
        out_specs=pl.BlockSpec((None, M, Co), lambda b: (b, 0, 0)),
        scratch_shapes=[pltpu.VMEM((Rp, Cm), jnp.bfloat16)],
        compiler_params=pltpu.CompilerParams(
            dimension_semantics=("parallel",),
            vmem_limit_bytes=32 * 1024 * 1024),
    )(xf, w1, b1, w2, b2, mask)

    return yf.reshape(B, H, Wp, Co)[:, :, :W, :]    # drop the 2 junk columns per row


# ---------------------------------------------------------------------------------
# XLA glue: bilinear x2 upsample with align_corners=True (PyTorch semantics), NHWC
# ---------------------------------------------------------------------------------
def _upsample_bilinear_x2_align_corners(x):
    B, H, W, C = x.shape

    def grid(n_in):
        n_out = 2 * n_in
        if n_in == 1:
            z = np.zeros(n_out, np.int32)
            return z, z, np.zeros(n_out, np.float32)
        src = np.arange(n_out, dtype=np.float64) * (n_in - 1) / (n_out - 1)
        i0 = np.floor(src).astype(np.int32)
        i1 = np.minimum(i0 + 1, n_in - 1).astype(np.int32)
        return i0, i1, (src - i0).astype(np.float32)

    i0, i1, wh = grid(H)
    j0, j1, ww = grid(W)
    wh = jnp.asarray(wh)[None, :, None, None]
    ww = jnp.asarray(ww)[None, None, :, None]
    xh = x[:, i0] * (1.0 - wh) + x[:, i1] * wh            # (B, 2H, W, C)
    xw = xh[:, :, j0] * (1.0 - ww) + xh[:, :, j1] * ww    # (B, 2H, 2W, C)
    return xw


# ---------------------------------------------------------------------------------
# Deterministic synthetic parameters (mirror the module's __init__ shapes)
# ---------------------------------------------------------------------------------
def _kaiming_conv(key, cin, cout):
    std = math.sqrt(2.0 / (9 * cout))  # kaiming_normal_(mode='fan_out', relu)
    return jax.random.normal(key, (3, 3, cin, cout), jnp.float32) * std


def _bn_fold(key, c):
    # Inference-mode BatchNorm folded to per-channel scale / bias.
    k1, k2, k3, k4 = jax.random.split(key, 4)
    gamma = 1.0 + 0.1 * jax.random.normal(k1, (c,), jnp.float32)
    beta = 0.1 * jax.random.normal(k2, (c,), jnp.float32)
    mean = 0.1 * jax.random.normal(k3, (c,), jnp.float32)
    var = 1.0 + 0.1 * jax.random.uniform(k4, (c,), jnp.float32)
    scale = gamma / jnp.sqrt(var + 1e-5)
    bias = beta - mean * scale
    return scale, bias


def make_params(key, in_channels, out_channels, bilinear=True):
    mid = in_channels // 2 if bilinear else out_channels
    kw1, kb1, kw2, kb2 = jax.random.split(key, 4)
    w1 = _kaiming_conv(kw1, in_channels, mid)
    s1, b1 = _bn_fold(kb1, mid)
    w2 = _kaiming_conv(kw2, mid, out_channels)
    s2, b2 = _bn_fold(kb2, out_channels)
    return {
        # fold BN scale into the weights, cast to bf16 for the MXU
        "w1": (w1 * s1).reshape(9, in_channels, mid).astype(jnp.bfloat16),
        "b1": b1[None, :],                       # (1, mid) f32
        "w2": (w2 * s2).reshape(9, mid, out_channels).astype(jnp.bfloat16),
        "b2": b2[None, :],                       # (1, out_channels) f32
    }


# ---------------------------------------------------------------------------------
# Up.forward(x1, x2)
# ---------------------------------------------------------------------------------
def up_forward(x1_nchw, x2_nchw, params):
    x1 = jnp.transpose(x1_nchw, (0, 2, 3, 1)).astype(jnp.float32)  # NCHW -> NHWC
    x2 = jnp.transpose(x2_nchw, (0, 2, 3, 1)).astype(jnp.float32)

    x1 = _upsample_bilinear_x2_align_corners(x1)
    dy = x2.shape[1] - x1.shape[1]
    dx = x2.shape[2] - x1.shape[2]
    x1 = jnp.pad(x1, ((0, 0),
                      (dy // 2, dy - dy // 2),
                      (dx // 2, dx - dx // 2),
                      (0, 0)))
    x = jnp.concatenate([x2, x1], axis=-1)          # cat([x2, x1], dim=channel)

    y = double_conv(x, params["w1"], params["b1"], params["w2"], params["b2"],
                    out_dtype=jnp.float32)
    return jnp.transpose(y, (0, 3, 1, 2))           # NHWC -> NCHW


# ---------------------------------------------------------------------------------
if __name__ == "__main__":
    key = jax.random.PRNGKey(0)
    kx1, kx2, kp = jax.random.split(key, 3)

    B = 2
    in_channels, out_channels = 64, 32              # Up(64, 32, bilinear=True), mid=32
    c_half = in_channels // 2
    H1 = W1 = 8                                     # x1: deep feature (gets upsampled x2)
    H2 = W2 = 16                                    # x2: skip connection

    x1 = jax.random.normal(kx1, (B, c_half, H1, W1), jnp.float32)
    x2 = jax.random.normal(kx2, (B, c_half, H2, W2), jnp.float32)
    params = make_params(kp, in_channels, out_channels, bilinear=True)

    fwd = jax.jit(up_forward)
    out = jax.block_until_ready(fwd(x1, x2, params))

    assert out.shape == (B, out_channels, H2, W2), out.shape
    assert bool(jnp.all(jnp.isfinite(out)))
    print("KERNEL_OK")
</pallas_src>

<mosaic_0001>
module attributes {stable_mosaic.version = 11 : i64} {
  func.func @_double_conv_kernel(%arg0: i32, %arg1: memref<1x342x64xbf16, #tpu.memory_space<vmem>>, %arg2: memref<9x64x32xbf16, #tpu.memory_space<vmem>>, %arg3: memref<1x32xf32, #tpu.memory_space<vmem>>, %arg4: memref<9x32x32xbf16, #tpu.memory_space<vmem>>, %arg5: memref<1x32xf32, #tpu.memory_space<vmem>>, %arg6: memref<288x1xf32, #tpu.memory_space<vmem>>, %arg7: memref<1x288x32xf32, #tpu.memory_space<vmem>>, %arg8: memref<342x32xbf16, #tpu.memory_space<vmem>>) attributes {dimension_semantics = [#tpu.dimension_semantics<parallel>], iteration_bounds = array<i64: 2>, scalar_prefetch = 0 : i64, scratch_operands = 1 : i64, tpu.core_type = #tpu.core_type<tc>, window_params = [{transform_indices = @transform_0, window_bounds = array<i64: 1, 342, 64>}, {pipeline_mode = #tpu.pipeline_mode<synchronous>, transform_indices = @transform_1, window_bounds = array<i64: 9, 64, 32>}, {pipeline_mode = #tpu.pipeline_mode<synchronous>, transform_indices = @transform_2, window_bounds = array<i64: 1, 32>}, {pipeline_mode = #tpu.pipeline_mode<synchronous>, transform_indices = @transform_3, window_bounds = array<i64: 9, 32, 32>}, {pipeline_mode = #tpu.pipeline_mode<synchronous>, transform_indices = @transform_4, window_bounds = array<i64: 1, 32>}, {pipeline_mode = #tpu.pipeline_mode<synchronous>, transform_indices = @transform_5, window_bounds = array<i64: 288, 1>}, {transform_indices = @transform_6, window_bounds = array<i64: 1, 288, 32>}]} {
    %c0 = arith.constant 0 : index
    %c0_0 = arith.constant 0 : index
    %c0_1 = arith.constant 0 : index
    %0 = vector.load %arg1[%c0, %c0_0, %c0_1] : memref<1x342x64xbf16, #tpu.memory_space<vmem>>, vector<1x288x64xbf16>
    %1 = vector.shape_cast %0 : vector<1x288x64xbf16> to vector<288x64xbf16>
    %c0_2 = arith.constant 0 : index
    %c0_3 = arith.constant 0 : index
    %c0_4 = arith.constant 0 : index
    %2 = vector.load %arg2[%c0_2, %c0_3, %c0_4] : memref<9x64x32xbf16, #tpu.memory_space<vmem>>, vector<1x64x32xbf16>
    %3 = vector.shape_cast %2 : vector<1x64x32xbf16> to vector<64x32xbf16>
    %cst = arith.constant dense<0.000000e+00> : vector<288x32xf32>
    %4 = tpu.matmul %1, %3, %cst {dimension_numbers = #tpu.dot_dimension_numbers<[1], [0], [0], [1], [0, 0, 1, 1], [], []>} : vector<288x64xbf16>, vector<64x32xbf16>, vector<288x32xf32> -> vector<288x32xf32>
    %c0_5 = arith.constant 0 : index
    %c1 = arith.constant 1 : index
    %c0_6 = arith.constant 0 : index
    %5 = vector.load %arg1[%c0_5, %c1, %c0_6] : memref<1x342x64xbf16, #tpu.memory_space<vmem>>, vector<1x288x64xbf16>
    %6 = vector.shape_cast %5 : vector<1x288x64xbf16> to vector<288x64xbf16>
    %c1_7 = arith.constant 1 : index
    %c0_8 = arith.constant 0 : index
    %c0_9 = arith.constant 0 : index
    %7 = vector.load %arg2[%c1_7, %c0_8, %c0_9] : memref<9x64x32xbf16, #tpu.memory_space<vmem>>, vector<1x64x32xbf16>
    %8 = vector.shape_cast %7 : vector<1x64x32xbf16> to vector<64x32xbf16>
    %cst_10 = arith.constant dense<0.000000e+00> : vector<288x32xf32>
    %9 = tpu.matmul %6, %8, %cst_10 {dimension_numbers = #tpu.dot_dimension_numbers<[1], [0], [0], [1], [0, 0, 1, 1], [], []>} : vector<288x64xbf16>, vector<64x32xbf16>, vector<288x32xf32> -> vector<288x32xf32>
    %10 = arith.addf %4, %9 : vector<288x32xf32>
    %c0_11 = arith.constant 0 : index
    %c2 = arith.constant 2 : index
    %c0_12 = arith.constant 0 : index
    %11 = vector.load %arg1[%c0_11, %c2, %c0_12] : memref<1x342x64xbf16, #tpu.memory_space<vmem>>, vector<1x288x64xbf16>
    %12 = vector.shape_cast %11 : vector<1x288x64xbf16> to vector<288x64xbf16>
    %c2_13 = arith.constant 2 : index
    %c0_14 = arith.constant 0 : index
    %c0_15 = arith.constant 0 : index
    %13 = vector.load %arg2[%c2_13, %c0_14, %c0_15] : memref<9x64x32xbf16, #tpu.memory_space<vmem>>, vector<1x64x32xbf16>
    %14 = vector.shape_cast %13 : vector<1x64x32xbf16> to vector<64x32xbf16>
    %cst_16 = arith.constant dense<0.000000e+00> : vector<288x32xf32>
    %15 = tpu.matmul %12, %14, %cst_16 {dimension_numbers = #tpu.dot_dimension_numbers<[1], [0], [0], [1], [0, 0, 1, 1], [], []>} : vector<288x64xbf16>, vector<64x32xbf16>, vector<288x32xf32> -> vector<288x32xf32>
    %16 = arith.addf %10, %15 : vector<288x32xf32>
    %c0_17 = arith.constant 0 : index
    %c18 = arith.constant 18 : index
    %c0_18 = arith.constant 0 : index
    %17 = vector.load %arg1[%c0_17, %c18, %c0_18] : memref<1x342x64xbf16, #tpu.memory_space<vmem>>, vector<1x288x64xbf16>
    %18 = vector.shape_cast %17 : vector<1x288x64xbf16> to vector<288x64xbf16>
    %c3 = arith.constant 3 : index
    %c0_19 = arith.constant 0 : index
    %c0_20 = arith.constant 0 : index
    %19 = vector.load %arg2[%c3, %c0_19, %c0_20] : memref<9x64x32xbf16, #tpu.memory_space<vmem>>, vector<1x64x32xbf16>
    %20 = vector.shape_cast %19 : vector<1x64x32xbf16> to vector<64x32xbf16>
    %cst_21 = arith.constant dense<0.000000e+00> : vector<288x32xf32>
    %21 = tpu.matmul %18, %20, %cst_21 {dimension_numbers = #tpu.dot_dimension_numbers<[1], [0], [0], [1], [0, 0, 1, 1], [], []>} : vector<288x64xbf16>, vector<64x32xbf16>, vector<288x32xf32> -> vector<288x32xf32>
    %22 = arith.addf %16, %21 : vector<288x32xf32>
    %c0_22 = arith.constant 0 : index
    %c19 = arith.constant 19 : index
    %c0_23 = arith.constant 0 : index
    %23 = vector.load %arg1[%c0_22, %c19, %c0_23] : memref<1x342x64xbf16, #tpu.memory_space<vmem>>, vector<1x288x64xbf16>
    %24 = vector.shape_cast %23 : vector<1x288x64xbf16> to vector<288x64xbf16>
    %c4 = arith.constant 4 : index
    %c0_24 = arith.constant 0 : index
    %c0_25 = arith.constant 0 : index
    %25 = vector.load %arg2[%c4, %c0_24, %c0_25] : memref<9x64x32xbf16, #tpu.memory_space<vmem>>, vector<1x64x32xbf16>
    %26 = vector.shape_cast %25 : vector<1x64x32xbf16> to vector<64x32xbf16>
    %cst_26 = arith.constant dense<0.000000e+00> : vector<288x32xf32>
    %27 = tpu.matmul %24, %26, %cst_26 {dimension_numbers = #tpu.dot_dimension_numbers<[1], [0], [0], [1], [0, 0, 1, 1], [], []>} : vector<288x64xbf16>, vector<64x32xbf16>, vector<288x32xf32> -> vector<288x32xf32>
    %28 = arith.addf %22, %27 : vector<288x32xf32>
    %c0_27 = arith.constant 0 : index
    %c20 = arith.constant 20 : index
    %c0_28 = arith.constant 0 : index
    %29 = vector.load %arg1[%c0_27, %c20, %c0_28] : memref<1x342x64xbf16, #tpu.memory_space<vmem>>, vector<1x288x64xbf16>
    %30 = vector.shape_cast %29 : vector<1x288x64xbf16> to vector<288x64xbf16>
    %c5 = arith.constant 5 : index
    %c0_29 = arith.constant 0 : index
    %c0_30 = arith.constant 0 : index
    %31 = vector.load %arg2[%c5, %c0_29, %c0_30] : memref<9x64x32xbf16, #tpu.memory_space<vmem>>, vector<1x64x32xbf16>
    %32 = vector.shape_cast %31 : vector<1x64x32xbf16> to vector<64x32xbf16>
    %cst_31 = arith.constant dense<0.000000e+00> : vector<288x32xf32>
    %33 = tpu.matmul %30, %32, %cst_31 {dimension_numbers = #tpu.dot_dimension_numbers<[1], [0], [0], [1], [0, 0, 1, 1], [], []>} : vector<288x64xbf16>, vector<64x32xbf16>, vector<288x32xf32> -> vector<288x32xf32>
    %34 = arith.addf %28, %33 : vector<288x32xf32>
    %c0_32 = arith.constant 0 : index
    %c36 = arith.constant 36 : index
    %c0_33 = arith.constant 0 : index
    %35 = vector.load %arg1[%c0_32, %c36, %c0_33] : memref<1x342x64xbf16, #tpu.memory_space<vmem>>, vector<1x288x64xbf16>
    %36 = vector.shape_cast %35 : vector<1x288x64xbf16> to vector<288x64xbf16>
    %c6 = arith.constant 6 : index
    %c0_34 = arith.constant 0 : index
    %c0_35 = arith.constant 0 : index
    %37 = vector.load %arg2[%c6, %c0_34, %c0_35] : memref<9x64x32xbf16, #tpu.memory_space<vmem>>, vector<1x64x32xbf16>
    %38 = vector.shape_cast %37 : vector<1x64x32xbf16> to vector<64x32xbf16>
    %cst_36 = arith.constant dense<0.000000e+00> : vector<288x32xf32>
    %39 = tpu.matmul %36, %38, %cst_36 {dimension_numbers = #tpu.dot_dimension_numbers<[1], [0], [0], [1], [0, 0, 1, 1], [], []>} : vector<288x64xbf16>, vector<64x32xbf16>, vector<288x32xf32> -> vector<288x32xf32>
    %40 = arith.addf %34, %39 : vector<288x32xf32>
    %c0_37 = arith.constant 0 : index
    %c37 = arith.constant 37 : index
    %c0_38 = arith.constant 0 : index
    %41 = vector.load %arg1[%c0_37, %c37, %c0_38] : memref<1x342x64xbf16, #tpu.memory_space<vmem>>, vector<1x288x64xbf16>
    %42 = vector.shape_cast %41 : vector<1x288x64xbf16> to vector<288x64xbf16>
    %c7 = arith.constant 7 : index
    %c0_39 = arith.constant 0 : index
    %c0_40 = arith.constant 0 : index
    %43 = vector.load %arg2[%c7, %c0_39, %c0_40] : memref<9x64x32xbf16, #tpu.memory_space<vmem>>, vector<1x64x32xbf16>
    %44 = vector.shape_cast %43 : vector<1x64x32xbf16> to vector<64x32xbf16>
    %cst_41 = arith.constant dense<0.000000e+00> : vector<288x32xf32>
    %45 = tpu.matmul %42, %44, %cst_41 {dimension_numbers = #tpu.dot_dimension_numbers<[1], [0], [0], [1], [0, 0, 1, 1], [], []>} : vector<288x64xbf16>, vector<64x32xbf16>, vector<288x32xf32> -> vector<288x32xf32>
    %46 = arith.addf %40, %45 : vector<288x32xf32>
    %c0_42 = arith.constant 0 : index
    %c38 = arith.constant 38 : index
    %c0_43 = arith.constant 0 : index
    %47 = vector.load %arg1[%c0_42, %c38, %c0_43] : memref<1x342x64xbf16, #tpu.memory_space<vmem>>, vector<1x288x64xbf16>
    %48 = vector.shape_cast %47 : vector<1x288x64xbf16> to vector<288x64xbf16>
    %c8 = arith.constant 8 : index
    %c0_44 = arith.constant 0 : index
    %c0_45 = arith.constant 0 : index
    %49 = vector.load %arg2[%c8, %c0_44, %c0_45] : memref<9x64x32xbf16, #tpu.memory_space<vmem>>, vector<1x64x32xbf16>
    %50 = vector.shape_cast %49 : vector<1x64x32xbf16> to vector<64x32xbf16>
    %cst_46 = arith.constant dense<0.000000e+00> : vector<288x32xf32>
    %51 = tpu.matmul %48, %50, %cst_46 {dimension_numbers = #tpu.dot_dimension_numbers<[1], [0], [0], [1], [0, 0, 1, 1], [], []>} : vector<288x64xbf16>, vector<64x32xbf16>, vector<288x32xf32> -> vector<288x32xf32>
    %52 = arith.addf %46, %51 : vector<288x32xf32>
    %c0_47 = arith.constant 0 : index
    %c0_48 = arith.constant 0 : index
    %53 = vector.load %arg3[%c0_47, %c0_48] : memref<1x32xf32, #tpu.memory_space<vmem>>, vector<1x32xf32>
    %54 = vector.broadcast %53 : vector<1x32xf32> to vector<288x32xf32>
    %55 = arith.addf %52, %54 : vector<288x32xf32>
    %cst_49 = arith.constant 0.000000e+00 : f32
    %56 = vector.broadcast %cst_49 : f32 to vector<288x32xf32>
    %57 = arith.maximumf %55, %56 : vector<288x32xf32>
    %c0_50 = arith.constant 0 : index
    %c0_51 = arith.constant 0 : index
    %58 = vector.load %arg6[%c0_50, %c0_51] : memref<288x1xf32, #tpu.memory_space<vmem>>, vector<288x1xf32>
    %59 = vector.broadcast %58 : vector<288x1xf32> to vector<288x32xf32>
    %60 = arith.mulf %57, %59 : vector<288x32xf32>
    %cst_52 = arith.constant 0.000000e+00 : bf16
    %61 = vector.broadcast %cst_52 : bf16 to vector<19x32xbf16>
    %c0_53 = arith.constant 0 : index
    %c0_54 = arith.constant 0 : index
    %62 = vector.load %arg8[%c0_53, %c0_54] : memref<342x32xbf16, #tpu.memory_space<vmem>>, vector<19x32xbf16>
    tpu.vector_store %arg8[%c0_53, %c0_54], %61 {strides = array<i32>} : memref<342x32xbf16, #tpu.memory_space<vmem>>, vector<19x32xbf16>,
    %cst_55 = arith.constant 0.000000e+00 : bf16
    %63 = vector.broadcast %cst_55 : bf16 to vector<35x32xbf16>
    %c307 = arith.constant 307 : index
    %c0_56 = arith.constant 0 : index
    %64 = vector.load %arg8[%c307, %c0_56] : memref<342x32xbf16, #tpu.memory_space<vmem>>, vector<35x32xbf16>
    tpu.vector_store %arg8[%c307, %c0_56], %63 {strides = array<i32>} : memref<342x32xbf16, #tpu.memory_space<vmem>>, vector<35x32xbf16>,
    %65 = arith.truncf %60 : vector<288x32xf32> to vector<288x32xbf16>
    %c19_57 = arith.constant 19 : index
    %c0_58 = arith.constant 0 : index
    %66 = vector.load %arg8[%c19_57, %c0_58] : memref<342x32xbf16, #tpu.memory_space<vmem>>, vector<288x32xbf16>
    tpu.vector_store %arg8[%c19_57, %c0_58], %65 {strides = array<i32>} : memref<342x32xbf16, #tpu.memory_space<vmem>>, vector<288x32xbf16>,
    %c0_59 = arith.constant 0 : index
    %c0_60 = arith.constant 0 : index
    %67 = vector.load %arg8[%c0_59, %c0_60] : memref<342x32xbf16, #tpu.memory_space<vmem>>, vector<288x32xbf16>
    %c0_61 = arith.constant 0 : index
    %c0_62 = arith.constant 0 : index
    %c0_63 = arith.constant 0 : index
    %68 = vector.load %arg4[%c0_61, %c0_62, %c0_63] : memref<9x32x32xbf16, #tpu.memory_space<vmem>>, vector<1x32x32xbf16>
    %69 = vector.shape_cast %68 : vector<1x32x32xbf16> to vector<32x32xbf16>
    %cst_64 = arith.constant dense<0.000000e+00> : vector<288x32xf32>
    %70 = tpu.matmul %67, %69, %cst_64 {dimension_numbers = #tpu.dot_dimension_numbers<[1], [0], [0], [1], [0, 0, 1, 1], [], []>} : vector<288x32xbf16>, vector<32x32xbf16>, vector<288x32xf32> -> vector<288x32xf32>
    %c1_65 = arith.constant 1 : index
    %c0_66 = arith.constant 0 : index
    %71 = vector.load %arg8[%c1_65, %c0_66] : memref<342x32xbf16, #tpu.memory_space<vmem>>, vector<288x32xbf16>
    %c1_67 = arith.constant 1 : index
    %c0_68 = arith.constant 0 : index
    %c0_69 = arith.constant 0 : index
    %72 = vector.load %arg4[%c1_67, %c0_68, %c0_69] : memref<9x32x32xbf16, #tpu.memory_space<vmem>>, vector<1x32x32xbf16>
    %73 = vector.shape_cast %72 : vector<1x32x32xbf16> to vector<32x32xbf16>
    %cst_70 = arith.constant dense<0.000000e+00> : vector<288x32xf32>
    %74 = tpu.matmul %71, %73, %cst_70 {dimension_numbers = #tpu.dot_dimension_numbers<[1], [0], [0], [1], [0, 0, 1, 1], [], []>} : vector<288x32xbf16>, vector<32x32xbf16>, vector<288x32xf32> -> vector<288x32xf32>
    %75 = arith.addf %70, %74 : vector<288x32xf32>
    %c2_71 = arith.constant 2 : index
    %c0_72 = arith.constant 0 : index
    %76 = vector.load %arg8[%c2_71, %c0_72] : memref<342x32xbf16, #tpu.memory_space<vmem>>, vector<288x32xbf16>
    %c2_73 = arith.constant 2 : index
    %c0_74 = arith.constant 0 : index
    %c0_75 = arith.constant 0 : index
    %77 = vector.load %arg4[%c2_73, %c0_74, %c0_75] : memref<9x32x32xbf16, #tpu.memory_space<vmem>>, vector<1x32x32xbf16>
    %78 = vector.shape_cast %77 : vector<1x32x32xbf16> to vector<32x32xbf16>
    %cst_76 = arith.constant dense<0.000000e+00> : vector<288x32xf32>
    %79 = tpu.matmul %76, %78, %cst_76 {dimension_numbers = #tpu.dot_dimension_numbers<[1], [0], [0], [1], [0, 0, 1, 1], [], []>} : vector<288x32xbf16>, vector<32x32xbf16>, vector<288x32xf32> -> vector<288x32xf32>
    %80 = arith.addf %75, %79 : vector<288x32xf32>
    %c18_77 = arith.constant 18 : index
    %c0_78 = arith.constant 0 : index
    %81 = vector.load %arg8[%c18_77, %c0_78] : memref<342x32xbf16, #tpu.memory_space<vmem>>, vector<288x32xbf16>
    %c3_79 = arith.constant 3 : index
    %c0_80 = arith.constant 0 : index
    %c0_81 = arith.constant 0 : index
    %82 = vector.load %arg4[%c3_79, %c0_80, %c0_81] : memref<9x32x32xbf16, #tpu.memory_space<vmem>>, vector<1x32x32xbf16>
    %83 = vector.shape_cast %82 : vector<1x32x32xbf16> to vector<32x32xbf16>
    %cst_82 = arith.constant dense<0.000000e+00> : vector<288x32xf32>
    %84 = tpu.matmul %81, %83, %cst_82 {dimension_numbers = #tpu.dot_dimension_numbers<[1], [0], [0], [1], [0, 0, 1, 1], [], []>} : vector<288x32xbf16>, vector<32x32xbf16>, vector<288x32xf32> -> vector<288x32xf32>
    %85 = arith.addf %80, %84 : vector<288x32xf32>
    %c19_83 = arith.constant 19 : index
    %c0_84 = arith.constant 0 : index
    %86 = vector.load %arg8[%c19_83, %c0_84] : memref<342x32xbf16, #tpu.memory_space<vmem>>, vector<288x32xbf16>
    %c4_85 = arith.constant 4 : index
    %c0_86 = arith.constant 0 : index
    %c0_87 = arith.constant 0 : index
    %87 = vector.load %arg4[%c4_85, %c0_86, %c0_87] : memref<9x32x32xbf16, #tpu.memory_space<vmem>>, vector<1x32x32xbf16>
    %88 = vector.shape_cast %87 : vector<1x32x32xbf16> to vector<32x32xbf16>
    %cst_88 = arith.constant dense<0.000000e+00> : vector<288x32xf32>
    %89 = tpu.matmul %86, %88, %cst_88 {dimension_numbers = #tpu.dot_dimension_numbers<[1], [0], [0], [1], [0, 0, 1, 1], [], []>} : vector<288x32xbf16>, vector<32x32xbf16>, vector<288x32xf32> -> vector<288x32xf32>
    %90 = arith.addf %85, %89 : vector<288x32xf32>
    %c20_89 = arith.constant 20 : index
    %c0_90 = arith.constant 0 : index
    %91 = vector.load %arg8[%c20_89, %c0_90] : memref<342x32xbf16, #tpu.memory_space<vmem>>, vector<288x32xbf16>
    %c5_91 = arith.constant 5 : index
    %c0_92 = arith.constant 0 : index
    %c0_93 = arith.constant 0 : index
    %92 = vector.load %arg4[%c5_91, %c0_92, %c0_93] : memref<9x32x32xbf16, #tpu.memory_space<vmem>>, vector<1x32x32xbf16>
    %93 = vector.shape_cast %92 : vector<1x32x32xbf16> to vector<32x32xbf16>
    %cst_94 = arith.constant dense<0.000000e+00> : vector<288x32xf32>
    %94 = tpu.matmul %91, %93, %cst_94 {dimension_numbers = #tpu.dot_dimension_numbers<[1], [0], [0], [1], [0, 0, 1, 1], [], []>} : vector<288x32xbf16>, vector<32x32xbf16>, vector<288x32xf32> -> vector<288x32xf32>
    %95 = arith.addf %90, %94 : vector<288x32xf32>
    %c36_95 = arith.constant 36 : index
    %c0_96 = arith.constant 0 : index
    %96 = vector.load %arg8[%c36_95, %c0_96] : memref<342x32xbf16, #tpu.memory_space<vmem>>, vector<288x32xbf16>
    %c6_97 = arith.constant 6 : index
    %c0_98 = arith.constant 0 : index
    %c0_99 = arith.constant 0 : index
    %97 = vector.load %arg4[%c6_97, %c0_98, %c0_99] : memref<9x32x32xbf16, #tpu.memory_space<vmem>>, vector<1x32x32xbf16>
    %98 = vector.shape_cast %97 : vector<1x32x32xbf16> to vector<32x32xbf16>
    %cst_100 = arith.constant dense<0.000000e+00> : vector<288x32xf32>
    %99 = tpu.matmul %96, %98, %cst_100 {dimension_numbers = #tpu.dot_dimension_numbers<[1], [0], [0], [1], [0, 0, 1, 1], [], []>} : vector<288x32xbf16>, vector<32x32xbf16>, vector<288x32xf32> -> vector<288x32xf32>
    %100 = arith.addf %95, %99 : vector<288x32xf32>
    %c37_101 = arith.constant 37 : index
    %c0_102 = arith.constant 0 : index
    %101 = vector.load %arg8[%c37_101, %c0_102] : memref<342x32xbf16, #tpu.memory_space<vmem>>, vector<288x32xbf16>
    %c7_103 = arith.constant 7 : index
    %c0_104 = arith.constant 0 : index
    %c0_105 = arith.constant 0 : index
    %102 = vector.load %arg4[%c7_103, %c0_104, %c0_105] : memref<9x32x32xbf16, #tpu.memory_space<vmem>>, vector<1x32x32xbf16>
    %103 = vector.shape_cast %102 : vector<1x32x32xbf16> to vector<32x32xbf16>
    %cst_106 = arith.constant dense<0.000000e+00> : vector<288x32xf32>
    %104 = tpu.matmul %101, %103, %cst_106 {dimension_numbers = #tpu.dot_dimension_numbers<[1], [0], [0], [1], [0, 0, 1, 1], [], []>} : vector<288x32xbf16>, vector<32x32xbf16>, vector<288x32xf32> -> vector<288x32xf32>
    %105 = arith.addf %100, %104 : vector<288x32xf32>
    %c38_107 = arith.constant 38 : index
    %c0_108 = arith.constant 0 : index
    %106 = vector.load %arg8[%c38_107, %c0_108] : memref<342x32xbf16, #tpu.memory_space<vmem>>, vector<288x32xbf16>
    %c8_109 = arith.constant 8 : index
    %c0_110 = arith.constant 0 : index
    %c0_111 = arith.constant 0 : index
    %107 = vector.load %arg4[%c8_109, %c0_110, %c0_111] : memref<9x32x32xbf16, #tpu.memory_space<vmem>>, vector<1x32x32xbf16>
    %108 = vector.shape_cast %107 : vector<1x32x32xbf16> to vector<32x32xbf16>
    %cst_112 = arith.constant dense<0.000000e+00> : vector<288x32xf32>
    %109 = tpu.matmul %106, %108, %cst_112 {dimension_numbers = #tpu.dot_dimension_numbers<[1], [0], [0], [1], [0, 0, 1, 1], [], []>} : vector<288x32xbf16>, vector<32x32xbf16>, vector<288x32xf32> -> vector<288x32xf32>
    %110 = arith.addf %105, %109 : vector<288x32xf32>
    %c0_113 = arith.constant 0 : index
    %c0_114 = arith.constant 0 : index
    %111 = vector.load %arg5[%c0_113, %c0_114] : memref<1x32xf32, #tpu.memory_space<vmem>>, vector<1x32xf32>
    %112 = vector.broadcast %111 : vector<1x32xf32> to vector<288x32xf32>
    %113 = arith.addf %110, %112 : vector<288x32xf32>
    %cst_115 = arith.constant 0.000000e+00 : f32
    %114 = vector.broadcast %cst_115 : f32 to vector<288x32xf32>
    %115 = arith.maximumf %113, %114 : vector<288x32xf32>
    %c0_116 = arith.constant 0 : index
    %c0_117 = arith.constant 0 : index
    %c0_118 = arith.constant 0 : index
    %116 = vector.load %arg7[%c0_116, %c0_117, %c0_118] : memref<1x288x32xf32, #tpu.memory_space<vmem>>, vector<1x288x32xf32>
    %117 = vector.shape_cast %116 : vector<1x288x32xf32> to vector<288x32xf32>
    %118 = vector.shape_cast %115 : vector<288x32xf32> to vector<1x288x32xf32>
    tpu.vector_store %arg7[%c0_116, %c0_117, %c0_118], %118 {strides = array<i32>} : memref<1x288x32xf32, #tpu.memory_space<vmem>>, vector<1x288x32xf32>,
    return
  }
  func.func @transform_0(%arg0: i32) -> (i32, i32, i32) {
    %c0_i32 = arith.constant 0 : i32
    %c0_i32_0 = arith.constant 0 : i32
    %c0_i32_1 = arith.constant 0 : i32
    return %arg0, %c0_i32, %c0_i32_0 : i32, i32, i32
  }
  func.func @transform_1(%arg0: i32) -> (i32, i32, i32) {
    %c0_i32 = arith.constant 0 : i32
    %c0_i32_0 = arith.constant 0 : i32
    %c0_i32_1 = arith.constant 0 : i32
    %c0_i32_2 = arith.constant 0 : i32
    return %c0_i32, %c0_i32_0, %c0_i32_1 : i32, i32, i32
  }
  func.func @transform_2(%arg0: i32) -> (i32, i32) {
    %c0_i32 = arith.constant 0 : i32
    %c0_i32_0 = arith.constant 0 : i32
    %c0_i32_1 = arith.constant 0 : i32
    return %c0_i32, %c0_i32_0 : i32, i32
  }
  func.func @transform_3(%arg0: i32) -> (i32, i32, i32) {
    %c0_i32 = arith.constant 0 : i32
    %c0_i32_0 = arith.constant 0 : i32
    %c0_i32_1 = arith.constant 0 : i32
    %c0_i32_2 = arith.constant 0 : i32
    return %c0_i32, %c0_i32_0, %c0_i32_1 : i32, i32, i32
  }
  func.func @transform_4(%arg0: i32) -> (i32, i32) {
    %c0_i32 = arith.constant 0 : i32
    %c0_i32_0 = arith.constant 0 : i32
    %c0_i32_1 = arith.constant 0 : i32
    return %c0_i32, %c0_i32_0 : i32, i32
  }
  func.func @transform_5(%arg0: i32) -> (i32, i32) {
    %c0_i32 = arith.constant 0 : i32
    %c0_i32_0 = arith.constant 0 : i32
    %c0_i32_1 = arith.constant 0 : i32
    return %c0_i32, %c0_i32_0 : i32, i32
  }
  func.func @transform_6(%arg0: i32) -> (i32, i32, i32) {
    %c0_i32 = arith.constant 0 : i32
    %c0_i32_0 = arith.constant 0 : i32
    %c0_i32_1 = arith.constant 0 : i32
    return %arg0, %c0_i32, %c0_i32_0 : i32, i32, i32
  }
}

</mosaic_0001>

<bundles_post_ra>
// kernel: up_forward.1
= control target key start
LH: loop header
LB: loop body
LE: loop exit
PB: predicated region body
PF: predicated region fallthrough
CT: control target
= control target key end

     0   :  { %s8415_s21 = smov 0   ;;  %s11412_s0 = inlined_call_operand.vmem [shape: bf16[2,342,64], index: 0, kind: input, shape index: {}]   ;;  %s11413_s1 = inlined_call_operand.vmem [shape: bf16[9,64,32], index: 1, kind: input, shape index: {}]   ;;  %s11414_s2 = inlined_call_operand.vmem [shape: f32[1,32], index: 2, kind: input, shape index: {}]   ;;  %s11415_s3 = inlined_call_operand.vmem [shape: bf16[9,32,32], index: 3, kind: input, shape index: {}]   ;;  %s11416_s4 = inlined_call_operand.vmem [shape: f32[1,32], index: 4, kind: input, shape index: {}]   ;;  %s11417_s5 = inlined_call_operand.vmem [shape: f32[288,1], index: 5, kind: input, shape index: {}]   ;;  %s11418_s6 = inlined_call_operand.vmem [shape: f32[2,288,32], index: 6, kind: output, shape index: {}]  }
   0x1 LB: > { %s7087_s22 = sadd.s32 4294967295, %s8377_s21   ;;  %p7091_p0 = scmp.ge.s32.totalorder %s8377_s21, 1  ;;  %s8377_s21 = sphi %s8415_s21, %s16_s21  }
   0x2   : > { %p212_p1 = scmp.lt.s32.totalorder %s8377_s21, 3 }
   0x4   : > { %p213_p2 = pnand %p7091_p0, %p212_p1 }
   0x6   : > { %216 = sbr.rel (%p213_p2) target bundleno = 1625 (0x659), region = 44 }
   0xb   : > { %v8164_v0 = vld [vmem:[%s11413_s1 + $0x38] sm:$0xff]  ;;  %p242_p3 = scmp.lt.s32.totalorder %s7087_s22, 1  ;;  %v8163_v2 = vld [vmem:[%s11413_s1 + $0x30] sm:$0xff]  ;;  %v8162_v4 = vld [vmem:[%s11413_s1 + $0x28] sm:$0xff]  ;;  %vm400_vm0 = vsmask.f32 7424 }
   0xc   : > { %v8160_v1 = vld [vmem:[%s11413_s1 + $0x18] sm:$0xff]  ;;  %632 = vmatpush.bf16.msra.mxu0 %v8164_v0  ;;  %8310 = vmatpush.bf16.msra.mxu2 %v8164_v0  ;;  %v8159_v3 = vld [vmem:[%s11413_s1 + $0x10] sm:$0xff]  ;;  %v8158_v5 = vld [vmem:[%s11413_s1 + $0x8] sm:$0xff]  ;;  %vm573_vm1 = vcmask 523264   ;;  %vm899_vm2 = vcmask 1046528   ;;  %vm1949_vm4 = vcmask 1045504  }
   0xd   : > { %s11696_s22 = smov (!%p242_p3, %s7087_s22), 1  ;;  %8314 = vmatpush.bf16.msra.mxu3 %v8160_v1  ;;  %791 = vmatpush.bf16.msra.mxu1 %v8160_v1  ;;  %v8161_v15 = vld [vmem:[%s11413_s1 + $0x20] sm:$0xff]  ;;  %v8168_v23 = vld [vmem:[%s11413_s1 + $0x58] sm:$0xff]  ;;  %v8167_v31 = vld [vmem:[%s11413_s1 + $0x50] sm:$0xff]  ;;  %vm1552_vm3 = vsmask.f32 6400 }
   0xe   : > { %s8318_s7 = smul.u32 172, %s11696_s22  ;;  %v8157_v18 = vld [vmem:[%s11413_s1] sm:$0xff]  ;;  %v8189_v24 = vld [vmem:[%s11413_s1 + $0x78] sm:$0xff]  ;;  %v8188_v32 = vld [vmem:[%s11413_s1 + $0x70] sm:$0xff]  ;;  %vm3578_vm5 = vcmask 257024   ;;  %vm2999_vm6 = vcmask 1044480  }
   0xf   : > { %v8193_v28 = vld [vmem:[%s11413_s1 + $0x98] sm:$0xff]  ;;  %v8192_v33 = vld [vmem:[%s11413_s1 + $0x90] sm:$0xff]  ;;  %v8166_v58 = vld [vmem:[%s11413_s1 + $0x48] sm:$0xff]  ;;  %vm2602_vm7 = vsmask.f32 5376  ;;  %vm3581_vm8 = vcmask 254976  }
  0x10   : > { %633 = vmatpush.bf16.msra.mxu0 %v8163_v2  ;;  %8311 = vmatpush.bf16.msra.mxu2 %v8163_v2  ;;  %s8447_s14 = scalar_lea.vmem %s11412_s0, %s8318_s7  ;;  %v8187_v59 = vld [vmem:[%s11413_s1 + $0x68] sm:$0xff]  ;;  %vm3582_vm9 = vsmask.f32 1280  ;;  %vm3587_vm10 = vcmask 257025   ;;  %vm3588_vm12 = vsmask.f32 7942 }
  0x11   : > { %8315 = vmatpush.bf16.msra.mxu3 %v8159_v3  ;;  %792 = vmatpush.bf16.msra.mxu1 %v8159_v3  ;;  %v8297_v6 = vld [vmem:[%s8447_s14] sm:$0xff]   ;;  %v8451_v7 = vld [vmem:[%s8447_s14 + $0x8] sm:$0xff]  ;;  %v8457_v11 = vld [vmem:[%s8447_s14 + $0x50] sm:$0xff]  ;;  %vm3634_vm14 = vsmask.f32 5392  ;;  %s8319_s23 = smul.u32 288, %s11696_s22 }
  0x12   : > { %v8454_v8 = vld [vmem:[%s8447_s14 + $0x48] sm:$0xff]  ;;  %v402_v9 = vshrl.u32 %v8297_v6, 16  ;;  %v404_v10 = vshll.u32 %v8297_v6, 16  ;;  %v409_v12 = vshll.u32 %v8451_v7, 16  ;;  %v481_v17 = vshll.u32 %v8457_v11, 16  ;;  %v8486_v29 = vld [vmem:[%s8447_s14 + $0x10] sm:$0xff]  ;;  %vm9384_vm11 = vmand %vm3581_vm8, %vm3582_vm9 }
  0x13   : > { %v473_v13 = vshll.u32 %v8454_v8, 16  ;;  %v477_v14 = vshrl.u32 %v8454_v8, 16  ;;  %v8492_v30 = vld [vmem:[%s8447_s14 + $0x58] sm:$0xff]  ;;  %v413_v34 = vshrl.u32 %v8451_v7, 16  ;;  %v417_v35 = vshll.u32 %v8486_v29, 16  ;;  %v8151_v45 = vld [vmem:[%s8447_s14 + $0x60] sm:$0xff]  ;;  %vm9394_vm13 = vmand %vm3587_vm10, %vm3588_vm12  ;;  %s11247_s26 = scalar_lea.vmem %s11418_s6, %s8319_s23 }
  0x14   : > { %634 = vmatpush.bf16.msra.mxu0 %v8162_v4  ;;  %8312 = vmatpush.bf16.msra.mxu2 %v8162_v4  ;;  %v406_v16 = vrot.slane %v404_v10, 1  ;;  %v411_v19 = vrot.slane %v409_v12, 1  ;;  %v483_v22 = vrot.slane %v481_v17, 1  ;;  %v485_v36 = vshrl.u32 %v8457_v11, 16  ;;  %v8516_v44 = vld [vmem:[%s8447_s14 + $0x18] sm:$0xff]  ;;  %v8527_v56 = vld [vmem:[%s8447_s14 + $0x20] sm:$0xff]  ;;  %vm9470_vm15 = vmor %vm3582_vm9, %vm3634_vm14 }
  0x15   : > { %8316 = vmatpush.bf16.msra.mxu3 %v8158_v5  ;;  %793 = vmatpush.bf16.msra.mxu1 %v8158_v5  ;;  %v8469_v20 = vrot.slane %v473_v13, 1  ;;  %v489_v37 = vshll.u32 %v8492_v30, 16  ;;  %v419_v39 = vrot.slane %v417_v35, 1  ;;  %v421_v46 = vshrl.u32 %v8486_v29, 16  ;;  %v8152_v57 = vld [vmem:[%s8447_s14 + $0x68] sm:$0xff] }
  0x16   : > { %v407_v21 = vor.u32 %v406_v16, %v402_v9  ;;  %v415_v38 = vor.u32 %v413_v34, %v411_v19  ;;  %v487_v40 = vor.u32 %v485_v36, %v483_v22  ;;  %v425_v47 = vshll.u32 %v8516_v44, 16  ;;  %v8153_v9 = vld [vmem:[%s8447_s14 + $0x70] sm:$0xff]  ;;  %v8191_v10 = vld [vmem:[%s11413_s1 + $0x88] sm:$0xff] }
  0x17   : > { %v479_v25 = vor.u32 %v477_v14, %v8469_v20  ;;  %v491_v41 = vrot.slane %v489_v37, 1  ;;  %v493_v48 = vshrl.u32 %v8492_v30, 16  ;;  %v497_v49 = vshll.u32 %v8151_v45, 16 }
  0x18   : > { %635 = vmatpush.bf16.msra.mxu0 %v8161_v15  ;;  %8313 = vmatpush.bf16.msra.mxu2 %v8161_v15  ;;  %v412_v26 = vsel %vm400_vm0, %v407_v21, %v411_v19  ;;  %v420_v42 = vsel %vm400_vm0, %v415_v38, %v419_v39  ;;  %v423_v50 = vor.u32 %v421_v46, %v419_v39  ;;  %v427_v51 = vrot.slane %v425_v47, 1  ;;  %v8585_v39 = vld [vmem:[%s8447_s14 + $0x38] sm:$0xff] }
  0x19   : > { %8317 = vmatpush.bf16.msra.mxu3 %v8157_v18  ;;  %794 = vmatpush.bf16.msra.mxu1 %v8157_v18  ;;  %v484_v27 = vsel %vm400_vm0, %v479_v25, %v483_v22  ;;  %v492_v43 = vsel %vm400_vm0, %v487_v40, %v491_v41  ;;  %v495_v52 = vor.u32 %v493_v48, %v491_v41  ;;  %v499_v53 = vrot.slane %v497_v49, 1  ;;  %v8165_v25 = vld [vmem:[%s11413_s1 + $0x40] sm:$0xff] }
  0x1a   : > { %v428_v54 = vsel %vm400_vm0, %v423_v50, %v427_v51  ;;  %v429_v60 = vshrl.u32 %v8516_v44, 16  ;;  %v433_v61 = vshll.u32 %v8527_v56, 16  ;;  %v501_v62 = vshrl.u32 %v8151_v45, 16  ;;  %v8155_v40 = vld [vmem:[%s8447_s14 + $0x80] sm:$0xff] }
  0x1b   : > { %7186 = vmatmul.msk.bf16.vlgmr.msra.gmra.mxu0 %vm573_vm1, %v412_v26  ;;  %7195 = vmatmul.msk.bf16.vlgmr.msra.gmra.mxu2 %vm573_vm1, %v484_v27  ;;  %v500_v55 = vsel %vm400_vm0, %v495_v52, %v499_v53  ;;  %v505_v63 = vshll.u32 %v8152_v57, 16  ;;  %v437_v12 = vshrl.u32 %v8527_v56, 16  ;;  %v509_v14 = vshrl.u32 %v8152_v57, 16  ;;  %v8186_v26 = vld [vmem:[%s11413_s1 + $0x60] sm:$0xff] }
  0x1c   : > { %1019 = vmatpush.bf16.msrb.mxu2 %v8168_v23  ;;  %7229 = vmatmul.msk.bf16.vlgmr.msra.gmra.mxu3 %vm573_vm1, %v8454_v8  ;;  %v431_v0 = vor.u32 %v429_v60, %v427_v51  ;;  %v435_v1 = vrot.slane %v433_v61, 1  ;;  %v503_v2 = vor.u32 %v501_v62, %v499_v53  ;;  %v513_v15 = vshll.u32 %v8153_v9, 16  ;;  %v8563_v23 = vld [vmem:[%s8447_s14 + $0x30] sm:$0xff]  ;;  %v8190_v41 = vld [vmem:[%s11413_s1 + $0x80] sm:$0xff] }
  0x1d   : > { %1408 = vmatpush.bf16.msrb.mxu3 %v8189_v24  ;;  %7220 = vmatmul.msk.bf16.vlgmr.msra.gmra.mxu1 %vm573_vm1, %v8297_v6  ;;  %v507_v3 = vrot.slane %v505_v63, 1  ;;  %v8550_v6 = vld [vmem:[%s8447_s14 + $0x28] sm:$0xff]  ;;  %v8154_v24 = vld [vmem:[%s8447_s14 + $0x78] sm:$0xff]  ;;  %v529_v46 = vshll.u32 %v8155_v40, 16  ;;  %v8601_v53 = vld [vmem:[%s8447_s14 + $0x40] sm:$0xff]  ;;  %vm4372_vm8 = vcmask 261120  }
  0x1e   : > { %1805 = vmatpush.bf16.msrb.mxu0 %v8193_v28  ;;  %v436_v4 = vsel %vm400_vm0, %v431_v0, %v435_v1  ;;  %v441_v13 = vshll.u32 %v8550_v6, 16  ;;  %v439_v16 = vor.u32 %v437_v12, %v435_v1  ;;  %v515_v19 = vrot.slane %v513_v15, 1  ;;  %v297_v0 = vld [vmem:[%s8447_s14 + $0x90] sm:$0x1]  ;;  %v8197_v1 = vld [vmem:[%s11413_s1 + $0xb8] sm:$0xff] }
  0x1f   : > { %v508_v5 = vsel %vm400_vm0, %v503_v2, %v507_v3  ;;  %v511_v18 = vor.u32 %v509_v14, %v507_v3  ;;  %v445_v27 = vshrl.u32 %v8550_v6, 16  ;;  %v449_v28 = vshll.u32 %v8563_v23, 16  ;;  %2069 = vmatpush.bf16.msrb.mxu1 %v8197_v1  ;;  %v8222_v12 = vld [vmem:[%s11413_s1 + $0xf8] sm:$0xff]  ;;  %v8195_v14 = vld [vmem:[%s11413_s1 + $0xa8] sm:$0xff] }
  0x20   : > { %1020 = vmatpush.bf16.msrb.mxu2 %v8167_v31  ;;  %v443_v17 = vrot.slane %v441_v13, 1  ;;  %v517_v31 = vshrl.u32 %v8153_v9, 16  ;;  %v531_v50 = vrot.slane %v529_v46, 1  ;;  %v469_v13 = vshrl.u32 %v8601_v53, 16 }
  0x21   : > { %1409 = vmatpush.bf16.msrb.mxu3 %v8188_v32  ;;  %v516_v22 = vsel %vm400_vm0, %v511_v18, %v515_v19  ;;  %v521_v32 = vshll.u32 %v8154_v24, 16  ;;  %v451_v34 = vrot.slane %v449_v28, 1  ;;  %v1151_v18 = vld [vmem:[%s8447_s14 + $0xc] sm:$0xf] }
  0x22   : > { %1806 = vmatpush.bf16.msrb.mxu0 %v8192_v33  ;;  %v444_v21 = vsel %vm400_vm0, %v439_v16, %v443_v17  ;;  %v447_v33 = vor.u32 %v445_v27, %v443_v17  ;;  %v519_v35 = vor.u32 %v517_v31, %v515_v19  ;;  %v1150_v17 = vld [vmem:[%s8447_s14 + $0x8] sm:$0xe]  ;;  %v8194_v19 = vld [vmem:[%s11413_s1 + $0xa0] sm:$0xff] }
  0x23   : > { %v523_v36 = vrot.slane %v521_v32, 1 }
  0x24   : > { %1021 = vmatpush.bf16.msrb.mxu2 %v8166_v58  ;;  %v452_v37 = vsel %vm400_vm0, %v447_v33, %v451_v34  ;;  %v533_v58 = vshrl.u32 %v8155_v40, 16 }
  0x25   : > { %1410 = vmatpush.bf16.msrb.mxu3 %v8187_v59  ;;  %v524_v38 = vsel %vm400_vm0, %v519_v35, %v523_v36 }
  0x26   : > { %1807 = vmatpush.bf16.msrb.mxu0 %v8191_v10  ;;  %v535_v62 = vor.u32 %v533_v58, %v531_v50  ;;  %v8218_v10 = vld [vmem:[%s11413_s1 + $0xd8] sm:$0xff] }
  0x28   : > { %1022 = vmatpush.bf16.msrb.mxu2 %v8165_v25 }
  0x29   : > { %1411 = vmatpush.bf16.msrb.mxu3 %v8186_v26 }
  0x2a   : > { %1808 = vmatpush.bf16.msrb.mxu0 %v8190_v41  ;;  %v8305_v41 = vld [vmem:[%s8447_s14] sm:$0xe] }
  0x2b   : > { %7187 = vmatmul.msk.bf16.gmra.mxu0 %vm573_vm1, %v420_v42  ;;  %7196 = vmatmul.msk.bf16.gmra.mxu2 %vm573_vm1, %v492_v43  ;;  %v453_v42 = vshrl.u32 %v8563_v23, 16  ;;  %v457_v43 = vshll.u32 %v8585_v39, 16 }
  0x2c   : > { %7230 = vmatmul.msk.bf16.gmra.mxu3 %vm573_vm1, %v8457_v11  ;;  %2458 = vmatpush.bf16.msra.mxu2 %v8218_v10 }
  0x2d   : > { %7221 = vmatmul.msk.bf16.gmra.mxu1 %vm573_vm1, %v8451_v7  ;;  %v455_v47 = vor.u32 %v453_v42, %v451_v34  ;;  %v459_v48 = vrot.slane %v457_v43, 1  ;;  %2855 = vmatpush.bf16.msra.mxu3 %v8222_v12  ;;  %v8645_v34 = vld [vmem:[%s8447_s14 + $0x10] sm:$0xff] }
  0x2e   : > { %v1562_v42 = vshrl.u32 %v8645_v34, 16  ;;  %v1565_v43 = vshll.u32 %v8645_v34, 16 }
  0x2f   : > { %v460_v51 = vsel %vm400_vm0, %v455_v47, %v459_v48 }
  0x3b   : > { %7188 = vmatmul.msk.bf16.gmra.mxu0 %vm573_vm1, %v428_v54  ;;  %7197 = vmatmul.msk.bf16.gmra.mxu2 %vm573_vm1, %v500_v55  ;;  %v8156_v54 = vld [vmem:[%s8447_s14 + $0x88] sm:$0xff]  ;;  %v461_v55 = vshrl.u32 %v8585_v39, 16 }
  0x3c   : > { %7231 = vmatmul.msk.bf16.gmra.mxu3 %vm573_vm1, %v8492_v30  ;;  %v537_v59 = vshll.u32 %v8156_v54, 16  ;;  %v541_v15 = vshrl.u32 %v8156_v54, 16 }
  0x3d   : > { %7222 = vmatmul.msk.bf16.gmra.mxu1 %vm573_vm1, %v8486_v29  ;;  %v463_v60 = vor.u32 %v461_v55, %v459_v48  ;;  %v1564_v55 = vrot.slane %v1562_v42, 1 }
  0x3e   : > { %v539_v63 = vrot.slane %v537_v59, 1 }
  0x40   : > { %v540_v3 = vsel %vm400_vm0, %v535_v62, %v539_v63  ;;  %v543_v26 = vor.u32 %v541_v15, %v539_v63  ;;  %v1290_v63 = vrot.slane %v8645_v34, 1 }
  0x4b   : > { %7189 = vmatmul.msk.bf16.gmra.mxu0 %vm573_vm1, %v436_v4  ;;  %7198 = vmatmul.msk.bf16.gmra.mxu2 %vm573_vm1, %v508_v5  ;;  %v380_v4 = vunpack.c.l.b16 %v297_v0  ;;  %v8196_v5 = vld [vmem:[%s11413_s1 + $0xb0] sm:$0xff] }
  0x4c   : > { %7232 = vmatmul.msk.bf16.gmra.mxu3 %vm573_vm1, %v8151_v45  ;;  %v525_v45 = vshrl.u32 %v8154_v24, 16  ;;  %2070 = vmatpush.bf16.msrb.mxu1 %v8196_v5 }
  0x4d   : > { %7223 = vmatmul.msk.bf16.gmra.mxu1 %vm573_vm1, %v8516_v44 }
  0x4e   : > { %v527_v49 = vor.u32 %v525_v45, %v523_v36 }
  0x50   : > { %v532_v52 = vsel %vm400_vm0, %v527_v49, %v531_v50  ;;  %2071 = vmatpush.bf16.msrb.mxu1 %v8195_v14  ;;  %v8671_v14 = vld [vmem:[%s8447_s14 + $0x18] sm:$0xff] }
  0x54   : > { %2072 = vmatpush.bf16.msrb.mxu1 %v8194_v19  ;;  %v1571_v19 = vshrl.u32 %v8671_v14, 16 }
  0x5b   : > { %7190 = vmatmul.msk.bf16.gmra.mxu0 %vm573_vm1, %v444_v21  ;;  %7199 = vmatmul.msk.bf16.gmra.mxu2 %vm573_vm1, %v516_v22  ;;  %v8226_v21 = vld [vmem:[%s11413_s1 + $0x118] sm:$0xff]  ;;  %v1233_v22 = vunpack.c.l.b16 %v1150_v17 }
  0x5c   : > { %7233 = vmatmul.msk.bf16.gmra.mxu3 %vm573_vm1, %v8152_v57  ;;  %v465_v57 = vshll.u32 %v8601_v53, 16  ;;  %3119 = vmatpush.bf16.msra.mxu0 %v8226_v21  ;;  %v1574_v21 = vshll.u32 %v8671_v14, 16 }
  0x5d   : > { %7224 = vmatmul.msk.bf16.gmra.mxu1 %vm573_vm1, %v8527_v56 }
  0x5e   : > { %v467_v61 = vrot.slane %v465_v57, 1 }
  0x60   : > { %v468_v2 = vsel %vm400_vm0, %v463_v60, %v467_v61  ;;  %v471_v25 = vor.u32 %v469_v13, %v467_v61  ;;  %v901_v61 = vrot.slane %v8451_v7, 1 }
  0x62   : > { %v476_v32 = vsel %vm400_vm0, %v471_v25, %v8469_v20  ;;  %v8304_v20 = vld [vmem:[%s8447_s14] sm:$0xf0] }
  0x63   : > { %v8306_v48 = vor.u32 %v8305_v41, %v8304_v20 }
  0x65   : > { %v900_v60 = vrot.slane %v8306_v48, 1 }
  0x67   : > { %v902_v13 = vsel %vm899_vm2, %v900_v60, %v901_v61 }
  0x6b   : > { %7191 = vmatmul.msk.bf16.gmra.mxu0 %vm573_vm1, %v452_v37  ;;  %7200 = vmatmul.msk.bf16.gmra.mxu2 %vm573_vm1, %v524_v38  ;;  %v1936_v37 = vld [vmem:[%s8447_s14 + $0x8] sm:$0xc] }
  0x6c   : > { %7234 = vmatmul.msk.bf16.gmra.mxu3 %vm573_vm1, %v8153_v9  ;;  %v8620_v9 = vpack.c.b16 %v380_v4, %v380_v4  ;;  %v1947_v45 = vunpack.c.l.b16 %v1936_v37  ;;  %v1953_v37 = vrot.slane %v8671_v14, 2 }
  0x6d   : > { %7225 = vmatmul.msk.bf16.gmra.mxu1 %vm573_vm1, %v8550_v6 }
  0x6e   : > { %v545_v16 = vshll.u32 %v8620_v9, 16 }
  0x70   : > { %v547_v27 = vrot.slane %v545_v16, 1 }
  0x72   : > { %v548_v33 = vsel %vm400_vm0, %v543_v26, %v547_v27  ;;  %v1573_v27 = vrot.slane %v1571_v19, 1 }
  0x7b   : > { %7192 = vmatmul.msk.bf16.gmra.mxu0 %vm573_vm1, %v460_v51  ;;  %7201 = vmatmul.msk.bf16.gmra.mxu2 %vm573_vm1, %v532_v52 }
  0x7c   : > { %7235 = vmatmul.msk.bf16.gmra.mxu3 %vm573_vm1, %v8154_v24  ;;  %v1234_v24 = vunpack.c.l.b16 %v1151_v18 }
  0x7d   : > { %7226 = vmatmul.msk.bf16.gmra.mxu1 %vm573_vm1, %v8563_v23 }
  0x7e   : > { %v1270_v28 = vpack.c.b16 %v1234_v24, %v1233_v22  ;;  %v1948_v58 = vpack.c.b16 %v1234_v24, %v1947_v45  ;;  %v8695_v45 = vld [vmem:[%s8447_s14 + $0x20] sm:$0xff] }
  0x80   : > { %v1554_v38 = vshrl.u32 %v1270_v28, 16  ;;  %v1289_v62 = vrot.slane %v1270_v28, 1 }
  0x82   : > { %v1556_v49 = vrot.slane %v1554_v38, 1  ;;  %v1291_v16 = vsel %vm899_vm2, %v1289_v62, %v1290_v63 }
  0x8b   : > { %7193 = vmatmul.msk.bf16.gmra.mxu0 %vm573_vm1, %v468_v2  ;;  %7202 = vmatmul.msk.bf16.gmra.mxu2 %vm573_vm1, %v540_v3  ;;  %v1950_v2 = vrot.slane %v1948_v58, 2  ;;  %v1951_v3 = vrot.slane %v8645_v34, 2 }
  0x8c   : > { %7236 = vmatmul.msk.bf16.gmra.mxu3 %vm573_vm1, %v8155_v40  ;;  %v1557_v40 = vshll.u32 %v1270_v28, 16  ;;  %v1576_v28 = vrot.slane %v1574_v21, 2 }
  0x8d   : > { %7227 = vmatmul.msk.bf16.gmra.mxu1 %vm573_vm1, %v8585_v39  ;;  %v1952_v17 = vsel %vm1949_vm4, %v1950_v2, %v1951_v3  ;;  %v1955_v2 = vrot.slane %v8695_v45, 2 }
  0x8e   : > { %v1559_v52 = vrot.slane %v1557_v40, 2  ;;  %v1577_v34 = vor.u32 %v1576_v28, %v1573_v27 }
  0x90   : > { %v1560_v0 = vor.u32 %v1559_v52, %v1556_v49  ;;  %v1580_v49 = vshrl.u32 %v8695_v45, 16 }
  0x92   : > { %v1582_v58 = vrot.slane %v1580_v49, 1 }
  0x98   : > { %v637_v31 = vpop.f32.mrf.mxu0 }
  0x9a   : > { %v796_v35 = vpop.f32.mrf.mxu1 }
  0x9b   : > { %v8647_v36 = vadd.f32 %v796_v35, %v637_v31  ;;  %7194 = vmatmul.msk.bf16.gmra.mxu0 %vm573_vm1, %v476_v32  ;;  %7203 = vmatmul.msk.bf16.gmra.mxu2 %vm573_vm1, %v548_v33  ;;  %v903_v33 = vrot.slane %v8486_v29, 1  ;;  %v1292_v35 = vrot.slane %v8671_v14, 1  ;;  %v1954_v29 = vsel %vm1949_vm4, %v1951_v3, %v1953_v37  ;;  %v8719_v14 = vld [vmem:[%s8447_s14 + $0x28] sm:$0xff] }
  0x9c   : > { %7237 = vmatmul.msk.bf16.gmra.mxu3 %vm573_vm1, %v8156_v54  ;;  %v1567_v54 = vrot.slane %v1565_v43, 2  ;;  %v1589_v19 = vshrl.u32 %v8719_v14, 16  ;;  %v1592_v21 = vshll.u32 %v8719_v14, 16 }
  0x9d   : > { %7228 = vmatmul.msk.bf16.gmra.mxu1 %vm573_vm1, %v8601_v53  ;;  %v904_v42 = vsel %vm899_vm2, %v901_v61, %v903_v33 }
  0x9e   : > { %v682_v46 = vpop.f32.mrf.mxu2  ;;  %v1568_v1 = vor.u32 %v1567_v54, %v1564_v55  ;;  %v1591_v28 = vrot.slane %v1589_v19, 1 }
  0x9f   : > { %v841_v47 = vpop.f32.mrf.mxu3 }
  0xa0   : > { %v8659_v50 = vadd.f32 %v841_v47, %v682_v46  ;;  %v639_v51 = vpop.f32.mrf.mxu0  ;;  %v1569_v7 = vsel %vm1552_vm3, %v1560_v0, %v1568_v1  ;;  %v1578_v43 = vsel %vm1552_vm3, %v1568_v1, %v1577_v34  ;;  %v1293_v47 = vsel %vm899_vm2, %v1290_v63, %v1292_v35 }
  0xa1   : > { %v905_v63 = vrot.slane %v8516_v44, 1  ;;  %v1294_v1 = vrot.slane %v8695_v45, 1  ;;  %v1956_v44 = vsel %vm1949_vm4, %v1953_v37, %v1955_v2  ;;  %v8221_v37 = vld [vmem:[%s11413_s1 + $0xf0] sm:$0xff] }
  0xa2   : > { %v798_v57 = vpop.f32.mrf.mxu1  ;;  %2856 = vmatpush.bf16.msra.mxu3 %v8221_v37 }
  0xa3   : > { %v8661_v59 = vadd.f32 %v798_v57, %v639_v51  ;;  %v1583_v51 = vshll.u32 %v8695_v45, 16 }
  0xa5   : > { %v1585_v60 = vrot.slane %v1583_v51, 2  ;;  %v8749_v51 = vld [vmem:[%s8447_s14 + $0x30] sm:$0xff] }
  0xa6   : > { %v684_v4 = vpop.f32.mrf.mxu2 }
  0xa7   : > { %v843_v5 = vpop.f32.mrf.mxu3  ;;  %v1586_v0 = vor.u32 %v1585_v60, %v1582_v58  ;;  %v1598_v58 = vshrl.u32 %v8749_v51, 16  ;;  %v1601_v60 = vshll.u32 %v8749_v51, 16 }
  0xa8   : > { %v8666_v10 = vadd.f32 %v843_v5, %v684_v4  ;;  %v642_v12 = vpop.f32.mrf.mxu0 }
  0xaa   : > { %v801_v15 = vpop.f32.mrf.mxu1 }
  0xab   : > { %v8675_v18 = vadd.f32 %v801_v15, %v642_v12  ;;  %7262 = vmatmul.msk.bf16.vlgmr.msrb.gmra.mxu2 %vm573_vm1, %v902_v13  ;;  %7414 = vmatmul.msk.bf16.vlgmr.msrb.gmra.mxu0 %vm573_vm1, %v1569_v7  ;;  %v906_v13 = vsel %vm899_vm2, %v903_v33, %v905_v63  ;;  %v1587_v7 = vsel %vm1552_vm3, %v1577_v34, %v1586_v0 }
  0xac   : > { %7372 = vmatmul.msk.bf16.vlgmr.msrb.gmra.mxu3 %vm573_vm1, %v1291_v16  ;;  %v1295_v16 = vsel %vm899_vm2, %v1292_v35, %v1294_v1  ;;  %v8217_v35 = vld [vmem:[%s11413_s1 + $0xd0] sm:$0xff] }
  0xad   : > { %7456 = vmatmul.msk.bf16.vlgmr.msrb.gmra.mxu1 %vm573_vm1, %v1952_v17  ;;  %2459 = vmatpush.bf16.msra.mxu2 %v8217_v35 }
  0xae   : > { %v687_v22 = vpop.f32.mrf.mxu2 }
  0xaf   : > { %v846_v24 = vpop.f32.mrf.mxu3 }
  0xb0   : > { %v8683_v25 = vadd.f32 %v846_v24, %v687_v22  ;;  %v644_v26 = vpop.f32.mrf.mxu0 }
  0xb2   : > { %v803_v31 = vpop.f32.mrf.mxu1 }
  0xb3   : > { %v8685_v32 = vadd.f32 %v803_v31, %v644_v26  ;;  %v1594_v31 = vrot.slane %v1592_v21, 2 }
  0xb6   : > { %v689_v38 = vpop.f32.mrf.mxu2 }
  0xb7   : > { %v848_v40 = vpop.f32.mrf.mxu3 }
  0xb8   : > { %v8690_v20 = vadd.f32 %v848_v40, %v689_v38  ;;  %v647_v41 = vpop.f32.mrf.mxu0  ;;  %v907_v38 = vrot.slane %v8527_v56, 1  ;;  %v1595_v40 = vor.u32 %v1594_v31, %v1591_v28  ;;  %v8776_v28 = vld [vmem:[%s8447_s14 + $0x38] sm:$0xff] }
  0xb9   : > { %v1607_v37 = vshrl.u32 %v8776_v28, 16 }
  0xba   : > { %v806_v46 = vpop.f32.mrf.mxu1  ;;  %v1596_v49 = vsel %vm1552_vm3, %v1586_v0, %v1595_v40 }
  0xbb   : > { %v8699_v48 = vadd.f32 %v806_v46, %v647_v41  ;;  %7263 = vmatmul.msk.bf16.gmra.mxu2 %vm573_vm1, %v904_v42  ;;  %7415 = vmatmul.msk.bf16.gmra.mxu0 %vm573_vm1, %v1578_v43  ;;  %v1296_v41 = vrot.slane %v8719_v14, 1  ;;  %v1957_v42 = vrot.slane %v8719_v14, 2 }
  0xbc   : > { %7373 = vmatmul.msk.bf16.gmra.mxu3 %vm573_vm1, %v1293_v47 }
  0xbd   : > { %7457 = vmatmul.msk.bf16.gmra.mxu1 %vm573_vm1, %v1954_v29  ;;  %v908_v29 = vsel %vm899_vm2, %v905_v63, %v907_v38  ;;  %v1297_v56 = vsel %vm899_vm2, %v1294_v1, %v1296_v41 }
  0xbe   : > { %v692_v52 = vpop.f32.mrf.mxu2 }
  0xbf   : > { %v851_v55 = vpop.f32.mrf.mxu3 }
  0xc0   : > { %v8707_v54 = vadd.f32 %v851_v55, %v692_v52  ;;  %v649_v57 = vpop.f32.mrf.mxu0  ;;  %v1958_v55 = vsel %vm1949_vm4, %v1955_v2, %v1957_v42 }
  0xc2   : > { %v808_v61 = vpop.f32.mrf.mxu1 }
  0xc3   : > { %v8709_v62 = vadd.f32 %v808_v61, %v649_v57  ;;  %v8225_v61 = vld [vmem:[%s11413_s1 + $0x110] sm:$0xff] }
  0xc4   : > { %3120 = vmatpush.bf16.msra.mxu0 %v8225_v61 }
  0xc6   : > { %v694_v3 = vpop.f32.mrf.mxu2 }
  0xc7   : > { %v853_v4 = vpop.f32.mrf.mxu3 }
  0xc8   : > { %v8714_v5 = vadd.f32 %v853_v4, %v694_v3  ;;  %v652_v12 = vpop.f32.mrf.mxu0  ;;  %v1600_v3 = vrot.slane %v1598_v58, 1  ;;  %v1603_v4 = vrot.slane %v1601_v60, 2 }
  0xca   : > { %v811_v15 = vpop.f32.mrf.mxu1  ;;  %v1604_v14 = vor.u32 %v1603_v4, %v1600_v3  ;;  %v8800_v3 = vld [vmem:[%s8447_s14 + $0x40] sm:$0xff] }
  0xcb   : > { %v8723_v17 = vadd.f32 %v811_v15, %v652_v12  ;;  %7264 = vmatmul.msk.bf16.gmra.mxu2 %vm573_vm1, %v906_v13  ;;  %7416 = vmatmul.msk.bf16.gmra.mxu0 %vm573_vm1, %v1587_v7  ;;  %v909_v7 = vrot.slane %v8550_v6, 1  ;;  %v1298_v15 = vrot.slane %v8749_v51, 1 }
  0xcc   : > { %7374 = vmatmul.msk.bf16.gmra.mxu3 %vm573_vm1, %v1295_v16  ;;  %v1959_v16 = vrot.slane %v8749_v51, 2  ;;  %v911_v51 = vrot.slane %v8563_v23, 1 }
  0xcd   : > { %7458 = vmatmul.msk.bf16.gmra.mxu1 %vm573_vm1, %v1956_v44 }
  0xce   : > { %v697_v22 = vpop.f32.mrf.mxu2  ;;  %v1960_v6 = vsel %vm1949_vm4, %v1957_v42, %v1959_v16  ;;  %v1609_v42 = vrot.slane %v1607_v37, 1  ;;  %v1302_v37 = vrot.slane %v8800_v3, 1 }
  0xcf   : > { %v856_v24 = vpop.f32.mrf.mxu3 }
  0xd0   : > { %v8731_v26 = vadd.f32 %v856_v24, %v697_v22  ;;  %v654_v27 = vpop.f32.mrf.mxu0  ;;  %v910_v24 = vsel %vm899_vm2, %v907_v38, %v909_v7  ;;  %v1610_v38 = vshll.u32 %v8776_v28, 16 }
  0xd2   : > { %v813_v33 = vpop.f32.mrf.mxu1 }
  0xd3   : > { %v8733_v34 = vadd.f32 %v813_v33, %v654_v27  ;;  %v1605_v27 = vsel %vm1552_vm3, %v1595_v40, %v1604_v14  ;;  %v1299_v33 = vsel %vm899_vm2, %v1296_v41, %v1298_v15 }
  0xd6   : > { %v699_v43 = vpop.f32.mrf.mxu2 }
  0xd7   : > { %v858_v45 = vpop.f32.mrf.mxu3 }
  0xd8   : > { %v8744_v46 = vadd.f32 %v858_v45, %v699_v43  ;;  %v657_v47 = vpop.f32.mrf.mxu0 }
  0xda   : > { %v816_v52 = vpop.f32.mrf.mxu1 }
  0xdb   : > { %v8753_v57 = vadd.f32 %v816_v52, %v657_v47  ;;  %7265 = vmatmul.msk.bf16.gmra.mxu2 %vm573_vm1, %v908_v29  ;;  %7417 = vmatmul.msk.bf16.gmra.mxu0 %vm573_vm1, %v1596_v49  ;;  %v1612_v47 = vrot.slane %v1610_v38, 2  ;;  %v1963_v38 = vrot.slane %v8800_v3, 2 }
  0xdc   : > { %7375 = vmatmul.msk.bf16.gmra.mxu3 %vm573_vm1, %v1297_v56  ;;  %v1300_v56 = vrot.slane %v8776_v28, 1 }
  0xdd   : > { %7459 = vmatmul.msk.bf16.gmra.mxu1 %vm573_vm1, %v1958_v55  ;;  %v1613_v52 = vor.u32 %v1612_v47, %v1609_v42  ;;  %v1961_v55 = vrot.slane %v8776_v28, 2 }
  0xde   : > { %v702_v63 = vpop.f32.mrf.mxu2 }
  0xdf   : > { %v861_v0 = vpop.f32.mrf.mxu3  ;;  %v1962_v23 = vsel %vm1949_vm4, %v1959_v16, %v1961_v55 }
  0xe0   : > { %v8764_v1 = vadd.f32 %v861_v0, %v702_v63  ;;  %v659_v2 = vpop.f32.mrf.mxu0  ;;  %v912_v0 = vsel %vm899_vm2, %v909_v7, %v911_v51  ;;  %v1616_v7 = vshrl.u32 %v8800_v3, 16 }
  0xe2   : > { %v818_v12 = vpop.f32.mrf.mxu1  ;;  %v1618_v16 = vrot.slane %v1616_v7, 1 }
  0xe3   : > { %v8766_v13 = vadd.f32 %v818_v12, %v659_v2  ;;  %v1614_v2 = vsel %vm1552_vm3, %v1604_v14, %v1613_v52  ;;  %v1301_v12 = vsel %vm899_vm2, %v1298_v15, %v1300_v56  ;;  %v1619_v14 = vshll.u32 %v8800_v3, 16 }
  0xe6   : > { %v704_v44 = vpop.f32.mrf.mxu2 }
  0xe7   : > { %v863_v19 = vpop.f32.mrf.mxu3 }
  0xe8   : > { %v8771_v21 = vadd.f32 %v863_v19, %v704_v44  ;;  %v662_v22 = vpop.f32.mrf.mxu0 }
  0xea   : > { %v821_v31 = vpop.f32.mrf.mxu1 }
  0xeb   : > { %v8780_v35 = vadd.f32 %v821_v31, %v662_v22  ;;  %7266 = vmatmul.msk.bf16.gmra.mxu2 %vm573_vm1, %v910_v24  ;;  %7418 = vmatmul.msk.bf16.gmra.mxu0 %vm573_vm1, %v1605_v27  ;;  %v1621_v27 = vrot.slane %v1619_v14, 2  ;;  %v915_v14 = vrot.slane %v8601_v53, 1 }
  0xec   : > { %7376 = vmatmul.msk.bf16.gmra.mxu3 %vm573_vm1, %v1299_v33  ;;  %v913_v33 = vrot.slane %v8585_v39, 1  ;;  %v1964_v39 = vsel %vm1949_vm4, %v1961_v55, %v1963_v38 }
  0xed   : > { %7460 = vmatmul.msk.bf16.gmra.mxu1 %vm573_vm1, %v1960_v6  ;;  %v1622_v6 = vor.u32 %v1621_v27, %v1618_v16 }
  0xee   : > { %v707_v40 = vpop.f32.mrf.mxu2  ;;  %v914_v47 = vsel %vm899_vm2, %v911_v51, %v913_v33 }
  0xef   : > { %v866_v43 = vpop.f32.mrf.mxu3 }
  0xf0   : > { %v8788_v45 = vadd.f32 %v866_v43, %v707_v40  ;;  %v664_v41 = vpop.f32.mrf.mxu0 }
  0xf2   : > { %v823_v29 = vpop.f32.mrf.mxu1 }
  0xf3   : > { %v8790_v49 = vadd.f32 %v823_v29, %v664_v41  ;;  %v1623_v29 = vsel %vm1552_vm3, %v1613_v52, %v1622_v6 }
  0xf6   : > { %v709_v58 = vpop.f32.mrf.mxu2 }
  0xf7   : > { %v868_v60 = vpop.f32.mrf.mxu3 }
  0xf8   : > { %v8795_v61 = vadd.f32 %v868_v60, %v709_v58  ;;  %v667_v63 = vpop.f32.mrf.mxu0  ;;  %v8824_v58 = vld [vmem:[%s8447_s14 + $0x48] sm:$0xff] }
  0xf9   : > { %v1625_v51 = vshrl.u32 %v8824_v58, 16  ;;  %v1628_v52 = vshll.u32 %v8824_v58, 16 }
  0xfa   : > { %v826_v4 = vpop.f32.mrf.mxu1 }
  0xfb   : > { %v8804_v44 = vadd.f32 %v826_v4, %v667_v63  ;;  %7267 = vmatmul.msk.bf16.gmra.mxu2 %vm573_vm1, %v912_v0  ;;  %7419 = vmatmul.msk.bf16.gmra.mxu0 %vm573_vm1, %v1614_v2  ;;  %v1303_v63 = vsel %vm899_vm2, %v1300_v56, %v1302_v37  ;;  %v1627_v55 = vrot.slane %v1625_v51, 1 }
  0xfc   : > { %7377 = vmatmul.msk.bf16.gmra.mxu3 %vm573_vm1, %v1301_v12  ;;  %v1630_v12 = vrot.slane %v1628_v52, 2 }
  0xfd   : > { %7461 = vmatmul.msk.bf16.gmra.mxu1 %vm573_vm1, %v1962_v23 }
  0xfe   : > { %v712_v19 = vpop.f32.mrf.mxu2 }
  0xff   : > { %v871_v22 = vpop.f32.mrf.mxu3 }
 0x100   : > { %v8812_v24 = vadd.f32 %v871_v22, %v712_v19  ;;  %v669_v15 = vpop.f32.mrf.mxu0  ;;  %v1631_v19 = vor.u32 %v1630_v12, %v1627_v55  ;;  %v1304_v22 = vrot.slane %v8824_v58, 1  ;;  %v917_v12 = vrot.slane %v8454_v8, 1  ;;  %v8881_v8 = vld [vmem:[%s8447_s14 + $0x58] sm:$0xff] }
 0x102   : > { %v828_v28 = vpop.f32.mrf.mxu1 }
 0x103   : > { %v8814_v31 = vadd.f32 %v828_v28, %v669_v15  ;;  %v1965_v15 = vrot.slane %v8824_v58, 2 }
 0x105   : > { %v1966_v53 = vsel %vm1949_vm4, %v1963_v38, %v1965_v15  ;;  %v8220_v38 = vld [vmem:[%s11413_s1 + $0xe8] sm:$0xff] }
 0x106   : > { %v714_v40 = vpop.f32.mrf.mxu2  ;;  %2857 = vmatpush.bf16.msra.mxu3 %v8220_v38  ;;  %v1643_v38 = vshrl.u32 %v8881_v8, 16 }
 0x107   : > { %v873_v43 = vpop.f32.mrf.mxu3 }
 0x108   : > { %v8819_v41 = vadd.f32 %v873_v43, %v714_v40  ;;  %v672_v42 = vpop.f32.mrf.mxu0  ;;  %v916_v43 = vsel %vm899_vm2, %v913_v33, %v915_v14 }
 0x10a   : > { %v831_v60 = vpop.f32.mrf.mxu1 }
 0x10b   : > { %v8828_v0 = vadd.f32 %v831_v60, %v672_v42  ;;  %7268 = vmatmul.msk.bf16.gmra.mxu2 %vm573_vm1, %v914_v47  ;;  %7420 = vmatmul.msk.bf16.gmra.mxu0 %vm573_vm1, %v1623_v29  ;;  %v1632_v42 = vsel %vm1552_vm3, %v1622_v6, %v1631_v19  ;;  %v8848_v47 = vld [vmem:[%s8447_s14 + $0x50] sm:$0xff]  ;;  %v1305_v60 = vsel %vm899_vm2, %v1302_v37, %v1304_v22  ;;  %v8216_v37 = vld [vmem:[%s11413_s1 + $0xc8] sm:$0xff] }
 0x10c   : > { %7378 = vmatmul.msk.bf16.gmra.mxu3 %vm573_vm1, %v1303_v63  ;;  %v1634_v33 = vshrl.u32 %v8848_v47, 16  ;;  %v1637_v6 = vshll.u32 %v8848_v47, 16  ;;  %2460 = vmatpush.bf16.msra.mxu2 %v8216_v37 }
 0x10d   : > { %7462 = vmatmul.msk.bf16.gmra.mxu1 %vm573_vm1, %v1964_v39 }
 0x10e   : > { %v717_v2 = vpop.f32.mrf.mxu2 }
 0x10f   : > { %v876_v3 = vpop.f32.mrf.mxu3 }
 0x110   : > { %v8836_v4 = vadd.f32 %v876_v3, %v717_v2  ;;  %v674_v56 = vpop.f32.mrf.mxu0  ;;  %v1636_v2 = vrot.slane %v1634_v33, 1  ;;  %v1639_v3 = vrot.slane %v1637_v6, 2 }
 0x112   : > { %v833_v23 = vpop.f32.mrf.mxu1 }
 0x113   : > { %v8838_v7 = vadd.f32 %v833_v23, %v674_v56  ;;  %v1640_v23 = vor.u32 %v1639_v3, %v1636_v2 }
 0x115   : > { %v1641_v33 = vsel %vm1552_vm3, %v1631_v19, %v1640_v23 }
 0x116   : > { %v719_v16 = vpop.f32.mrf.mxu2 }
 0x117   : > { %v878_v27 = vpop.f32.mrf.mxu3 }
 0x118   : > { %v8843_v28 = vadd.f32 %v878_v27, %v719_v16  ;;  %v677_v40 = vpop.f32.mrf.mxu0  ;;  %v1306_v16 = vrot.slane %v8848_v47, 1  ;;  %v1967_v27 = vrot.slane %v8848_v47, 2 }
 0x11a   : > { %v836_v29 = vpop.f32.mrf.mxu1  ;;  %v1307_v6 = vsel %vm899_vm2, %v1304_v22, %v1306_v16  ;;  %v1968_v47 = vsel %vm1949_vm4, %v1965_v15, %v1967_v27 }
 0x11b   : > { %v8852_v63 = vadd.f32 %v836_v29, %v677_v40  ;;  %7269 = vmatmul.msk.bf16.gmra.mxu2 %vm573_vm1, %v916_v43  ;;  %7421 = vmatmul.msk.bf16.gmra.mxu0 %vm573_vm1, %v1632_v42  ;;  %v8224_v40 = vld [vmem:[%s11413_s1 + $0x108] sm:$0xff] }
 0x11c   : > { %7379 = vmatmul.msk.bf16.gmra.mxu3 %vm573_vm1, %v1305_v60  ;;  %3121 = vmatpush.bf16.msra.mxu0 %v8224_v40  ;;  %v919_v40 = vrot.slane %v8457_v11, 1 }
 0x11d   : > { %7463 = vmatmul.msk.bf16.gmra.mxu1 %vm573_vm1, %v1966_v53  ;;  %v918_v53 = vsel %vm899_vm2, %v915_v14, %v917_v12  ;;  %v1646_v14 = vshll.u32 %v8881_v8, 16 }
 0x11e   : > { %v722_v58 = vpop.f32.mrf.mxu2 }
 0x11f   : > { %v881_v39 = vpop.f32.mrf.mxu3  ;;  %v1648_v15 = vrot.slane %v1646_v14, 2 }
 0x120   : > { %v8866_v51 = vadd.f32 %v881_v39, %v722_v58  ;;  %v679_v52 = vpop.f32.mrf.mxu0 }
 0x122   : > { %v838_v56 = vpop.f32.mrf.mxu1 }
 0x123   : > { %v8868_v55 = vadd.f32 %v838_v56, %v679_v52  ;;  %v1645_v52 = vrot.slane %v1643_v38, 1  ;;  %v920_v38 = vsel %vm899_vm2, %v917_v12, %v919_v40 }
 0x126   : > { %v724_v43 = vpop.f32.mrf.mxu2 }
 0x127   : > { %v883_v42 = vpop.f32.mrf.mxu3 }
 0x128   : > { %v8876_v29 = vadd.f32 %v883_v42, %v724_v43  ;;  %v1810_v60 = vpop.f32.mrf.mxu0  ;;  %v1649_v43 = vor.u32 %v1648_v15, %v1645_v52 }
 0x12a   : > { %v2074_v37 = vpop.f32.mrf.mxu1  ;;  %v1650_v14 = vsel %vm1552_vm3, %v1640_v23, %v1649_v43  ;;  %v8247_v23 = vld [vmem:[%s11415_s3 + $0x18] sm:$0xff] }
 0x12b   : > { %7270 = vmatmul.msk.bf16.gmra.mxu2 %vm573_vm1, %v918_v53  ;;  %7422 = vmatmul.msk.bf16.gmra.mxu0 %vm573_vm1, %v1641_v33  ;;  %v1308_v53 = vrot.slane %v8881_v8, 1  ;;  %v1969_v33 = vrot.slane %v8881_v8, 2 }
 0x12c   : > { %7380 = vmatmul.msk.bf16.gmra.mxu3 %vm573_vm1, %v1307_v6  ;;  %4433 = vmatpush.bf16.msra.mxu1 %v8247_v23 }
 0x12d   : > { %7464 = vmatmul.msk.bf16.gmra.mxu1 %vm573_vm1, %v1968_v47  ;;  %v1309_v11 = vsel %vm899_vm2, %v1306_v16, %v1308_v53 }
 0x12e   : > { %v1024_v19 = vpop.f32.mrf.mxu2 }
 0x12f   : > { %v1114_v58 = vadd.f32 %v1024_v19, %v8647_v36  ;;  %v1413_v39 = vpop.f32.mrf.mxu3 }
 0x130   : > { %v1812_v22 = vpop.f32.mrf.mxu0 }
 0x131   : > { %v1503_v2 = vadd.f32 %v1413_v39, %v1114_v58  ;;  %v8901_v58 = vld [vmem:[%s8447_s14 + $0x60] sm:$0xff]  ;;  %v1970_v39 = vsel %vm1949_vm4, %v1967_v27, %v1969_v33 }
 0x132   : > { %v2076_v3 = vpop.f32.mrf.mxu1  ;;  %v1655_v12 = vshll.u32 %v8901_v58, 16 }
 0x133   : > { %v1900_v56 = vadd.f32 %v1810_v60, %v1503_v2 }
 0x135   : > { %v8893_v42 = vadd.f32 %v2074_v37, %v1900_v56  ;;  %v1657_v56 = vrot.slane %v1655_v12, 2 }
 0x136   : > { %v1026_v6 = vpop.f32.mrf.mxu2 }
 0x137   : > { %v1115_v36 = vadd.f32 %v1026_v6, %v8661_v59  ;;  %v1415_v47 = vpop.f32.mrf.mxu3  ;;  %v1652_v59 = vshrl.u32 %v8901_v58, 16 }
 0x138   : > { %v1815_v19 = vpop.f32.mrf.mxu0 }
 0x139   : > { %v1504_v60 = vadd.f32 %v1415_v47, %v1115_v36  ;;  %v1654_v2 = vrot.slane %v1652_v59, 1 }
 0x13a   : > { %v2079_v37 = vpop.f32.mrf.mxu1 }
 0x13b   : > { %7271 = vmatmul.msk.bf16.gmra.mxu2 %vm573_vm1, %v920_v38  ;;  %7423 = vmatmul.msk.bf16.gmra.mxu0 %vm573_vm1, %v1650_v14  ;;  %v1901_v8 = vadd.f32 %v1812_v22, %v1504_v60  ;;  %v921_v38 = vrot.slane %v8492_v30, 1  ;;  %v1658_v14 = vor.u32 %v1657_v56, %v1654_v2 }
 0x13c   : > { %7381 = vmatmul.msk.bf16.gmra.mxu3 %vm573_vm1, %v1309_v11  ;;  %v1971_v11 = vrot.slane %v8901_v58, 2 }
 0x13d   : > { %7465 = vmatmul.msk.bf16.gmra.mxu1 %vm573_vm1, %v1970_v39  ;;  %v8914_v16 = vadd.f32 %v2076_v3, %v1901_v8  ;;  %v1310_v3 = vrot.slane %v8901_v58, 1  ;;  %v922_v59 = vsel %vm899_vm2, %v919_v40, %v921_v38  ;;  %v1659_v12 = vsel %vm1552_vm3, %v1649_v43, %v1658_v14 }
 0x13e   : > { %v1029_v27 = vpop.f32.mrf.mxu2 }
 0x13f   : > { %v1116_v52 = vadd.f32 %v1029_v27, %v8675_v18  ;;  %v1418_v15 = vpop.f32.mrf.mxu3  ;;  %v8926_v27 = vld [vmem:[%s8447_s14 + $0x68] sm:$0xff]  ;;  %v1311_v30 = vsel %vm899_vm2, %v1308_v53, %v1310_v3 }
 0x140   : > { %v1817_v22 = vpop.f32.mrf.mxu0  ;;  %v1661_v40 = vshrl.u32 %v8926_v27, 16  ;;  %v1664_v43 = vshll.u32 %v8926_v27, 16 }
 0x141   : > { %v1505_v6 = vadd.f32 %v1418_v15, %v1116_v52  ;;  %v1972_v52 = vsel %vm1949_vm4, %v1969_v33, %v1971_v11 }
 0x142   : > { %v2081_v36 = vpop.f32.mrf.mxu1  ;;  %v1663_v56 = vrot.slane %v1661_v40, 1 }
 0x143   : > { %v1902_v47 = vadd.f32 %v1815_v19, %v1505_v6  ;;  %v1666_v6 = vrot.slane %v1664_v43, 2 }
 0x145   : > { %v8918_v60 = vadd.f32 %v2079_v37, %v1902_v47 }
 0x146   : > { %v1031_v39 = vpop.f32.mrf.mxu2 }
 0x147   : > { %v1117_v18 = vadd.f32 %v1031_v39, %v8685_v32  ;;  %v1420_v8 = vpop.f32.mrf.mxu3 }
 0x148   : > { %v1820_v23 = vpop.f32.mrf.mxu0 }
 0x149   : > { %v1506_v19 = vadd.f32 %v1420_v8, %v1117_v18  ;;  %v8334_v18 = vld [vmem:[%s8447_s14 + $0x60] sm:$0xff] }
 0x14a   : > { %v2084_v37 = vpop.f32.mrf.mxu1  ;;  %v923_v8 = vrot.slane %v8334_v18, 1 }
 0x14b   : > { %7272 = vmatmul.msk.bf16.gmra.mxu2 %vm573_vm1, %v922_v59  ;;  %7424 = vmatmul.msk.bf16.gmra.mxu0 %vm573_vm1, %v1659_v12  ;;  %v1903_v32 = vadd.f32 %v1817_v22, %v1506_v19  ;;  %v1667_v59 = vor.u32 %v1666_v6, %v1663_v56  ;;  %v1312_v19 = vrot.slane %v8926_v27, 1 }
 0x14c   : > { %7382 = vmatmul.msk.bf16.gmra.mxu3 %vm573_vm1, %v1311_v30  ;;  %v924_v40 = vsel %vm899_vm2, %v921_v38, %v923_v8 }
 0x14d   : > { %7466 = vmatmul.msk.bf16.gmra.mxu1 %vm573_vm1, %v1972_v52  ;;  %v8936_v58 = vadd.f32 %v2081_v36, %v1903_v32  ;;  %v1973_v36 = vrot.slane %v8926_v27, 2  ;;  %v1668_v43 = vsel %vm1552_vm3, %v1658_v14, %v1667_v59 }
 0x14e   : > { %v1034_v53 = vpop.f32.mrf.mxu2 }
 0x14f   : > { %v1118_v15 = vadd.f32 %v1034_v53, %v8699_v48  ;;  %v1423_v33 = vpop.f32.mrf.mxu3  ;;  %v8948_v53 = vld [vmem:[%s8447_s14 + $0x70] sm:$0xff] }
 0x150   : > { %v1822_v2 = vpop.f32.mrf.mxu0  ;;  %v1673_v38 = vshll.u32 %v8948_v53, 16 }
 0x151   : > { %v1507_v47 = vadd.f32 %v1423_v33, %v1118_v15  ;;  %v1313_v15 = vsel %vm899_vm2, %v1310_v3, %v1312_v19  ;;  %v1974_v33 = vsel %vm1949_vm4, %v1971_v11, %v1973_v36 }
 0x152   : > { %v2086_v22 = vpop.f32.mrf.mxu1 }
 0x153   : > { %v1904_v39 = vadd.f32 %v1820_v23, %v1507_v47 }
 0x155   : > { %v8940_v12 = vadd.f32 %v2084_v37, %v1904_v39  ;;  %v1675_v39 = vrot.slane %v1673_v38, 2 }
 0x156   : > { %v1036_v30 = vpop.f32.mrf.mxu2 }
 0x157   : > { %v1119_v48 = vadd.f32 %v1036_v30, %v8709_v62  ;;  %v1425_v52 = vpop.f32.mrf.mxu3  ;;  %v1670_v62 = vshrl.u32 %v8948_v53, 16  ;;  %v8215_v30 = vld [vmem:[%s11413_s1 + $0xc0] sm:$0xff] }
 0x158   : > { %v1825_v32 = vpop.f32.mrf.mxu0  ;;  %2461 = vmatpush.bf16.msra.mxu2 %v8215_v30  ;;  %v8379_v30 = vmov 0  }
 0x159   : > { %v1508_v23 = vadd.f32 %v1425_v52, %v1119_v48  ;;  %v1672_v47 = vrot.slane %v1670_v62, 1  ;;  %v8965_v52 = vld [vmem:[%s8447_s14 + $0x68] sm:$0xff]  ;;  %8329 = vset.pattern.permute.xlu0 %v8379_v30  ;;  %3579 = vst.msk [vmem:[#allocation2] sm:$0xf] %vm3578_vm5, %v8379_v30  ;;  %8330 = vset.pattern.permute.xlu1 %v8379_v30 }
 0x15a   : > { %v2089_v37 = vpop.f32.mrf.mxu1  ;;  %3580 = vst.msk [vmem:[#allocation2 + $0x4] sm:$0xf] %vm3578_vm5, %v8379_v30  ;;  %8331 = vset.pattern.permute.xlu2 %v8379_v30 }
 0x15b   : > { %7273 = vmatmul.msk.bf16.gmra.mxu2 %vm573_vm1, %v924_v40  ;;  %7425 = vmatmul.msk.bf16.gmra.mxu0 %vm573_vm1, %v1668_v43  ;;  %v1905_v27 = vadd.f32 %v1822_v2, %v1508_v23  ;;  %v1676_v40 = vor.u32 %v1675_v39, %v1672_v47  ;;  %v1975_v23 = vrot.slane %v8948_v53, 2  ;;  %3593 = vst.msk [vmem:[#allocation2 + $0x9c] sm:$0xf] %vm3578_vm5, %v8379_v30 }
 0x15c   : > { %7383 = vmatmul.msk.bf16.gmra.mxu3 %vm573_vm1, %v1313_v15  ;;  %v8219_v15 = vld [vmem:[%s11413_s1 + $0xe0] sm:$0xff]  ;;  %3594 = vst.msk [vmem:[#allocation2 + $0xa0] sm:$0xf] %vm3578_vm5, %v8379_v30 }
 0x15d   : > { %7467 = vmatmul.msk.bf16.gmra.mxu1 %vm573_vm1, %v1974_v33  ;;  %v8958_v14 = vadd.f32 %v2086_v22, %v1905_v27  ;;  %v925_v22 = vrot.slane %v8965_v52, 1  ;;  %2858 = vmatpush.bf16.msra.mxu3 %v8219_v15  ;;  %v1976_v39 = vsel %vm1949_vm4, %v1973_v36, %v1975_v23  ;;  %v3326_v36 = vld [vmem:[%s11417_s5] sm:$0xff] }
 0x15e   : > { %v1039_v3 = vpop.f32.mrf.mxu2  ;;  %3364 = vperm.xlu0 %8329, %v3326_v36  }
 0x15f   : > { %v1120_v56 = vadd.f32 %v1039_v3, %v8723_v17  ;;  %v1428_v11 = vpop.f32.mrf.mxu3  ;;  %v1314_v17 = vrot.slane %v8948_v53, 1  ;;  %v926_v38 = vsel %vm899_vm2, %v923_v8, %v925_v22  ;;  %v1677_v3 = vsel %vm1552_vm3, %v1667_v59, %v1676_v40  ;;  %v3328_v53 = vld [vmem:[%s11417_s5 + $0x10] sm:$0xff] }
 0x160   : > { %v1827_v6 = vpop.f32.mrf.mxu0  ;;  %3374 = vperm.xlu1 %8330, %v3328_v53  }
 0x161   : > { %v1509_v18 = vadd.f32 %v1428_v11, %v1120_v56  ;;  %v1315_v11 = vsel %vm899_vm2, %v1312_v19, %v1314_v17  ;;  %v8223_v19 = vld [vmem:[%s11413_s1 + $0x100] sm:$0xff] }
 0x162   : > { %v2091_v2 = vpop.f32.mrf.mxu1  ;;  %3122 = vmatpush.bf16.msra.mxu0 %v8223_v19 }
 0x163   : > { %v1906_v48 = vadd.f32 %v1825_v32, %v1509_v18 }
 0x165   : > { %v8968_v43 = vadd.f32 %v2089_v37, %v1906_v48  ;;  %v8979_v37 = vld [vmem:[%s8447_s14 + $0x78] sm:$0xff] }
 0x166   : > { %v1041_v33 = vpop.f32.mrf.mxu2  ;;  %v1679_v8 = vshrl.u32 %v8979_v37, 16  ;;  %v1682_v59 = vshll.u32 %v8979_v37, 16 }
 0x167   : > { %v1121_v32 = vadd.f32 %v1041_v33, %v8733_v34  ;;  %v1430_v27 = vpop.f32.mrf.mxu3 }
 0x168   : > { %v1830_v62 = vpop.f32.mrf.mxu0  ;;  %v1681_v15 = vrot.slane %v1679_v8, 1  ;;  %v1684_v33 = vrot.slane %v1682_v59, 2  ;;  %v3327_v8 = vld [vmem:[%s11417_s5 + $0x8] sm:$0xff] }
 0x169   : > { %v1510_v56 = vadd.f32 %v1430_v27, %v1121_v32  ;;  %3369 = vperm.xlu0 %8329, %v3327_v8  }
 0x16a   : > { %v2094_v47 = vpop.f32.mrf.mxu1 }
 0x16b   : > { %7274 = vmatmul.msk.bf16.gmra.mxu2 %vm573_vm1, %v926_v38  ;;  %7426 = vmatmul.msk.bf16.gmra.mxu0 %vm573_vm1, %v1677_v3  ;;  %v1907_v34 = vadd.f32 %v1827_v6, %v1510_v56  ;;  %v8336_v3 = vld [vmem:[%s8447_s14 + $0x70] sm:$0xff] }
 0x16c   : > { %7384 = vmatmul.msk.bf16.gmra.mxu3 %vm573_vm1, %v1315_v11  ;;  %v927_v56 = vrot.slane %v8336_v3, 1 }
 0x16d   : > { %7468 = vmatmul.msk.bf16.gmra.mxu1 %vm573_vm1, %v1976_v39  ;;  %v8991_v18 = vadd.f32 %v2091_v2, %v1907_v34  ;;  %v1316_v39 = vrot.slane %v8979_v37, 1  ;;  %v1977_v34 = vrot.slane %v8979_v37, 2 }
 0x16e   : > { %v1044_v6 = vpop.f32.mrf.mxu2 }
 0x16f   : > { %v1122_v48 = vadd.f32 %v1044_v6, %v8753_v57  ;;  %v1433_v2 = vpop.f32.mrf.mxu3  ;;  %v1685_v57 = vor.u32 %v1684_v33, %v1681_v15  ;;  %v1978_v15 = vsel %vm1949_vm4, %v1975_v23, %v1977_v34  ;;  %v3332_v23 = vld [vmem:[%s11417_s5 + $0x30] sm:$0xff] }
 0x170   : > { %v1832_v52 = vpop.f32.mrf.mxu0 }
 0x171   : > { %v1511_v32 = vadd.f32 %v1433_v2, %v1122_v48  ;;  %v1686_v30 = vsel %vm1552_vm3, %v1676_v40, %v1685_v57  ;;  %v1317_v2 = vsel %vm899_vm2, %v1314_v17, %v1316_v39  ;;  %3394 = vperm.xlu0 %8329, %v3332_v23  }
 0x172   : > { %v2096_v27 = vpop.f32.mrf.mxu1 }
 0x173   : > { %v1908_v38 = vadd.f32 %v1830_v62, %v1511_v32  ;;  %v928_v62 = vsel %vm899_vm2, %v925_v22, %v927_v56 }
 0x175   : > { %v9005_v11 = vadd.f32 %v2094_v47, %v1908_v38  ;;  %v9016_v47 = vld [vmem:[%s8447_s14 + $0x80] sm:$0xff] }
 0x176   : > { %v1046_v59 = vpop.f32.mrf.mxu2  ;;  %v1688_v22 = vshrl.u32 %v9016_v47, 16  ;;  %v1691_v40 = vshll.u32 %v9016_v47, 16 }
 0x177   : > { %v1123_v19 = vadd.f32 %v1046_v59, %v8766_v13  ;;  %v1435_v36 = vpop.f32.mrf.mxu3 }
 0x178   : > { %v1835_v6 = vpop.f32.mrf.mxu0  ;;  %v1690_v3 = vrot.slane %v1688_v22, 1  ;;  %v1693_v8 = vrot.slane %v1691_v40, 2 }
 0x179   : > { %v1512_v48 = vadd.f32 %v1435_v36, %v1123_v19  ;;  %v8337_v36 = vld [vmem:[%s8447_s14 + $0x78] sm:$0xff] }
 0x17a   : > { %v2099_v37 = vpop.f32.mrf.mxu1 }
 0x17b   : > { %7275 = vmatmul.msk.bf16.gmra.mxu2 %vm573_vm1, %v928_v62  ;;  %7427 = vmatmul.msk.bf16.gmra.mxu0 %vm573_vm1, %v1686_v30  ;;  %v1909_v13 = vadd.f32 %v1832_v52, %v1512_v48  ;;  %v929_v62 = vrot.slane %v8337_v36, 1  ;;  %v1694_v30 = vor.u32 %v1693_v8, %v1690_v3 }
 0x17c   : > { %7385 = vmatmul.msk.bf16.gmra.mxu3 %vm573_vm1, %v1317_v2  ;;  %v1318_v2 = vrot.slane %v9016_v47, 1 }
 0x17d   : > { %7469 = vmatmul.msk.bf16.gmra.mxu1 %vm573_vm1, %v1978_v15  ;;  %v9028_v17 = vadd.f32 %v2096_v27, %v1909_v13  ;;  %v1979_v15 = vrot.slane %v9016_v47, 2  ;;  %v3335_v13 = vld [vmem:[%s11417_s5 + $0x48] sm:$0xff]  ;;  %v930_v53 = vsel %vm899_vm2, %v927_v56, %v929_v62  ;;  %v1695_v23 = vsel %vm1552_vm3, %v1685_v57, %v1694_v30 }
 0x17e   : > { %v1049_v52 = vpop.f32.mrf.mxu2  ;;  %3409 = vperm.xlu0 %8329, %v3335_v13   ;;  %v9052_v47 = vld [vmem:[%s8447_s14 + $0x88] sm:$0xff] }
 0x17f   : > { %v1124_v33 = vadd.f32 %v1049_v52, %v8780_v35  ;;  %v1438_v32 = vpop.f32.mrf.mxu3  ;;  %v3329_v35 = vld [vmem:[%s11417_s5 + $0x18] sm:$0xff]  ;;  %v1980_v3 = vsel %vm1949_vm4, %v1977_v34, %v1979_v15  ;;  %v1697_v56 = vshrl.u32 %v9052_v47, 16  ;;  %v1700_v57 = vshll.u32 %v9052_v47, 16  ;;  %v3338_v34 = vld [vmem:[%s11417_s5 + $0x60] sm:$0xff] }
 0x180   : > { %v1837_v38 = vpop.f32.mrf.mxu0  ;;  %3379 = vperm.xlu1 %8330, %v3329_v35  }
 0x181   : > { %v1513_v59 = vadd.f32 %v1438_v32, %v1124_v33  ;;  %v1319_v33 = vsel %vm899_vm2, %v1316_v39, %v1318_v2  ;;  %v3333_v39 = vld [vmem:[%s11417_s5 + $0x38] sm:$0xff]  ;;  %v1699_v35 = vrot.slane %v1697_v56, 1  ;;  %v1702_v13 = vrot.slane %v1700_v57, 2 }
 0x182   : > { %v2101_v27 = vpop.f32.mrf.mxu1 }
 0x183   : > { %v1910_v19 = vadd.f32 %v1835_v6, %v1513_v59 }
 0x185   : > { %v9038_v48 = vadd.f32 %v2099_v37, %v1910_v19 }
 0x186   : > { %v1051_v22 = vpop.f32.mrf.mxu2  ;;  %3424 = vperm.xlu0 %8329, %v3338_v34  }
 0x187   : > { %v1125_v6 = vadd.f32 %v1051_v22, %v8790_v49  ;;  %v1440_v40 = vpop.f32.mrf.mxu3 }
 0x188   : > { %v1840_v37 = vpop.f32.mrf.mxu0  ;;  %3399 = vperm.xlu1 %8330, %v3333_v39  }
 0x189   : > { %v1514_v52 = vadd.f32 %v1440_v40, %v1125_v6  ;;  %v8338_v40 = vld [vmem:[%s8447_s14 + $0x80] sm:$0xff] }
 0x18a   : > { %v2104_v32 = vpop.f32.mrf.mxu1 }
 0x18b   : > { %7276 = vmatmul.msk.bf16.gmra.mxu2 %vm573_vm1, %v930_v53  ;;  %7428 = vmatmul.msk.bf16.gmra.mxu0 %vm573_vm1, %v1695_v23  ;;  %v1911_v49 = vadd.f32 %v1837_v38, %v1514_v52  ;;  %v931_v53 = vrot.slane %v8338_v40, 1  ;;  %v1703_v23 = vor.u32 %v1702_v13, %v1699_v35 }
 0x18c   : > { %7386 = vmatmul.msk.bf16.gmra.mxu3 %vm573_vm1, %v1319_v33  ;;  %v1320_v33 = vrot.slane %v9052_v47, 1 }
 0x18d   : > { %7470 = vmatmul.msk.bf16.gmra.mxu1 %vm573_vm1, %v1980_v3  ;;  %v9062_v8 = vadd.f32 %v2101_v27, %v1911_v49  ;;  %v1981_v3 = vrot.slane %v9052_v47, 2  ;;  %v3341_v49 = vld [vmem:[%s11417_s5 + $0x78] sm:$0xff]  ;;  %v932_v39 = vsel %vm899_vm2, %v929_v62, %v931_v53  ;;  %v1704_v34 = vsel %vm1552_vm3, %v1694_v30, %v1703_v23  ;;  %v9088_v47 = vld [vmem:[%s8447_s14 + $0x90] sm:$0xff] }
 0x18e   : > { %v1054_v38 = vpop.f32.mrf.mxu2  ;;  %3439 = vperm.xlu0 %8329, %v3341_v49   ;;  %v1706_v62 = vshrl.u32 %v9088_v47, 16  ;;  %v1709_v30 = vshll.u32 %v9088_v47, 16 }
 0x18f   : > { %v1126_v59 = vadd.f32 %v1054_v38, %v8804_v44  ;;  %v1443_v19 = vpop.f32.mrf.mxu3  ;;  %v3336_v44 = vld [vmem:[%s11417_s5 + $0x50] sm:$0xff]  ;;  %v1982_v35 = vsel %vm1949_vm4, %v1979_v15, %v1981_v3 }
 0x190   : > { %v1842_v36 = vpop.f32.mrf.mxu0  ;;  %3414 = vperm.xlu1 %8330, %v3336_v44   ;;  %v3344_v15 = vld [vmem:[%s11417_s5 + $0x90] sm:$0xff]  ;;  %v1708_v40 = vrot.slane %v1706_v62, 1  ;;  %v1711_v44 = vrot.slane %v1709_v30, 2  ;;  %v3330_v62 = vld [vmem:[%s11417_s5 + $0x20] sm:$0xff]  ;;  %v3347_v30 = vld [vmem:[%s11417_s5 + $0xa8] sm:$0xff] }
 0x191   : > { %v1515_v22 = vadd.f32 %v1443_v19, %v1126_v59  ;;  %v1321_v59 = vsel %vm899_vm2, %v1318_v2, %v1320_v33  ;;  %v3339_v2 = vld [vmem:[%s11417_s5 + $0x68] sm:$0xff]  ;;  %3384 = vperm.xlu2 %8331, %v3330_v62   ;;  %v1186_v62 = vld [vmem:[%s8447_s14 + $0x98] sm:$0x1] }
 0x192   : > { %v9071_v27 = vpop.f32.mrf.mxu1 }
 0x193   : > { %v1912_v6 = vadd.f32 %v1840_v37, %v1515_v22 }
 0x195   : > { %v9074_v52 = vadd.f32 %v2104_v32, %v1912_v6 }
 0x196   : > { %v1056_v56 = vpop.f32.mrf.mxu2  ;;  %3454 = vperm.xlu0 %8329, %v3344_v15  }
 0x197   : > { %v1127_v37 = vadd.f32 %v1056_v56, %v8814_v31  ;;  %v1445_v57 = vpop.f32.mrf.mxu3 }
 0x198   : > { %v1845_v32 = vpop.f32.mrf.mxu0  ;;  %3429 = vperm.xlu1 %8330, %v3339_v2   ;;  %v11419_v2 = vrot.slane %v9088_v47, 2 }
 0x199   : > { %v1516_v38 = vadd.f32 %v1445_v57, %v1127_v37  ;;  %v1539_v37 = vld [vmem:[%s8447_s14 + $0x98] sm:$0x3] }
 0x19a   : > { %v2109_v19 = vpop.f32.mrf.mxu1 }
 0x19b   : > { %7277 = vmatmul.msk.bf16.gmra.mxu2 %vm573_vm1, %v932_v39  ;;  %7429 = vmatmul.msk.bf16.gmra.mxu0 %vm573_vm1, %v1704_v34  ;;  %v9094_v31 = vadd.f32 %v1842_v36, %v1516_v38  ;;  %v9111_v39 = vld [vmem:[%s8447_s14 + $0x88] sm:$0xff]  ;;  %v9114_v38 = vor.u32 %v1711_v44, %v1708_v40 }
 0x19c   : > { %7387 = vmatmul.msk.bf16.gmra.mxu3 %vm573_vm1, %v1321_v59  ;;  %v11421_v34 = vrot.slane %v9111_v39, 1  ;;  %v1550_v59 = vunpack.c.l.b16 %v1539_v37 }
 0x19d   : > { %7471 = vmatmul.msk.bf16.gmra.mxu1 %vm573_vm1, %v1982_v35  ;;  %v1713_v40 = vsel %vm1552_vm3, %v1703_v23, %v9114_v38 }
 0x19e   : > { %v1059_v36 = vpop.f32.mrf.mxu2  ;;  %3469 = vperm.xlu0 %8329, %v3347_v30   ;;  %v1551_v44 = vpack.c.b16 %v1550_v59, %v1550_v59 }
 0x19f   : > { %v1128_v13 = vadd.f32 %v1059_v36, %v8828_v0  ;;  %v1448_v22 = vpop.f32.mrf.mxu3  ;;  %v11420_v0 = vrot.slane %v9088_v47, 1 }
 0x1a0   : > { %v1847_v6 = vpop.f32.mrf.mxu0  ;;  %v1715_v23 = vshrl.u32 %v1551_v44, 16  ;;  %v1718_v59 = vshll.u32 %v1551_v44, 16 }
 0x1a1   : > { %v1517_v49 = vadd.f32 %v1448_v22, %v1128_v13  ;;  %v934_v22 = vsel %vm899_vm2, %v931_v53, %v11421_v34  ;;  %v1323_v37 = vsel %vm899_vm2, %v1320_v33, %v11420_v0  ;;  %v3331_v33 = vld [vmem:[%s11417_s5 + $0x28] sm:$0xff]  ;;  %v935_v34 = vrot.slane %v8620_v9, 1  ;;  %v3353_v9 = vld [vmem:[%s11417_s5 + $0xd8] sm:$0xff] }
 0x1a2   : > { %v9107_v56 = vpop.f32.mrf.mxu1  ;;  %3389 = vperm.xlu2 %8331, %v3331_v33  }
 0x1a3   : > { %11467 = vst [vmem:[#allocation3_spill] sm:$0xff] %v9107_v56  ;;  %v1914_v57 = vadd.f32 %v1845_v32, %v1517_v49  ;;  %v3342_v32 = vld [vmem:[%s11417_s5 + $0x80] sm:$0xff] }
 0x1a4   : > { %3444 = vperm.xlu1 %8330, %v3342_v32   ;;  %v1269_v32 = vunpack.c.l.b16 %v1186_v62  ;;  %v2200_v62 = vld [vmem:[%s8447_s14 + $0x10] sm:$0xc] }
 0x1a5   : > { %v9116_v35 = vadd.f32 %v2109_v19, %v1914_v57 }
 0x1a6   : > { %v1061_v15 = vpop.f32.mrf.mxu2 }
 0x1a7   : > { %v1129_v19 = vadd.f32 %v1061_v15, %v8838_v7  ;;  %v1450_v36 = vpop.f32.mrf.mxu3  ;;  %v1984_v7 = vsel %vm1949_vm4, %v1981_v3, %v11419_v2  ;;  %v3345_v3 = vld [vmem:[%s11417_s5 + $0x98] sm:$0xff]  ;;  %v2201_v2 = vld [vmem:[%s8447_s14 + $0x14] sm:$0xf] }
 0x1a8   : > { %v1850_v13 = vpop.f32.mrf.mxu0  ;;  %v2284_v33 = vunpack.c.l.b16 %v2201_v2 }
 0x1a9   : > { %v1518_v49 = vadd.f32 %v1450_v36, %v1129_v19 }
 0x1aa   : > { %v2114_v57 = vpop.f32.mrf.mxu1 }
 0x1ab   : > { %7278 = vmatmul.msk.bf16.gmra.mxu2 %vm573_vm1, %v934_v22  ;;  %7430 = vmatmul.msk.bf16.gmra.mxu0 %vm573_vm1, %v1713_v40  ;;  %v9144_v53 = vadd.f32 %v1847_v6, %v1518_v49  ;;  %v3350_v6 = vld [vmem:[%s11417_s5 + $0xc0] sm:$0xff]  ;;  %v1717_v22 = vrot.slane %v1715_v23, 1  ;;  %v1720_v40 = vrot.slane %v1718_v59, 2  ;;  %v3348_v59 = vld [vmem:[%s11417_s5 + $0xb0] sm:$0xff] }
 0x1ac   : > { %7388 = vmatmul.msk.bf16.gmra.mxu3 %vm573_vm1, %v1323_v37  ;;  %3459 = vperm.xlu1 %8330, %v3345_v3   ;;  %v1288_v37 = vpack.c.b16 %v1269_v32, %v1269_v32  ;;  %v3334_v23 = vld [vmem:[%s11417_s5 + $0x40] sm:$0xff] }
 0x1ad   : > { %11468 = vst [vmem:[#allocation4_spill] sm:$0xff] %v9144_v53  ;;  %7472 = vmatmul.msk.bf16.gmra.mxu1 %vm573_vm1, %v1984_v7  ;;  %3484 = vperm.xlu0 %8329, %v3350_v6   ;;  %v1721_v56 = vor.u32 %v1720_v40, %v1717_v22  ;;  %v2283_v53 = vunpack.c.l.b16 %v2200_v62  ;;  %v11471_v22 = vrot.slane %v9088_v47, 1  ;;  %v9187_v62 = vld [vmem:[%s8447_s14 + $0x18] sm:$0xff] }
 0x1ae   : > { %v1064_v30 = vpop.f32.mrf.mxu2  ;;  %3404 = vperm.xlu2 %8331, %v3334_v23   ;;  %v2986_v23 = vld [vmem:[%s8447_s14 + $0x10] sm:$0x8] }
 0x1af   : > { %v1130_v15 = vadd.f32 %v1064_v30, %v8852_v63  ;;  %v1453_v19 = vpop.f32.mrf.mxu3  ;;  %v1324_v63 = vrot.slane %v1288_v37, 1  ;;  %v1985_v30 = vrot.slane %v1551_v44, 2  ;;  %v1722_v6 = vsel %vm1552_vm3, %v9114_v38, %v1721_v56 }
 0x1b0   : > { %v1852_v36 = vpop.f32.mrf.mxu0  ;;  %v11472_v37 = vrot.slane %v9088_v47, 2  ;;  %v2612_v47 = vshrl.u32 %v9187_v62, 16 }
 0x1b1   : > { %v1519_v49 = vadd.f32 %v1453_v19, %v1130_v15  ;;  %v2320_v15 = vpack.c.b16 %v2284_v33, %v2283_v53  ;;  %v1325_v40 = vsel %vm899_vm2, %v11471_v22, %v1324_v63  ;;  %v2615_v53 = vshll.u32 %v9187_v62, 16  ;;  %v3337_v63 = vld [vmem:[%s11417_s5 + $0x58] sm:$0xff] }
 0x1b2   : > { %v9158_v7 = vpop.f32.mrf.mxu1 }
 0x1b3   : > { %11469 = vst [vmem:[#allocation5_spill] sm:$0xff] %v9158_v7  ;;  %v1916_v0 = vadd.f32 %v1850_v13, %v1519_v49  ;;  %v2604_v56 = vshrl.u32 %v2320_v15, 16  ;;  %v2607_v38 = vshll.u32 %v2320_v15, 16  ;;  %v2617_v22 = vrot.slane %v2615_v53, 3 }
 0x1b4   : > { %3474 = vperm.xlu1 %8330, %v3348_v59  }
 0x1b5   : > { %v9163_v3 = vadd.f32 %v2114_v57, %v1916_v0  ;;  %3499 = vperm.xlu0 %8329, %v3353_v9   ;;  %v11470_v57 = vrot.slane %v9111_v39, 1 }
 0x1b6   : > { %v1066_v13 = vpop.f32.mrf.mxu2  ;;  %3419 = vperm.xlu2 %8331, %v3337_v63   ;;  %v3001_v63 = vrot.slane %v9187_v62, 3 }
 0x1b7   : > { %v1131_v0 = vadd.f32 %v1066_v13, %v8868_v55  ;;  %v1455_v2 = vpop.f32.mrf.mxu3  ;;  %v936_v32 = vsel %vm899_vm2, %v11470_v57, %v935_v34  ;;  %v1986_v55 = vsel %vm1949_vm4, %v11472_v37, %v1985_v30  ;;  %v2997_v34 = vunpack.c.l.b16 %v2986_v23  ;;  %v3356_v30 = vld [vmem:[%s11417_s5 + $0xf0] sm:$0xff] }
 0x1b8   : > { %v1855_v44 = vpop.f32.mrf.mxu0  ;;  %v2340_v23 = vrot.slane %v9187_v62, 2 }
 0x1b9   : > { %v1520_v19 = vadd.f32 %v1455_v2, %v1131_v0  ;;  %v2606_v2 = vrot.slane %v2604_v56, 2  ;;  %v2998_v57 = vpack.c.b16 %v2284_v33, %v2997_v34  ;;  %v3340_v33 = vld [vmem:[%s11417_s5 + $0x70] sm:$0xff] }
 0x1ba   : > { %v2119_v49 = vpop.f32.mrf.mxu1 }
 0x1bb   : > { %7279 = vmatmul.msk.bf16.gmra.mxu2 %vm573_vm1, %v936_v32  ;;  %7431 = vmatmul.msk.bf16.gmra.mxu0 %vm573_vm1, %v1722_v6  ;;  %v9192_v39 = vadd.f32 %v1852_v36, %v1520_v19  ;;  %v3351_v36 = vld [vmem:[%s11417_s5 + $0xc8] sm:$0xff]  ;;  %v2609_v6 = vrot.slane %v2607_v38, 3  ;;  %v2614_v19 = vrot.slane %v2612_v47, 2  ;;  %v3000_v7 = vrot.slane %v2998_v57, 3 }
 0x1bc   : > { %7389 = vmatmul.msk.bf16.gmra.mxu3 %vm573_vm1, %v1325_v40  ;;  %3489 = vperm.xlu1 %8330, %v3351_v36  }
 0x1bd   : > { %7473 = vmatmul.msk.bf16.gmra.mxu1 %vm573_vm1, %v1986_v55  ;;  %3514 = vperm.xlu0 %8329, %v3356_v30   ;;  %v2339_v55 = vrot.slane %v2320_v15, 2  ;;  %v2618_v30 = vor.u32 %v2617_v22, %v2614_v19  ;;  %v3359_v15 = vld [vmem:[%s11417_s5 + $0x108] sm:$0xff]  ;;  %v3002_v47 = vsel %vm2999_vm6, %v3000_v7, %v3001_v63 }
 0x1be   : > { %v1069_v59 = vpop.f32.mrf.mxu2  ;;  %3434 = vperm.xlu2 %8331, %v3340_v33  }
 0x1bf   : > { %v1132_v9 = vadd.f32 %v1069_v59, %v8659_v50  ;;  %v1458_v13 = vpop.f32.mrf.mxu3  ;;  %v2610_v50 = vor.u32 %v2609_v6, %v2606_v2  ;;  %v2341_v38 = vsel %vm1949_vm4, %v2339_v55, %v2340_v23  ;;  %v3357_v6 = vld [vmem:[%s11417_s5 + $0xf8] sm:$0xff] }
 0x1c0   : > { %v1857_v0 = vpop.f32.mrf.mxu0 }
 0x1c1   : > { %v1521_v32 = vadd.f32 %v1458_v13, %v1132_v9  ;;  %v2619_v59 = vsel %vm2602_vm7, %v2610_v50, %v2618_v30  ;;  %v9228_v13 = vld [vmem:[%s8447_s14 + $0x20] sm:$0xff] }
 0x1c2   : > { %v9208_v40 = vpop.f32.mrf.mxu1  ;;  %v2621_v7 = vshrl.u32 %v9228_v13, 16  ;;  %v2624_v57 = vshll.u32 %v9228_v13, 16 }
 0x1c3   : > { %v1918_v37 = vadd.f32 %v1855_v44, %v1521_v32  ;;  %v3354_v44 = vld [vmem:[%s11417_s5 + $0xe0] sm:$0xff]  ;;  %v3343_v32 = vld [vmem:[%s11417_s5 + $0x88] sm:$0xff] }
 0x1c4   : > { %3504 = vperm.xlu1 %8330, %v3354_v44   ;;  %v2623_v50 = vrot.slane %v2621_v7, 2  ;;  %v2626_v33 = vrot.slane %v2624_v57, 3 }
 0x1c5   : > { %v9212_v36 = vadd.f32 %v2119_v49, %v1918_v37  ;;  %3529 = vperm.xlu0 %8329, %v3359_v15  }
 0x1c6   : > { %v1071_v56 = vpop.f32.mrf.mxu2  ;;  %3449 = vperm.xlu2 %8331, %v3343_v32  }
 0x1c7   : > { %v1133_v49 = vadd.f32 %v1071_v56, %v8666_v10  ;;  %v1460_v62 = vpop.f32.mrf.mxu3  ;;  %v8246_v10 = vld [vmem:[%s11415_s3 + $0x10] sm:$0xff]  ;;  %v2342_v56 = vrot.slane %v9228_v13, 2 }
 0x1c8   : > { %v1860_v34 = vpop.f32.mrf.mxu0  ;;  %4434 = vmatpush.bf16.msra.mxu1 %v8246_v10 }
 0x1c9   : > { %v1522_v53 = vadd.f32 %v1460_v62, %v1133_v49  ;;  %v3003_v49 = vrot.slane %v9228_v13, 3  ;;  %v2343_v13 = vsel %vm1949_vm4, %v2340_v23, %v2342_v56 }
 0x1ca   : > { %v2124_v9 = vpop.f32.mrf.mxu1 }
 0x1cb   : > { %7566 = vmatmul.msk.bf16.vlgmr.msra.gmra.mxu2 %vm573_vm1, %v2341_v38  ;;  %7650 = vmatmul.msk.bf16.vlgmr.msra.gmra.mxu0 %vm573_vm1, %v3002_v47  ;;  %v9232_v2 = vadd.f32 %v1857_v0, %v1522_v53  ;;  %v2627_v38 = vor.u32 %v2626_v33, %v2623_v50  ;;  %v3360_v47 = vld [vmem:[%s11417_s5 + $0x110] sm:$0xff] }
 0x1cc   : > { %7608 = vmatmul.msk.bf16.vlgmr.msra.gmra.mxu3 %vm573_vm1, %v2619_v59  ;;  %3519 = vperm.xlu1 %8330, %v3357_v6   ;;  %v9264_v6 = vld [vmem:[%s8447_s14 + $0x28] sm:$0xff] }
 0x1cd   : > { %v2628_v57 = vsel %vm2602_vm7, %v2618_v30, %v2627_v38  ;;  %v2633_v23 = vshll.u32 %v9264_v6, 16 }
 0x1ce   : > { %v1074_v0 = vpop.f32.mrf.mxu2 }
 0x1cf   : > { %v1134_v19 = vadd.f32 %v1074_v0, %v8683_v25  ;;  %v1463_v22 = vpop.f32.mrf.mxu3  ;;  %v3346_v25 = vld [vmem:[%s11417_s5 + $0xa0] sm:$0xff] }
 0x1d0   : > { %v1862_v37 = vpop.f32.mrf.mxu0  ;;  %3464 = vperm.xlu2 %8331, %v3346_v25  }
 0x1d1   : > { %v1523_v55 = vadd.f32 %v1463_v22, %v1134_v19 }
 0x1d2   : > { %v9247_v44 = vpop.f32.mrf.mxu1 }
 0x1d3   : > { %v1920_v15 = vadd.f32 %v1860_v34, %v1523_v55 }
 0x1d4   : > { %3534 = vperm.xlu1 %8330, %v3360_v47   ;;  %v2344_v47 = vrot.slane %v9264_v6, 2 }
 0x1d5   : > { %v9251_v62 = vadd.f32 %v2124_v9, %v1920_v15  ;;  %v3004_v9 = vsel %vm2999_vm6, %v3001_v63, %v3003_v49  ;;  %v3349_v63 = vld [vmem:[%s11417_s5 + $0xb8] sm:$0xff] }
 0x1d6   : > { %v1076_v53 = vpop.f32.mrf.mxu2 }
 0x1d7   : > { %v1135_v34 = vadd.f32 %v1076_v53, %v8690_v20  ;;  %v1465_v59 = vpop.f32.mrf.mxu3  ;;  %v2630_v20 = vshrl.u32 %v9264_v6, 16  ;;  %v3005_v53 = vrot.slane %v9264_v6, 3 }
 0x1d8   : > { %v1865_v10 = vpop.f32.mrf.mxu0  ;;  %3479 = vperm.xlu2 %8331, %v3349_v63   ;;  %v8201_v63 = vld [vmem:[%s8447_s14 + $0x30] sm:$0xff] }
 0x1d9   : > { %v1524_v7 = vadd.f32 %v1465_v59, %v1135_v34  ;;  %v2632_v33 = vrot.slane %v2630_v20, 2  ;;  %v3006_v20 = vsel %vm2999_vm6, %v3003_v49, %v3005_v53 }
 0x1da   : > { %v2129_v32 = vpop.f32.mrf.mxu1 }
 0x1db   : > { %7567 = vmatmul.msk.bf16.gmra.mxu2 %vm573_vm1, %v2343_v13  ;;  %7651 = vmatmul.msk.bf16.gmra.mxu0 %vm573_vm1, %v3004_v9  ;;  %v9268_v0 = vadd.f32 %v1862_v37, %v1524_v7  ;;  %v2635_v37 = vrot.slane %v2633_v23, 3 }
 0x1dc   : > { %7609 = vmatmul.msk.bf16.gmra.mxu3 %vm573_vm1, %v2628_v57 }
 0x1dd   : > { %v2636_v59 = vor.u32 %v2635_v37, %v2632_v33 }
 0x1de   : > { %v1079_v30 = vpop.f32.mrf.mxu2 }
 0x1df   : > { %v1136_v19 = vadd.f32 %v1079_v30, %v8707_v54  ;;  %v1468_v22 = vpop.f32.mrf.mxu3  ;;  %v3352_v54 = vld [vmem:[%s11417_s5 + $0xd0] sm:$0xff]  ;;  %v2637_v6 = vsel %vm2602_vm7, %v2627_v38, %v2636_v59 }
 0x1e0   : > { %v1867_v55 = vpop.f32.mrf.mxu0  ;;  %3494 = vperm.xlu2 %8331, %v3352_v54  }
 0x1e1   : > { %v1525_v50 = vadd.f32 %v1468_v22, %v1136_v19  ;;  %v2642_v19 = vshll.u32 %v8201_v63, 16 }
 0x1e2   : > { %v9277_v15 = vpop.f32.mrf.mxu1 }
 0x1e3   : > { %v1922_v25 = vadd.f32 %v1865_v10, %v1525_v50  ;;  %v2345_v10 = vsel %vm1949_vm4, %v2342_v56, %v2344_v47  ;;  %v3355_v56 = vld [vmem:[%s11417_s5 + $0xe8] sm:$0xff] }
 0x1e5   : > { %v9281_v34 = vadd.f32 %v2129_v32, %v1922_v25  ;;  %v2644_v25 = vrot.slane %v2642_v19, 3 }
 0x1e6   : > { %v1081_v13 = vpop.f32.mrf.mxu2 }
 0x1e7   : > { %v1137_v9 = vadd.f32 %v1081_v13, %v8714_v5  ;;  %v1470_v7 = vpop.f32.mrf.mxu3  ;;  %v2639_v5 = vshrl.u32 %v8201_v63, 16  ;;  %v2346_v13 = vrot.slane %v8201_v63, 2 }
 0x1e8   : > { %v1870_v57 = vpop.f32.mrf.mxu0  ;;  %3509 = vperm.xlu2 %8331, %v3355_v56  }
 0x1e9   : > { %v1526_v23 = vadd.f32 %v1470_v7, %v1137_v9  ;;  %v2641_v37 = vrot.slane %v2639_v5, 2  ;;  %v3007_v9 = vrot.slane %v8201_v63, 3  ;;  %v2347_v19 = vsel %vm1949_vm4, %v2344_v47, %v2346_v13  ;;  %v3361_v47 = vld [vmem:[%s11417_s5 + $0x118] sm:$0xff] }
 0x1ea   : > { %v2134_v32 = vpop.f32.mrf.mxu1 }
 0x1eb   : > { %7568 = vmatmul.msk.bf16.gmra.mxu2 %vm573_vm1, %v2345_v10  ;;  %7652 = vmatmul.msk.bf16.gmra.mxu0 %vm573_vm1, %v3006_v20  ;;  %v9293_v30 = vadd.f32 %v1867_v55, %v1526_v23  ;;  %v2645_v10 = vor.u32 %v2644_v25, %v2641_v37  ;;  %v3358_v20 = vld [vmem:[%s11417_s5 + $0x100] sm:$0xff] }
 0x1ec   : > { %7610 = vmatmul.msk.bf16.gmra.mxu3 %vm573_vm1, %v2637_v6 }
 0x1ed   : > { %v2646_v63 = vsel %vm2602_vm7, %v2636_v59, %v2645_v10 }
 0x1ee   : > { %v1084_v49 = vpop.f32.mrf.mxu2 }
 0x1ef   : > { %v1138_v38 = vadd.f32 %v1084_v49, %v8731_v26  ;;  %v1473_v22 = vpop.f32.mrf.mxu3  ;;  %v8202_v49 = vld [vmem:[%s8447_s14 + $0x38] sm:$0xff] }
 0x1f0   : > { %v1872_v50 = vpop.f32.mrf.mxu0  ;;  %3524 = vperm.xlu2 %8331, %v3358_v20  }
 0x1f1   : > { %v1527_v33 = vadd.f32 %v1473_v22, %v1138_v38  ;;  %v2651_v22 = vshll.u32 %v8202_v49, 16 }
 0x1f2   : > { %v9300_v54 = vpop.f32.mrf.mxu1 }
 0x1f3   : > { %11473 = vst [vmem:[#allocation6_spill] sm:$0xff] %v9300_v54  ;;  %v1924_v55 = vadd.f32 %v1870_v57, %v1527_v33  ;;  %v3008_v57 = vsel %vm2999_vm6, %v3005_v53, %v3007_v9  ;;  %v2653_v20 = vrot.slane %v2651_v22, 3 }
 0x1f5   : > { %v9302_v7 = vadd.f32 %v2134_v32, %v1924_v55 }
 0x1f6   : > { %v1086_v23 = vpop.f32.mrf.mxu2 }
 0x1f7   : > { %v1139_v26 = vadd.f32 %v1086_v23, %v8744_v46  ;;  %v1475_v6 = vpop.f32.mrf.mxu3  ;;  %v2648_v46 = vshrl.u32 %v8202_v49, 16 }
 0x1f8   : > { %v1875_v5 = vpop.f32.mrf.mxu0  ;;  %3539 = vperm.xlu2 %8331, %v3361_v47  }
 0x1f9   : > { %v1528_v56 = vadd.f32 %v1475_v6, %v1139_v26  ;;  %v2650_v55 = vrot.slane %v2648_v46, 2  ;;  %v2348_v26 = vrot.slane %v8202_v49, 2  ;;  %v3009_v6 = vrot.slane %v8202_v49, 3 }
 0x1fa   : > { %v2139_v32 = vpop.f32.mrf.mxu1 }
 0x1fb   : > { %7569 = vmatmul.msk.bf16.gmra.mxu2 %vm573_vm1, %v2347_v19  ;;  %7653 = vmatmul.msk.bf16.gmra.mxu0 %vm573_vm1, %v3008_v57  ;;  %v9314_v38 = vadd.f32 %v1872_v50, %v1528_v56  ;;  %v2654_v57 = vor.u32 %v2653_v20, %v2650_v55 }
 0x1fc   : > { %7611 = vmatmul.msk.bf16.gmra.mxu3 %vm573_vm1, %v2646_v63 }
 0x1fd   : > { %v2655_v22 = vsel %vm2602_vm7, %v2645_v10, %v2654_v57 }
 0x1fe   : > { %v1089_v53 = vpop.f32.mrf.mxu2 }
 0x1ff   : > { %v1140_v59 = vadd.f32 %v1089_v53, %v8764_v1  ;;  %v1478_v33 = vpop.f32.mrf.mxu3  ;;  %v2349_v1 = vsel %vm1949_vm4, %v2346_v13, %v2348_v26  ;;  %v3010_v53 = vsel %vm2999_vm6, %v3007_v9, %v3009_v6 }
 0x200   : > { %v1877_v37 = vpop.f32.mrf.mxu0 }
 0x201   : > { %v1529_v25 = vadd.f32 %v1478_v33, %v1140_v59  ;;  %v8203_v33 = vld [vmem:[%s8447_s14 + $0x40] sm:$0xff] }
 0x202   : > { %v9321_v50 = vpop.f32.mrf.mxu1 }
 0x203   : > { %11474 = vst [vmem:[#allocation7_spill] sm:$0xff] %v9321_v50  ;;  %v1926_v23 = vadd.f32 %v1875_v5, %v1529_v25 }
 0x205   : > { %v9323_v19 = vadd.f32 %v2139_v32, %v1926_v23  ;;  %v2660_v32 = vshll.u32 %v8203_v33, 16 }
 0x206   : > { %v1091_v56 = vpop.f32.mrf.mxu2 }
 0x207   : > { %v1141_v63 = vadd.f32 %v1091_v56, %v8771_v21  ;;  %v1480_v47 = vpop.f32.mrf.mxu3  ;;  %v2657_v21 = vshrl.u32 %v8203_v33, 16  ;;  %v2662_v10 = vrot.slane %v2660_v32, 3 }
 0x208   : > { %v1880_v54 = vpop.f32.mrf.mxu0 }
 0x209   : > { %v1530_v46 = vadd.f32 %v1480_v47, %v1141_v63  ;;  %v2659_v20 = vrot.slane %v2657_v21, 2  ;;  %v2350_v63 = vrot.slane %v8203_v33, 2  ;;  %v3011_v47 = vrot.slane %v8203_v33, 3 }
 0x20a   : > { %v2144_v59 = vpop.f32.mrf.mxu1 }
 0x20b   : > { %7570 = vmatmul.msk.bf16.gmra.mxu2 %vm573_vm1, %v2349_v1  ;;  %7654 = vmatmul.msk.bf16.gmra.mxu0 %vm573_vm1, %v3010_v53  ;;  %v9332_v5 = vadd.f32 %v1877_v37, %v1530_v46  ;;  %v2663_v1 = vor.u32 %v2662_v10, %v2659_v20 }
 0x20c   : > { %7612 = vmatmul.msk.bf16.gmra.mxu3 %vm573_vm1, %v2655_v22 }
 0x20d   : > { %v2664_v32 = vsel %vm2602_vm7, %v2654_v57, %v2663_v1 }
 0x20e   : > { %v1094_v49 = vpop.f32.mrf.mxu2 }
 0x20f   : > { %v1142_v13 = vadd.f32 %v1094_v49, %v8788_v45  ;;  %v1483_v25 = vpop.f32.mrf.mxu3  ;;  %v2351_v45 = vsel %vm1949_vm4, %v2348_v26, %v2350_v63  ;;  %v3012_v49 = vsel %vm2999_vm6, %v3009_v6, %v3011_v47 }
 0x210   : > { %v1882_v9 = vpop.f32.mrf.mxu0 }
 0x211   : > { %v1531_v55 = vadd.f32 %v1483_v25, %v1142_v13  ;;  %v8204_v13 = vld [vmem:[%s8447_s14 + $0x48] sm:$0xff] }
 0x212   : > { %v9336_v23 = vpop.f32.mrf.mxu1 }
 0x213   : > { %11475 = vst [vmem:[#allocation8_spill] sm:$0xff] %v9336_v23  ;;  %v1928_v56 = vadd.f32 %v1880_v54, %v1531_v55 }
 0x215   : > { %v9338_v37 = vadd.f32 %v2144_v59, %v1928_v56  ;;  %v2669_v59 = vshll.u32 %v8204_v13, 16 }
 0x216   : > { %v1096_v53 = vpop.f32.mrf.mxu2 }
 0x217   : > { %v1143_v46 = vadd.f32 %v1096_v53, %v8795_v61  ;;  %v1485_v22 = vpop.f32.mrf.mxu3  ;;  %v2666_v61 = vshrl.u32 %v8204_v13, 16  ;;  %v2671_v10 = vrot.slane %v2669_v59, 3  ;;  %v2352_v53 = vrot.slane %v8204_v13, 2 }
 0x218   : > { %v1885_v50 = vpop.f32.mrf.mxu0 }
 0x219   : > { %v1532_v21 = vadd.f32 %v1485_v22, %v1143_v46  ;;  %v2668_v57 = vrot.slane %v2666_v61, 2  ;;  %v3013_v46 = vrot.slane %v8204_v13, 3 }
 0x21a   : > { %v2149_v25 = vpop.f32.mrf.mxu1 }
 0x21b   : > { %7571 = vmatmul.msk.bf16.gmra.mxu2 %vm573_vm1, %v2351_v45  ;;  %7655 = vmatmul.msk.bf16.gmra.mxu0 %vm573_vm1, %v3012_v49  ;;  %v9347_v54 = vadd.f32 %v1882_v9, %v1532_v21  ;;  %v2672_v45 = vor.u32 %v2671_v10, %v2668_v57 }
 0x21c   : > { %7613 = vmatmul.msk.bf16.gmra.mxu3 %vm573_vm1, %v2664_v32 }
 0x21d   : > { %11476 = vst [vmem:[#allocation9_spill] sm:$0xff] %v9347_v54 }
 0x21e   : > { %v1099_v33 = vpop.f32.mrf.mxu2 }
 0x21f   : > { %v1144_v26 = vadd.f32 %v1099_v33, %v8812_v24  ;;  %v1488_v55 = vpop.f32.mrf.mxu3  ;;  %v2353_v24 = vsel %vm1949_vm4, %v2350_v63, %v2352_v53  ;;  %v3014_v33 = vsel %vm2999_vm6, %v3011_v47, %v3013_v46 }
 0x220   : > { %v1887_v6 = vpop.f32.mrf.mxu0 }
 0x221   : > { %v1533_v20 = vadd.f32 %v1488_v55, %v1144_v26  ;;  %v9359_v26 = vld [vmem:[%s8447_s14 + $0x50] sm:$0xff] }
 0x222   : > { %v9351_v22 = vpop.f32.mrf.mxu1 }
 0x223   : > { %v1930_v56 = vadd.f32 %v1885_v50, %v1533_v20  ;;  %11477 = vst [vmem:[#allocation10_spill] sm:$0xff] %v9351_v22  ;;  %v2673_v50 = vsel %vm2602_vm7, %v2663_v1, %v2672_v45 }
 0x225   : > { %v9353_v9 = vadd.f32 %v2149_v25, %v1930_v56  ;;  %v2678_v25 = vshll.u32 %v9359_v26, 16 }
 0x226   : > { %v1101_v49 = vpop.f32.mrf.mxu2 }
 0x227   : > { %11478 = vst [vmem:[#allocation11_spill] sm:$0xff] %v9353_v9  ;;  %v1145_v21 = vadd.f32 %v1101_v49, %v8819_v41  ;;  %v1490_v32 = vpop.f32.mrf.mxu3  ;;  %v2675_v41 = vshrl.u32 %v9359_v26, 16  ;;  %v2680_v1 = vrot.slane %v2678_v25, 3 }
 0x228   : > { %v1890_v23 = vpop.f32.mrf.mxu0 }
 0x229   : > { %v1534_v61 = vadd.f32 %v1490_v32, %v1145_v21  ;;  %v2677_v57 = vrot.slane %v2675_v41, 2  ;;  %v3015_v21 = vrot.slane %v9359_v26, 3 }
 0x22a   : > { %v2154_v59 = vpop.f32.mrf.mxu1 }
 0x22b   : > { %7572 = vmatmul.msk.bf16.gmra.mxu2 %vm573_vm1, %v2353_v24  ;;  %7656 = vmatmul.msk.bf16.gmra.mxu0 %vm573_vm1, %v3014_v33  ;;  %v9364_v13 = vadd.f32 %v1887_v6, %v1534_v61  ;;  %v2354_v6 = vrot.slane %v9359_v26, 2  ;;  %v2681_v49 = vor.u32 %v2680_v1, %v2677_v57  ;;  %v3016_v25 = vsel %vm2999_vm6, %v3013_v46, %v3015_v21  ;;  %v3584_v26 = vld [vmem:[#allocation2 + $0x8] sm:$0x3] }
 0x22c   : > { %7614 = vmatmul.msk.bf16.gmra.mxu3 %vm573_vm1, %v2673_v50 }
 0x22d   : > { %11479 = vst [vmem:[#allocation12_spill] sm:$0xff] %v9364_v13  ;;  %v2682_v41 = vsel %vm2602_vm7, %v2672_v45, %v2681_v49  ;;  %v3585_v45 = vsel %vm9384_vm11, 0, %v3584_v26 }
 0x22e   : > { %v1104_v63 = vpop.f32.mrf.mxu2  ;;  %3586 = vst [vmem:[#allocation2 + $0x8] sm:$0x3] %v3585_v45 }
 0x22f   : > { %v1146_v47 = vadd.f32 %v1104_v63, %v8836_v4  ;;  %v1493_v55 = vpop.f32.mrf.mxu3  ;;  %v2355_v4 = vsel %vm1949_vm4, %v2352_v53, %v2354_v6  ;;  %v3590_v53 = vld [vmem:[#allocation2 + $0x98] sm:$0xe] }
 0x230   : > { %v1892_v20 = vpop.f32.mrf.mxu0 }
 0x231   : > { %v1535_v10 = vadd.f32 %v1493_v55, %v1146_v47  ;;  %v3591_v55 = vsel %vm9394_vm13, 0, %v3590_v53 }
 0x232   : > { %v9378_v63 = vpop.f32.mrf.mxu1  ;;  %3592 = vst [vmem:[#allocation2 + $0x98] sm:$0xe] %v3591_v55 }
 0x233   : > { %v1932_v56 = vadd.f32 %v1890_v23, %v1535_v10  ;;  %11481 = vst [vmem:[#allocation14_spill] sm:$0xff] %v9378_v63  ;;  %v9381_v23 = vld [vmem:[%s8447_s14 + $0x58] sm:$0xff] }
 0x234   : > { %v2684_v57 = vshrl.u32 %v9381_v23, 16  ;;  %v2687_v1 = vshll.u32 %v9381_v23, 16  ;;  %v3017_v26 = vrot.slane %v9381_v23, 3 }
 0x235   : > { %v9372_v32 = vadd.f32 %v2154_v59, %v1932_v56 }
 0x236   : > { %v1106_v24 = vpop.f32.mrf.mxu2 }
 0x237   : > { %11480 = vst [vmem:[#allocation13_spill] sm:$0xff] %v9372_v32  ;;  %v1147_v33 = vadd.f32 %v1106_v24, %v8843_v28  ;;  %v1495_v61 = vpop.f32.mrf.mxu3  ;;  %v11482_v28 = vmov 0 }
 0x238   : > { %v1895_v50 = vpop.f32.mrf.mxu0  ;;  %v11483_v28 = vsel %vm9384_vm11, 4294967295, %v11482_v28 }
 0x239   : > { %v1536_v47 = vadd.f32 %v1495_v61, %v1147_v33  ;;  %11484 = vst [vmem:[#allocation15_spill] sm:$0xff] %v11483_v28  ;;  %v2686_v61 = vrot.slane %v2684_v57, 2  ;;  %v3018_v57 = vsel %vm2999_vm6, %v3015_v21, %v3017_v26 }
 0x23b   : > { %7573 = vmatmul.msk.bf16.gmra.mxu2 %vm573_vm1, %v2355_v4  ;;  %7657 = vmatmul.msk.bf16.gmra.mxu0 %vm573_vm1, %v3016_v25  ;;  %v9390_v46 = vadd.f32 %v1892_v20, %v1536_v47  ;;  %v2689_v4 = vrot.slane %v2687_v1, 3  ;;  %v2159_v25 = vpop.f32.mrf.mxu1  ;;  %v2356_v47 = vrot.slane %v9381_v23, 2 }
 0x23c   : > { %7615 = vmatmul.msk.bf16.gmra.mxu3 %vm573_vm1, %v2682_v41 }
 0x23d   : > { %11485 = vst [vmem:[#allocation16_spill] sm:$0xff] %v9390_v46  ;;  %v2690_v45 = vor.u32 %v2689_v4, %v2686_v61 }
 0x23e   : > { %v1109_v20 = vpop.f32.mrf.mxu2 }
 0x23f   : > { %v1148_v10 = vadd.f32 %v1109_v20, %v8866_v51  ;;  %v1498_v56 = vpop.f32.mrf.mxu3  ;;  %v2357_v20 = vsel %vm1949_vm4, %v2354_v6, %v2356_v47  ;;  %v2691_v1 = vsel %vm2602_vm7, %v2681_v49, %v2690_v45 }
 0x240   : > { %v1897_v24 = vpop.f32.mrf.mxu0 }
 0x241   : > { %v1537_v33 = vadd.f32 %v1498_v56, %v1148_v10 }
 0x243   : > { %v1934_v41 = vadd.f32 %v1895_v50, %v1537_v33  ;;  %v9413_v50 = vld [vmem:[%s8447_s14 + $0x60] sm:$0xff] }
 0x244   : > { %v9426_v33 = vld [vmem:[%s11414_s2] ss:$0 sm:$0xff] }
 0x245   : > { %v9406_v53 = vadd.f32 %v2159_v25, %v1934_v41  ;;  %v11424_v25 = vrot.slane %v9413_v50, 2  ;;  %v11423_v41 = vrot.slane %v9413_v50, 3 }
 0x246   : > { %v1111_v28 = vpop.f32.mrf.mxu2 }
 0x247   : > { %11488 = vst [vmem:[#allocation17_spill] sm:$0xff] %v9406_v53  ;;  %v1149_v55 = vadd.f32 %v1111_v28, %v8876_v29  ;;  %v1500_v63 = vpop.f32.mrf.mxu3  ;;  %v2693_v29 = vshrl.u32 %v9413_v50, 16  ;;  %v2696_v28 = vshll.u32 %v9413_v50, 16 }
 0x248   : > { %v3124_v51 = vpop.f32.mrf.mxu0 }
 0x249   : > { %v1538_v10 = vadd.f32 %v1500_v63, %v1149_v55  ;;  %v2698_v61 = vrot.slane %v2696_v28, 3  ;;  %v9441_v28 = vld [vmem:[%s8447_s14 + $0x68] sm:$0xff] }
 0x24b   : > { %7574 = vmatmul.msk.bf16.gmra.mxu2 %vm573_vm1, %v2357_v20  ;;  %7658 = vmatmul.msk.bf16.gmra.mxu0 %vm573_vm1, %v3018_v57  ;;  %v9417_v23 = vadd.f32 %v1897_v24, %v1538_v10  ;;  %v2695_v24 = vrot.slane %v2693_v29, 2  ;;  %v2359_v29 = vsel %vm1949_vm4, %v2356_v47, %v11424_v25  ;;  %v2705_v47 = vshll.u32 %v9441_v28, 16 }
 0x24c   : > { %7616 = vmatmul.msk.bf16.gmra.mxu3 %vm573_vm1, %v2691_v1 }
 0x24d   : > { %11489 = vst [vmem:[#allocation18_spill] sm:$0xff] %v9417_v23  ;;  %v9431_v20 = vor.u32 %v2698_v61, %v2695_v24 }
 0x24e   : > { %v2463_v6 = vpop.f32.mrf.mxu2 }
 0x24f   : > { %v2553_v21 = vadd.f32 %v2463_v6, %v8893_v42  ;;  %v2860_v63 = vpop.f32.mrf.mxu3  ;;  %v3365_v42 = vpop.permute.xlu0 %3364  ;;  %v2700_v24 = vsel %vm2602_vm7, %v2690_v45, %v9431_v20 }
 0x250   : > { %v3126_v56 = vpop.f32.mrf.mxu0 }
 0x251   : > { %v2950_v49 = vadd.f32 %v2860_v63, %v2553_v21 }
 0x253   : > { %v3214_v4 = vadd.f32 %v3124_v51, %v2950_v49  ;;  %v3020_v51 = vsel %vm2999_vm6, %v3017_v26, %v11423_v41 }
 0x255   : > { %v3254_v55 = vadd.f32 %v9426_v33, %v3214_v4 }
 0x256   : > { %v2465_v57 = vpop.f32.mrf.mxu2 }
 0x257   : > { %v3290_v10 = vmax.f32 %v3254_v55, 0.0  ;;  %v2554_v1 = vadd.f32 %v2465_v57, %v8914_v16  ;;  %v2862_v6 = vpop.f32.mrf.mxu3  ;;  %v2702_v16 = vshrl.u32 %v9441_v28, 16 }
 0x258   : > { %v3129_v21 = vpop.f32.mrf.mxu0 }
 0x259   : > { %v3542_v63 = vmul.f32 %v3365_v42, %v3290_v10  ;;  %v2951_v49 = vadd.f32 %v2862_v6, %v2554_v1 }
 0x25b   : > { %v3598_v61 = vpack.c.bf16 %v3542_v63, %v3542_v63  ;;  %v3215_v4 = vadd.f32 %v3126_v56, %v2951_v49  ;;  %7575 = vmatmul.msk.bf16.gmra.mxu2 %vm573_vm1, %v2359_v29  ;;  %7659 = vmatmul.msk.bf16.gmra.mxu0 %vm573_vm1, %v3020_v51  ;;  %v3370_v29 = vpop.permute.xlu0 %3369  ;;  %v4032_v63 = vld [vmem:[#allocation2 + $0x8] sm:$0xe]  ;;  %v2704_v49 = vrot.slane %v2702_v16, 2 }
 0x25c   : > { %7617 = vmatmul.msk.bf16.gmra.mxu3 %vm573_vm1, %v2700_v24  ;;  %v2707_v24 = vrot.slane %v2705_v47, 3  ;;  %v8245_v16 = vld [vmem:[%s11415_s3 + $0x8] sm:$0xff] }
 0x25d   : > { %v3637_v26 = vshrl.u32 %v3598_v61, 16  ;;  %v3640_v55 = vshll.u32 %v3598_v61, 16  ;;  %v3255_v42 = vadd.f32 %v9426_v33, %v3215_v4  ;;  %v8249_v47 = vld [vmem:[%s11415_s3 + $0x28] sm:$0xff]  ;;  %4580 = vmatpush.bf16.msrb.mxu2 %v8245_v16 }
 0x25e   : > { %v2468_v57 = vpop.f32.mrf.mxu2  ;;  %4791 = vmatpush.bf16.msrb.mxu3 %v8249_v47 }
 0x25f   : > { %v3639_v10 = vrot.slane %v3637_v26, 6  ;;  %v3642_v1 = vrot.slane %v3640_v55, 7  ;;  %v3291_v45 = vmax.f32 %v3255_v42, 0.0  ;;  %v2555_v56 = vadd.f32 %v2468_v57, %v8918_v60  ;;  %v2865_v6 = vpop.f32.mrf.mxu3  ;;  %v9466_v57 = vld [vmem:[%s8447_s14 + $0x70] sm:$0xff] }
 0x260   : > { %v3131_v51 = vpop.f32.mrf.mxu0  ;;  %v11425_v26 = vrot.slane %v9441_v28, 2  ;;  %v9455_v55 = vor.u32 %v2707_v24, %v2704_v49  ;;  %v11426_v60 = vrot.slane %v9441_v28, 3 }
 0x261   : > { %v3643_v41 = vor.u32 %v3642_v1, %v3639_v10  ;;  %v3543_v25 = vmul.f32 %v3370_v29, %v3291_v45  ;;  %v2952_v23 = vadd.f32 %v2865_v6, %v2555_v56 }
 0x262   : > { %v2709_v24 = vsel %vm2602_vm7, %v9431_v20, %v9455_v55  ;;  %v8270_v20 = vld [vmem:[%s11415_s3 + $0x48] sm:$0xff] }
 0x263   : > { %v4033_v61 = vsel %vm9394_vm13, %v3643_v41, %v4032_v63  ;;  %v3599_v53 = vpack.c.bf16 %v3543_v25, %v3543_v25  ;;  %v3216_v4 = vadd.f32 %v3129_v21, %v2952_v23  ;;  %v3375_v21 = vpop.permute.xlu1 %3374  ;;  %v11492_v63 = vrot.slane %v9413_v50, 2  ;;  %5544 = vmatpush.bf16.msrb.mxu1 %v8270_v20 }
 0x264   : > { %4034 = vst [vmem:[#allocation2 + $0x8] sm:$0xe] %v4033_v61 }
 0x265   : > { %v3646_v59 = vshrl.u32 %v3599_v53, 16  ;;  %v3649_v25 = vshll.u32 %v3599_v53, 16  ;;  %v3256_v23 = vadd.f32 %v9426_v33, %v3216_v4  ;;  %v2361_v49 = vsel %vm1949_vm4, %v11492_v63, %v11425_v26 }
 0x266   : > { %v2470_v42 = vpop.f32.mrf.mxu2  ;;  %v3644_v4 = vrot.slane %v3643_v41, 4  ;;  %v8268_v41 = vld [vmem:[%s11415_s3 + $0x38] sm:$0xff] }
 0x267   : > { %v3648_v10 = vrot.slane %v3646_v59, 6  ;;  %v3651_v1 = vrot.slane %v3649_v25, 7  ;;  %v3292_v45 = vmax.f32 %v3256_v23, 0.0  ;;  %v2556_v56 = vadd.f32 %v2470_v42, %v8936_v58  ;;  %v2867_v6 = vpop.f32.mrf.mxu3  ;;  %5164 = vmatpush.bf16.msrb.mxu0 %v8268_v41 }
 0x268   : > { %v3134_v53 = vpop.f32.mrf.mxu0  ;;  %v11493_v58 = vrot.slane %v9413_v50, 3  ;;  %v2711_v25 = vshrl.u32 %v9466_v57, 16  ;;  %v2714_v23 = vshll.u32 %v9466_v57, 16  ;;  %v8301_v50 = vld [vmem:[#allocation2] sm:$0xff]  }
 0x269   : > { %v3652_v16 = vor.u32 %v3651_v1, %v3648_v10  ;;  %v3544_v47 = vmul.f32 %v3375_v21, %v3292_v45  ;;  %v2953_v59 = vadd.f32 %v2867_v6, %v2556_v56  ;;  %v4215_v6 = vshll.u32 %v8301_v50, 16 }
 0x26a   : > { %v3022_v61 = vsel %vm2999_vm6, %v11493_v58, %v11426_v60  ;;  %v2713_v45 = vrot.slane %v2711_v25, 2  ;;  %v2716_v56 = vrot.slane %v2714_v23, 3  ;;  %v4213_v25 = vshrl.u32 %v8301_v50, 16 }
 0x26b   : > { %v3653_v42 = vsel %vm9470_vm15, %v3644_v4, %v3652_v16  ;;  %v3600_v63 = vpack.c.bf16 %v3544_v47, %v3544_v47  ;;  %v3217_v26 = vadd.f32 %v3131_v51, %v2953_v59  ;;  %7576 = vmatmul.msk.bf16.gmra.mxu2 %vm573_vm1, %v2361_v49  ;;  %7660 = vmatmul.msk.bf16.gmra.mxu0 %vm573_vm1, %v3022_v61  ;;  %v3380_v47 = vpop.permute.xlu1 %3379  ;;  %v4217_v23 = vrot.slane %v4215_v6, 1 }
 0x26c   : > { %4035 = vst.msk [vmem:[#allocation2 + $0xc] sm:$0xf] %vm3578_vm5, %v3653_v42  ;;  %7618 = vmatmul.msk.bf16.gmra.mxu3 %vm573_vm1, %v2709_v24  ;;  %v3654_v42 = vrot.slane %v3652_v16, 4  ;;  %v9504_v41 = vor.u32 %v2716_v56, %v2713_v45  ;;  %v11428_v16 = vrot.slane %v9466_v57, 3  ;;  %v3385_v56 = vpop.permute.xlu2 %3384 }
 0x26d   : > { %v3656_v21 = vshrl.u32 %v3600_v63, 16  ;;  %v3659_v10 = vshll.u32 %v3600_v63, 16  ;;  %v3257_v51 = vadd.f32 %v9426_v33, %v3217_v26  ;;  %v11427_v26 = vrot.slane %v9466_v57, 2 }
 0x26e   : > { %v2473_v1 = vpop.f32.mrf.mxu2 }
 0x26f   : > { %v3658_v49 = vrot.slane %v3656_v21, 6  ;;  %v3661_v24 = vrot.slane %v3659_v10, 7  ;;  %v3293_v58 = vmax.f32 %v3257_v51, 0.0  ;;  %v2557_v61 = vadd.f32 %v2473_v1, %v8940_v12  ;;  %v2870_v4 = vpop.f32.mrf.mxu3  ;;  %v9513_v51 = vld [vmem:[%s8447_s14 + $0x78] sm:$0xff] }
 0x270   : > { %v3136_v59 = vpop.f32.mrf.mxu0 }
 0x271   : > { %v3662_v60 = vor.u32 %v3661_v24, %v3658_v49  ;;  %v3545_v63 = vmul.f32 %v3380_v47, %v3293_v58  ;;  %v2954_v46 = vadd.f32 %v2870_v4, %v2557_v61  ;;  %v2718_v24 = vsel %vm2602_vm7, %v9455_v55, %v9504_v41 }
 0x272   : > { %v4218_v58 = vor.u32 %v4217_v23, %v4213_v25  ;;  %v2723_v55 = vshll.u32 %v9513_v51, 16 }
 0x273   : > { %v3663_v20 = vsel %vm9470_vm15, %v3654_v42, %v3662_v60  ;;  %v3601_v21 = vpack.c.bf16 %v3545_v63, %v3545_v63  ;;  %v3218_v10 = vadd.f32 %v3134_v53, %v2954_v46  ;;  %v9508_v12 = vld [vmem:[#allocation2 + $0x8] sm:$0xff]  ;;  %v11494_v46 = vrot.slane %v9441_v28, 2 }
 0x274   : > { %4036 = vst.msk [vmem:[#allocation2 + $0x10] sm:$0xf] %vm3578_vm5, %v3663_v20  ;;  %v4220_v50 = vshll.u32 %v9508_v12, 16  ;;  %v3664_v25 = vrot.slane %v3662_v60, 4 }
 0x275   : > { %v3666_v1 = vshrl.u32 %v3601_v21, 16  ;;  %v3669_v49 = vshll.u32 %v3601_v21, 16  ;;  %v3258_v45 = vadd.f32 %v9426_v33, %v3218_v10  ;;  %v2363_v53 = vsel %vm1949_vm4, %v11494_v46, %v11427_v26 }
 0x276   : > { %v2475_v6 = vpop.f32.mrf.mxu2  ;;  %v11495_v21 = vrot.slane %v9441_v28, 3  ;;  %v9531_v46 = vrot.slane %v4220_v50, 1  ;;  %v2720_v26 = vshrl.u32 %v9513_v51, 16  ;;  %v2725_v50 = vrot.slane %v2723_v55, 3 }
 0x277   : > { %v3668_v61 = vrot.slane %v3666_v1, 6  ;;  %v3671_v4 = vrot.slane %v3669_v49, 7  ;;  %v3294_v47 = vmax.f32 %v3258_v45, 0.0  ;;  %v2558_v42 = vadd.f32 %v2475_v6, %v8958_v14  ;;  %v2872_v63 = vpop.f32.mrf.mxu3 }
 0x278   : > { %v3139_v20 = vpop.f32.mrf.mxu0  ;;  %v3024_v10 = vsel %vm2999_vm6, %v11495_v21, %v11428_v16  ;;  %v4223_v14 = vsel %vm400_vm0, %v4218_v58, %v9531_v46  ;;  %v2722_v60 = vrot.slane %v2720_v26, 2  ;;  %v11429_v55 = vrot.slane %v9513_v51, 3 }
 0x279   : > { %v3672_v23 = vor.u32 %v3671_v4, %v3668_v61  ;;  %v3546_v1 = vmul.f32 %v3385_v56, %v3294_v47  ;;  %v2955_v49 = vadd.f32 %v2872_v63, %v2558_v42  ;;  %7748 = vmatmul.msk.bf16.vlgmr.msra.gmra.mxu1 %vm4372_vm8, %v4223_v14  ;;  %v4921_v4 = vld [vmem:[#allocation2 + $0xc] sm:$0xf] }
 0x27a   : > { %v9547_v26 = vor.u32 %v2725_v50, %v2722_v60  ;;  %v11496_v60 = vrot.slane %v9513_v51, 2 }
 0x27b   : > { %v3673_v45 = vsel %vm9470_vm15, %v3664_v25, %v3672_v23  ;;  %v3602_v6 = vpack.c.bf16 %v3546_v1, %v3546_v1  ;;  %v3219_v28 = vadd.f32 %v3136_v59, %v2955_v49  ;;  %7577 = vmatmul.msk.bf16.gmra.mxu2 %vm573_vm1, %v2363_v53  ;;  %7661 = vmatmul.msk.bf16.gmra.mxu0 %vm573_vm1, %v3024_v10  ;;  %v4920_v10 = vld [vmem:[#allocation2 + $0x8] sm:$0xe]  ;;  %v3390_v25 = vpop.permute.xlu2 %3389  ;;  %v5000_v49 = vunpack.c.l.b16 %v4921_v4 }
 0x27c   : > { %4037 = vst.msk [vmem:[#allocation2 + $0x14] sm:$0xf] %vm3578_vm5, %v3673_v45  ;;  %7619 = vmatmul.msk.bf16.gmra.mxu3 %vm573_vm1, %v2718_v24  ;;  %v3674_v14 = vrot.slane %v3672_v23, 4  ;;  %v5673_v1 = vld [vmem:[#allocation2 + $0x8] sm:$0xc]  ;;  %v11497_v23 = vrot.slane %v9466_v57, 2  ;;  %v2727_v4 = vsel %vm2602_vm7, %v9504_v41, %v9547_v26 }
 0x27d   : > { %v3676_v56 = vshrl.u32 %v3602_v6, 16  ;;  %v3679_v61 = vshll.u32 %v3602_v6, 16  ;;  %v3259_v58 = vadd.f32 %v9426_v33, %v3219_v28 }
 0x27e   : > { %v2478_v47 = vpop.f32.mrf.mxu2  ;;  %v2365_v50 = vsel %vm1949_vm4, %v11497_v23, %v11496_v60 }
 0x27f   : > { %v3678_v42 = vrot.slane %v3676_v56, 6  ;;  %v3681_v59 = vrot.slane %v3679_v61, 7  ;;  %v3295_v53 = vmax.f32 %v3259_v58, 0.0  ;;  %v2559_v63 = vadd.f32 %v2478_v47, %v8968_v43  ;;  %v2875_v21 = vpop.f32.mrf.mxu3  ;;  %v9551_v56 = vld [vmem:[%s8447_s14 + $0x80] sm:$0xff] }
 0x280   : > { %v3141_v24 = vpop.f32.mrf.mxu0  ;;  %v4999_v61 = vunpack.c.l.b16 %v4920_v10  ;;  %v2732_v41 = vshll.u32 %v9551_v56, 16 }
 0x281   : > { %v3682_v45 = vor.u32 %v3681_v59, %v3678_v42  ;;  %v3547_v6 = vmul.f32 %v3390_v25, %v3295_v53  ;;  %v2956_v28 = vadd.f32 %v2875_v21, %v2559_v63  ;;  %v11498_v42 = vrot.slane %v9466_v57, 3 }
 0x282   : > { %v9571_v59 = vpack.c.b16 %v5000_v49, %v4999_v61 }
 0x283   : > { %v3683_v43 = vsel %vm9470_vm15, %v3674_v14, %v3682_v45  ;;  %v3603_v58 = vpack.c.bf16 %v3547_v6, %v3547_v6  ;;  %v3220_v47 = vadd.f32 %v3139_v20, %v2956_v28  ;;  %v9555_v16 = vld [vmem:[#allocation2 + $0x10] sm:$0xff]  ;;  %v3026_v20 = vsel %vm2999_vm6, %v11498_v42, %v11429_v55  ;;  %v3395_v42 = vpop.permute.xlu0 %3394 }
 0x284   : > { %4038 = vst.msk [vmem:[#allocation2 + $0x18] sm:$0xf] %vm3578_vm5, %v3683_v43  ;;  %v4228_v10 = vshll.u32 %v9555_v16, 16  ;;  %v4224_v14 = vshrl.u32 %v9508_v12, 16  ;;  %v2729_v6 = vshrl.u32 %v9551_v56, 16  ;;  %v5680_v28 = vunpack.c.l.b16 %v5673_v1  ;;  %v9582_v32 = vld [vmem:[#allocation2 + $0x10] sm:$0xff] }
 0x285   : > { %v3686_v53 = vshrl.u32 %v3603_v58, 16  ;;  %v3689_v63 = vshll.u32 %v3603_v58, 16  ;;  %v3260_v21 = vadd.f32 %v9426_v33, %v3220_v47  ;;  %v5303_v12 = vshrl.u32 %v9571_v59, 16 }
 0x286   : > { %v2480_v25 = vpop.f32.mrf.mxu2  ;;  %v4226_v47 = vor.u32 %v4224_v14, %v9531_v46  ;;  %v9580_v55 = vrot.slane %v4228_v10, 1  ;;  %v5306_v22 = vshll.u32 %v9571_v59, 16  ;;  %v3684_v13 = vrot.slane %v3682_v45, 4 }
 0x287   : > { %v3688_v43 = vrot.slane %v3686_v53, 6  ;;  %v3691_v57 = vrot.slane %v3689_v63, 7  ;;  %v3296_v60 = vmax.f32 %v3260_v21, 0.0  ;;  %v2560_v61 = vadd.f32 %v2480_v25, %v8991_v18  ;;  %v2877_v23 = vpop.f32.mrf.mxu3 }
 0x288   : > { %v3144_v58 = vpop.f32.mrf.mxu0  ;;  %v4231_v18 = vsel %vm400_vm0, %v4226_v47, %v9580_v55  ;;  %v5681_v21 = vpack.c.b16 %v5000_v49, %v5680_v28  ;;  %v2731_v45 = vrot.slane %v2729_v6, 2  ;;  %v2734_v14 = vrot.slane %v2732_v41, 3 }
 0x289   : > { %v3692_v1 = vor.u32 %v3691_v57, %v3688_v43  ;;  %v3548_v53 = vmul.f32 %v3395_v42, %v3296_v60  ;;  %v2957_v63 = vadd.f32 %v2877_v23, %v2560_v61  ;;  %7749 = vmatmul.msk.bf16.gmra.mxu1 %vm4372_vm8, %v4231_v18  ;;  %v5305_v43 = vrot.slane %v5303_v12, 1  ;;  %v3400_v12 = vpop.permute.xlu1 %3399 }
 0x28a   : > { %v5311_v49 = vshrl.u32 %v9582_v32, 16  ;;  %v5682_v61 = vrot.slane %v5681_v21, 2  ;;  %v11431_v23 = vrot.slane %v9582_v32, 2 }
 0x28b   : > { %v3693_v25 = vsel %vm9470_vm15, %v3684_v13, %v3692_v1  ;;  %v3604_v46 = vpack.c.bf16 %v3548_v53, %v3548_v53  ;;  %v3221_v10 = vadd.f32 %v3141_v24, %v2957_v63  ;;  %7578 = vmatmul.msk.bf16.gmra.mxu2 %vm573_vm1, %v2365_v50  ;;  %7662 = vmatmul.msk.bf16.gmra.mxu0 %vm573_vm1, %v3026_v20  ;;  %v5308_v24 = vrot.slane %v5306_v22, 2 }
 0x28c   : > { %4039 = vst.msk [vmem:[#allocation2 + $0x1c] sm:$0xf] %vm3578_vm5, %v3693_v25  ;;  %7620 = vmatmul.msk.bf16.gmra.mxu3 %vm573_vm1, %v2727_v4  ;;  %v5313_v50 = vrot.slane %v5311_v49, 1  ;;  %v5314_v20 = vshll.u32 %v9582_v32, 16  ;;  %v9603_v22 = vsel %vm1949_vm4, %v5682_v61, %v11431_v23  ;;  %v3694_v18 = vrot.slane %v3692_v1, 4  ;;  %v9617_v61 = vld [vmem:[%s8447_s14 + $0x88] sm:$0xff] }
 0x28d   : > { %v3696_v28 = vshrl.u32 %v3604_v46, 16  ;;  %v3699_v57 = vshll.u32 %v3604_v46, 16  ;;  %v3261_v13 = vadd.f32 %v9426_v33, %v3221_v10  ;;  %11499 = vst [vmem:[#allocation19_spill] sm:$0xff] %v9603_v22  ;;  %v11430_v10 = vrot.slane %v9551_v56, 2 }
 0x28e   : > { %v2483_v60 = vpop.f32.mrf.mxu2  ;;  %v5316_v63 = vrot.slane %v5314_v20, 2  ;;  %v9606_v49 = vor.u32 %v2734_v14, %v2731_v45  ;;  %v11432_v1 = vrot.slane %v9551_v56, 3 }
 0x28f   : > { %v3698_v4 = vrot.slane %v3696_v28, 6  ;;  %v3701_v42 = vrot.slane %v3699_v57, 7  ;;  %v3297_v47 = vmax.f32 %v3261_v13, 0.0  ;;  %v2561_v6 = vadd.f32 %v2483_v60, %v9005_v11  ;;  %v2880_v41 = vpop.f32.mrf.mxu3 }
 0x290   : > { %v3146_v53 = vpop.f32.mrf.mxu0  ;;  %v5309_v28 = vor.u32 %v5308_v24, %v5305_v43  ;;  %v9608_v11 = vor.u32 %v5316_v63, %v5313_v50 }
 0x291   : > { %v3702_v25 = vor.u32 %v3701_v42, %v3698_v4  ;;  %v3549_v21 = vmul.f32 %v3400_v12, %v3297_v47  ;;  %v2958_v46 = vadd.f32 %v2880_v41, %v2561_v6  ;;  %v2736_v47 = vsel %vm2602_vm7, %v9547_v26, %v9606_v49 }
 0x292   : > { %v9621_v45 = vsel %vm1552_vm3, %v5309_v28, %v9608_v11  ;;  %v4232_v6 = vshrl.u32 %v9555_v16, 16  ;;  %v3405_v28 = vpop.permute.xlu2 %3404  ;;  %v2738_v16 = vshrl.u32 %v9617_v61, 16 }
 0x293   : > { %v3703_v57 = vsel %vm9470_vm15, %v3694_v18, %v3702_v25  ;;  %v3605_v13 = vpack.c.bf16 %v3549_v21, %v3549_v21  ;;  %v3222_v60 = vadd.f32 %v3144_v58, %v2958_v46  ;;  %v9612_v20 = vld [vmem:[#allocation2 + $0x18] sm:$0xff]  ;;  %11500 = vst [vmem:[#allocation20_spill] sm:$0xff] %v9621_v45  ;;  %v11501_v58 = vrot.slane %v9513_v51, 2  ;;  %v9635_v46 = vld [vmem:[#allocation2 + $0x14] sm:$0xf] }
 0x294   : > { %4040 = vst.msk [vmem:[#allocation2 + $0x20] sm:$0xf] %vm3578_vm5, %v3703_v57  ;;  %v4236_v50 = vshll.u32 %v9612_v20, 16  ;;  %v4234_v26 = vor.u32 %v4232_v6, %v9580_v55 }
 0x295   : > { %v3706_v14 = vshrl.u32 %v3605_v13, 16  ;;  %v3709_v43 = vshll.u32 %v3605_v13, 16  ;;  %v3262_v24 = vadd.f32 %v9426_v33, %v3222_v60  ;;  %v2367_v42 = vsel %vm1949_vm4, %v11501_v58, %v11430_v10  ;;  %11502 = vst [vmem:[#allocation21_spill] sm:$0xff] %v9635_v46  ;;  %v6673_v10 = vld [vmem:[#allocation2 + $0x10] sm:$0x8] }
 0x296   : > { %v2485_v4 = vpop.f32.mrf.mxu2  ;;  %v11503_v13 = vrot.slane %v9513_v51, 3  ;;  %v9643_v58 = vrot.slane %v4236_v50, 1  ;;  %v2741_v51 = vshll.u32 %v9617_v61, 16 }
 0x297   : > { %v3708_v41 = vrot.slane %v3706_v14, 6  ;;  %v3711_v12 = vrot.slane %v3709_v43, 7  ;;  %v3298_v63 = vmax.f32 %v3262_v24, 0.0  ;;  %v2562_v18 = vadd.f32 %v2485_v4, %v9028_v17  ;;  %v2882_v21 = vpop.f32.mrf.mxu3  ;;  %v9646_v14 = vld [vmem:[#allocation2 + $0x18] sm:$0xff] }
 0x298   : > { %v3149_v57 = vpop.f32.mrf.mxu0  ;;  %v3028_v60 = vsel %vm2999_vm6, %v11503_v13, %v11432_v1  ;;  %v3704_v17 = vrot.slane %v3702_v25, 4  ;;  %v4239_v23 = vsel %vm400_vm0, %v4234_v26, %v9643_v58  ;;  %v11434_v13 = vunpack.c.l.b16 %v9635_v46 }
 0x299   : > { %v3712_v43 = vor.u32 %v3711_v12, %v3708_v41  ;;  %v3550_v24 = vmul.f32 %v3405_v28, %v3298_v63  ;;  %v2959_v4 = vadd.f32 %v2882_v21, %v2562_v18  ;;  %7750 = vmatmul.msk.bf16.gmra.mxu1 %vm4372_vm8, %v4239_v23  ;;  %v5320_v25 = vshrl.u32 %v9646_v14, 16 }
 0x29a   : > { %v6680_v41 = vunpack.c.l.b16 %v6673_v10  ;;  %v2740_v21 = vrot.slane %v2738_v16, 2  ;;  %v11438_v16 = vrot.slane %v9617_v61, 2  ;;  %v11436_v46 = vrot.slane %v9646_v14, 2 }
 0x29b   : > { %v3713_v55 = vsel %vm9470_vm15, %v3704_v17, %v3712_v43  ;;  %v3606_v50 = vpack.c.bf16 %v3550_v24, %v3550_v24  ;;  %v3223_v6 = vadd.f32 %v3146_v53, %v2959_v4  ;;  %7579 = vmatmul.msk.bf16.gmra.mxu2 %vm573_vm1, %v2367_v42  ;;  %7663 = vmatmul.msk.bf16.gmra.mxu0 %vm573_vm1, %v3028_v60  ;;  %v2743_v53 = vrot.slane %v2741_v51, 3  ;;  %v9662_v60 = vld [vmem:[#allocation2 + $0x18] sm:$0xff] }
 0x29c   : > { %4041 = vst.msk [vmem:[#allocation2 + $0x24] sm:$0xf] %vm3578_vm5, %v3713_v55  ;;  %7621 = vmatmul.msk.bf16.gmra.mxu3 %vm573_vm1, %v2736_v47  ;;  %v5322_v26 = vrot.slane %v5320_v25, 1  ;;  %v5323_v42 = vshll.u32 %v9646_v14, 16  ;;  %v6681_v47 = vpack.c.b16 %v11434_v13, %v6680_v41  ;;  %v3410_v55 = vpop.permute.xlu0 %3409  ;;  %v3714_v51 = vrot.slane %v3712_v43, 4 }
 0x29d   : > { %v3716_v12 = vshrl.u32 %v3606_v50, 16  ;;  %v3719_v63 = vshll.u32 %v3606_v50, 16  ;;  %v3263_v18 = vadd.f32 %v9426_v33, %v3223_v6  ;;  %v11437_v43 = vrot.slane %v9617_v61, 3 }
 0x29e   : > { %v2488_v28 = vpop.f32.mrf.mxu2  ;;  %v5325_v6 = vrot.slane %v5323_v42, 2  ;;  %v6682_v41 = vrot.slane %v6681_v47, 3  ;;  %v11505_v42 = vrot.slane %v9582_v32, 2 }
 0x29f   : > { %v3718_v17 = vrot.slane %v3716_v12, 6  ;;  %v3721_v23 = vrot.slane %v3719_v63, 7  ;;  %v3299_v24 = vmax.f32 %v3263_v18, 0.0  ;;  %v2563_v10 = vadd.f32 %v2488_v28, %v9038_v48  ;;  %v2885_v4 = vpop.f32.mrf.mxu3 }
 0x2a0   : > { %v3151_v50 = vpop.f32.mrf.mxu0  ;;  %v9668_v45 = vor.u32 %v5325_v6, %v5322_v26  ;;  %v11435_v12 = vrot.slane %v9662_v60, 3  ;;  %v9674_v28 = vor.u32 %v2743_v53, %v2740_v21 }
 0x2a1   : > { %v3722_v25 = vor.u32 %v3721_v23, %v3718_v17  ;;  %v3551_v1 = vmul.f32 %v3410_v55, %v3299_v24  ;;  %v2960_v22 = vadd.f32 %v2885_v4, %v2563_v10  ;;  %v11508_v17 = vrot.slane %v9551_v56, 2 }
 0x2a2   : > { %v9683_v26 = vsel %vm1552_vm3, %v9608_v11, %v9668_v45  ;;  %v4240_v24 = vshrl.u32 %v9612_v20, 16 }
 0x2a3   : > { %v3723_v48 = vsel %vm9470_vm15, %v3714_v51, %v3722_v25  ;;  %v3607_v63 = vpack.c.bf16 %v3551_v1, %v3551_v1  ;;  %v3224_v18 = vadd.f32 %v3149_v57, %v2960_v22  ;;  %v9676_v13 = vld [vmem:[#allocation2 + $0x20] sm:$0xff]  ;;  %11504 = vst [vmem:[#allocation22_spill] sm:$0xff] %v9683_v26  ;;  %v9690_v1 = vsel %vm1949_vm4, %v11505_v42, %v11436_v46 }
 0x2a4   : > { %4042 = vst.msk [vmem:[#allocation2 + $0x28] sm:$0xf] %vm3578_vm5, %v3723_v48  ;;  %v9695_v22 = vsel %vm2999_vm6, %v6682_v41, %v11435_v12  ;;  %v4244_v11 = vshll.u32 %v9676_v13, 16  ;;  %v2369_v23 = vsel %vm1949_vm4, %v11508_v17, %v11438_v16  ;;  %v3415_v41 = vpop.permute.xlu1 %3414  ;;  %v4242_v20 = vor.u32 %v4240_v24, %v9643_v58  ;;  %v9739_v16 = vld [vmem:[%s8447_s14 + $0x98] sm:$0xff] }
 0x2a5   : > { %11506 = vst [vmem:[#allocation23_spill] sm:$0xff] %v9690_v1  ;;  %v3726_v57 = vshrl.u32 %v3607_v63, 16  ;;  %v3729_v21 = vshll.u32 %v3607_v63, 16  ;;  %v3264_v53 = vadd.f32 %v9426_v33, %v3224_v18  ;;  %v2745_v63 = vsel %vm2602_vm7, %v9606_v49, %v9674_v28 }
 0x2a6   : > { %11507 = vst [vmem:[#allocation24_spill] sm:$0xff] %v9695_v22  ;;  %v2490_v47 = vpop.f32.mrf.mxu2  ;;  %v11509_v18 = vrot.slane %v9551_v56, 3 }
 0x2a7   : > { %v3728_v10 = vrot.slane %v3726_v57, 6  ;;  %v3731_v4 = vrot.slane %v3729_v21, 7  ;;  %v3300_v55 = vmax.f32 %v3264_v53, 0.0  ;;  %v2564_v6 = vadd.f32 %v2490_v47, %v9062_v8  ;;  %v2887_v51 = vpop.f32.mrf.mxu3  ;;  %v9718_v21 = vld [vmem:[%s8447_s14 + $0x90] sm:$0xff]  ;;  %v9720_v8 = vld [vmem:[#allocation2 + $0x20] sm:$0xff] }
 0x2a8   : > { %v3154_v48 = vpop.f32.mrf.mxu0  ;;  %v3030_v42 = vsel %vm2999_vm6, %v11509_v18, %v11437_v43  ;;  %v9715_v57 = vrot.slane %v4244_v11, 1  ;;  %v3724_v53 = vrot.slane %v3722_v25, 4  ;;  %v2747_v58 = vshrl.u32 %v9718_v21, 16 }
 0x2a9   : > { %v3732_v47 = vor.u32 %v3731_v4, %v3728_v10  ;;  %v3552_v17 = vmul.f32 %v3415_v41, %v3300_v55  ;;  %v2961_v12 = vadd.f32 %v2887_v51, %v2564_v6  ;;  %v2750_v25 = vshll.u32 %v9718_v21, 16 }
 0x2aa   : > { %v4247_v49 = vsel %vm400_vm0, %v4242_v20, %v9715_v57  ;;  %v5329_v11 = vshrl.u32 %v9720_v8, 16  ;;  %v5332_v4 = vshll.u32 %v9720_v8, 16 }
 0x2ab   : > { %v3733_v56 = vsel %vm9470_vm15, %v3724_v53, %v3732_v47  ;;  %v3608_v46 = vpack.c.bf16 %v3552_v17, %v3552_v17  ;;  %v3225_v18 = vadd.f32 %v3151_v50, %v2961_v12  ;;  %7580 = vmatmul.msk.bf16.gmra.mxu2 %vm573_vm1, %v2369_v23  ;;  %7664 = vmatmul.msk.bf16.gmra.mxu0 %vm573_vm1, %v3030_v42  ;;  %v3420_v42 = vpop.permute.xlu2 %3419  ;;  %v2749_v53 = vrot.slane %v2747_v58, 2 }
 0x2ac   : > { %4043 = vst.msk [vmem:[#allocation2 + $0x2c] sm:$0xf] %vm3578_vm5, %v3733_v56  ;;  %7622 = vmatmul.msk.bf16.gmra.mxu3 %vm573_vm1, %v2745_v63  ;;  %7751 = vmatmul.msk.bf16.gmra.mxu1 %vm4372_vm8, %v4247_v49  ;;  %v5331_v23 = vrot.slane %v5329_v11, 1  ;;  %v2752_v17 = vrot.slane %v2750_v25, 3  ;;  %v5334_v49 = vrot.slane %v5332_v4, 2  ;;  %v3734_v56 = vrot.slane %v3732_v47, 4 }
 0x2ad   : > { %v3736_v24 = vshrl.u32 %v3608_v46, 16  ;;  %v3739_v10 = vshll.u32 %v3608_v46, 16  ;;  %v3265_v50 = vadd.f32 %v9426_v33, %v3225_v18  ;;  %v11439_v11 = vrot.slane %v9718_v21, 2 }
 0x2ae   : > { %v2493_v12 = vpop.f32.mrf.mxu2  ;;  %v9741_v22 = vor.u32 %v5334_v49, %v5331_v23  ;;  %v2177_v58 = vadd.f32 %v9071_v27, %v9094_v31  ;;  %v9750_v47 = vor.u32 %v2752_v17, %v2749_v53  ;;  %v11440_v25 = vrot.slane %v9718_v21, 3  ;;  %v3425_v49 = vpop.permute.xlu0 %3424 }
 0x2af   : > { %v3738_v55 = vrot.slane %v3736_v24, 6  ;;  %v3741_v6 = vrot.slane %v3739_v10, 7  ;;  %v3301_v51 = vmax.f32 %v3265_v50, 0.0  ;;  %v2565_v41 = vadd.f32 %v2493_v12, %v9074_v52  ;;  %v2890_v63 = vpop.f32.mrf.mxu3 }
 0x2b0   : > { %v3156_v20 = vpop.f32.mrf.mxu0  ;;  %v9756_v12 = vsel %vm1552_vm3, %v9668_v45, %v9741_v22  ;;  %v11511_v27 = vrot.slane %v9617_v61, 2  ;;  %v2759_v45 = vshll.u32 %v9739_v16, 16 }
 0x2b1   : > { %v3742_v46 = vor.u32 %v3741_v6, %v3738_v55  ;;  %v3553_v43 = vmul.f32 %v3420_v42, %v3301_v51  ;;  %v2962_v18 = vadd.f32 %v2890_v63, %v2565_v41  ;;  %11510 = vst [vmem:[#allocation25_spill] sm:$0xff] %v9756_v12  ;;  %v4248_v6 = vshrl.u32 %v9676_v13, 16  ;;  %v11525_v12 = vld [vmem:[#allocation5_spill] sm:$0xff] }
 0x2b2   : > { %v2371_v31 = vsel %vm1949_vm4, %v11511_v27, %v11439_v11  ;;  %v2756_v51 = vshrl.u32 %v9739_v16, 16  ;;  %v2181_v26 = vadd.f32 %v11525_v12, %v9192_v39 }
 0x2b3   : > { %v3743_v24 = vsel %vm9470_vm15, %v3734_v56, %v3742_v46  ;;  %v3609_v52 = vpack.c.bf16 %v3553_v43, %v3553_v43  ;;  %v3226_v10 = vadd.f32 %v3154_v48, %v2962_v18  ;;  %v9745_v50 = vld [vmem:[#allocation2 + $0x28] sm:$0xff]  ;;  %v2754_v18 = vsel %vm2602_vm7, %v9674_v28, %v9750_v47 }
 0x2b4   : > { %4044 = vst.msk [vmem:[#allocation2 + $0x30] sm:$0xf] %vm3578_vm5, %v3743_v24  ;;  %v4252_v48 = vshll.u32 %v9745_v50, 16  ;;  %v11512_v24 = vrot.slane %v9617_v61, 3  ;;  %v2758_v11 = vrot.slane %v2756_v51, 2  ;;  %v2761_v28 = vrot.slane %v2759_v45, 3 }
 0x2b5   : > { %v3746_v23 = vshrl.u32 %v3609_v52, 16  ;;  %v3749_v4 = vshll.u32 %v3609_v52, 16  ;;  %v3266_v43 = vadd.f32 %v9426_v33, %v3226_v10  ;;  %v4250_v10 = vor.u32 %v4248_v6, %v9715_v57  ;;  %v9781_v1 = vld [vmem:[#allocation2 + $0x28] sm:$0xff]  ;;  %v2589_v51 = vld [vmem:[%s8447_s14 + $0xa0] sm:$0x7] }
 0x2b6   : > { %v2495_v55 = vpop.f32.mrf.mxu2  ;;  %v3032_v52 = vsel %vm2999_vm6, %v11512_v24, %v11440_v25  ;;  %v9777_v27 = vrot.slane %v4252_v48, 1  ;;  %v11441_v57 = vrot.slane %v9720_v8, 2 }
 0x2b7   : > { %v3748_v41 = vrot.slane %v3746_v23, 6  ;;  %v3751_v63 = vrot.slane %v3749_v4, 7  ;;  %v3302_v42 = vmax.f32 %v3266_v43, 0.0  ;;  %v2566_v53 = vadd.f32 %v2495_v55, %v2177_v58  ;;  %v2892_v17 = vpop.f32.mrf.mxu3 }
 0x2b8   : > { %v3159_v56 = vpop.f32.mrf.mxu0  ;;  %v3744_v23 = vrot.slane %v3742_v46, 4  ;;  %v4255_v55 = vsel %vm400_vm0, %v4250_v10, %v9777_v27 }
 0x2b9   : > { %v3752_v4 = vor.u32 %v3751_v63, %v3748_v41  ;;  %v3554_v58 = vmul.f32 %v3425_v49, %v3302_v42  ;;  %v2963_v43 = vadd.f32 %v2892_v17, %v2566_v53  ;;  %v9794_v41 = vor.u32 %v2761_v28, %v2758_v11 }
 0x2ba   : > { %v5341_v63 = vshll.u32 %v9781_v1, 16  ;;  %v11513_v11 = vrot.slane %v9646_v14, 2 }
 0x2bb   : > { %v3753_v61 = vsel %vm9470_vm15, %v3744_v23, %v3752_v4  ;;  %v3610_v24 = vpack.c.bf16 %v3554_v58, %v3554_v58  ;;  %v3227_v25 = vadd.f32 %v3156_v20, %v2963_v43  ;;  %7581 = vmatmul.msk.bf16.gmra.mxu2 %vm573_vm1, %v2371_v31  ;;  %7665 = vmatmul.msk.bf16.gmra.mxu0 %vm573_vm1, %v3032_v52  ;;  %v5338_v31 = vshrl.u32 %v9781_v1, 16  ;;  %v3430_v52 = vpop.permute.xlu1 %3429 }
 0x2bc   : > { %4045 = vst.msk [vmem:[#allocation2 + $0x34] sm:$0xf] %vm3578_vm5, %v3753_v61  ;;  %7623 = vmatmul.msk.bf16.gmra.mxu3 %vm573_vm1, %v2754_v18  ;;  %7752 = vmatmul.msk.bf16.gmra.mxu1 %vm4372_vm8, %v4255_v55  ;;  %v5343_v58 = vrot.slane %v5341_v63, 2  ;;  %v9804_v43 = vsel %vm1949_vm4, %v11513_v11, %v11441_v57  ;;  %v3754_v55 = vrot.slane %v3752_v4, 4  ;;  %v2236_v11 = vld [vmem:[%s8447_s14 + $0xa0] sm:$0x3] }
 0x2bd   : > { %v3756_v46 = vshrl.u32 %v3610_v24, 16  ;;  %v3759_v48 = vshll.u32 %v3610_v24, 16  ;;  %v3267_v6 = vadd.f32 %v9426_v33, %v3227_v25  ;;  %v2600_v25 = vunpack.c.l.b16 %v2589_v51  ;;  %11514 = vst [vmem:[#allocation26_spill] sm:$0xff] %v9804_v43 }
 0x2be   : > { %v2498_v45 = vpop.f32.mrf.mxu2  ;;  %v5340_v23 = vrot.slane %v5338_v31, 1  ;;  %v11517_v4 = vrot.slane %v9739_v16, 2 }
 0x2bf   : > { %v3758_v42 = vrot.slane %v3756_v46, 6  ;;  %v3761_v53 = vrot.slane %v3759_v48, 7  ;;  %v3303_v17 = vmax.f32 %v3267_v6, 0.0  ;;  %v2567_v49 = vadd.f32 %v2498_v45, %v9116_v35  ;;  %v2895_v18 = vpop.f32.mrf.mxu3  ;;  %v11515_v48 = vld [vmem:[#allocation4_spill] sm:$0xff]  ;;  %v11516_v6 = vld [vmem:[#allocation3_spill] sm:$0xff] }
 0x2c0   : > { %v3161_v10 = vpop.f32.mrf.mxu0  ;;  %v11442_v35 = vrot.slane %v9739_v16, 3  ;;  %v9807_v46 = vor.u32 %v5343_v58, %v5340_v23  ;;  %v2179_v51 = vadd.f32 %v11516_v6, %v11515_v48 }
 0x2c1   : > { %v3762_v28 = vor.u32 %v3761_v53, %v3758_v42  ;;  %v3555_v61 = vmul.f32 %v3430_v52, %v3303_v17  ;;  %v2964_v24 = vadd.f32 %v2895_v18, %v2567_v49  ;;  %v11518_v42 = vrot.slane %v9718_v21, 2 }
 0x2c2   : > { %v2763_v17 = vsel %vm2602_vm7, %v9750_v47, %v9794_v41  ;;  %v9827_v49 = vpack.c.b16 %v2600_v25, %v2600_v25  ;;  %v4256_v25 = vshrl.u32 %v9745_v50, 16 }
 0x2c3   : > { %v3763_v45 = vsel %vm9470_vm15, %v3754_v55, %v3762_v28  ;;  %v3611_v31 = vpack.c.bf16 %v3555_v61, %v3555_v61  ;;  %v3228_v63 = vadd.f32 %v3159_v56, %v2964_v24  ;;  %v9813_v20 = vld [vmem:[#allocation2 + $0x30] sm:$0xff]  ;;  %v2373_v53 = vsel %vm1949_vm4, %v11518_v42, %v11517_v4 }
 0x2c4   : > { %v9816_v57 = vld [vmem:[#allocation2 + $0x30] sm:$0xff]  ;;  %4046 = vst.msk [vmem:[#allocation2 + $0x38] sm:$0xf] %vm3578_vm5, %v3763_v45  ;;  %v9832_v56 = vsel %vm1552_vm3, %v9741_v22, %v9807_v46  ;;  %v4260_v58 = vshll.u32 %v9813_v20, 16  ;;  %v11520_v61 = vrot.slane %v9718_v21, 3  ;;  %v2319_v24 = vunpack.c.l.b16 %v2236_v11  ;;  %v8244_v11 = vld [vmem:[%s11415_s3] sm:$0xff] }
 0x2c5   : > { %11519 = vst [vmem:[#allocation4_spill] sm:$0xff] %v9832_v56  ;;  %v3766_v18 = vshrl.u32 %v3611_v31, 16  ;;  %v3769_v52 = vshll.u32 %v3611_v31, 16  ;;  %v3268_v23 = vadd.f32 %v9426_v33, %v3228_v63  ;;  %v5347_v48 = vshrl.u32 %v9816_v57, 16  ;;  %v3435_v33 = vpop.permute.xlu2 %3434  ;;  %4581 = vmatpush.bf16.msrb.mxu2 %v8244_v11 }
 0x2c6   : > { %v2500_v55 = vpop.f32.mrf.mxu2  ;;  %v3034_v47 = vsel %vm2999_vm6, %v11520_v61, %v11442_v35  ;;  %v3764_v63 = vrot.slane %v3762_v28, 4  ;;  %v4258_v43 = vor.u32 %v4256_v25, %v9777_v27  ;;  %v9844_v56 = vrot.slane %v4260_v58, 1  ;;  %v8267_v28 = vld [vmem:[%s11415_s3 + $0x30] sm:$0xff] }
 0x2c7   : > { %v3768_v22 = vrot.slane %v3766_v18, 6  ;;  %v3771_v6 = vrot.slane %v3769_v52, 7  ;;  %v3304_v45 = vmax.f32 %v3268_v23, 0.0  ;;  %v2568_v31 = vadd.f32 %v2500_v55, %v2179_v51  ;;  %v2897_v4 = vpop.f32.mrf.mxu3  ;;  %v8248_v18 = vld [vmem:[%s11415_s3 + $0x20] sm:$0xff]  ;;  %5165 = vmatpush.bf16.msrb.mxu0 %v8267_v28 }
 0x2c8   : > { %v3164_v42 = vpop.f32.mrf.mxu0  ;;  %v2765_v21 = vshrl.u32 %v9827_v49, 16  ;;  %v5350_v27 = vshll.u32 %v9816_v57, 16  ;;  %v4263_v58 = vsel %vm400_vm0, %v4258_v43, %v9844_v56  ;;  %v2768_v55 = vshll.u32 %v9827_v49, 16  ;;  %4792 = vmatpush.bf16.msrb.mxu3 %v8248_v18 }
 0x2c9   : > { %v3772_v52 = vor.u32 %v3771_v6, %v3768_v22  ;;  %v3556_v51 = vmul.f32 %v3435_v33, %v3304_v45  ;;  %v2965_v23 = vadd.f32 %v2897_v4, %v2568_v31  ;;  %v5349_v61 = vrot.slane %v5347_v48, 1 }
 0x2ca   : > { %v5689_v25 = vrot.slane %v9781_v1, 2  ;;  %v5352_v43 = vrot.slane %v5350_v27, 2  ;;  %v11521_v48 = vrot.slane %v9720_v8, 2  ;;  %v2767_v11 = vrot.slane %v2765_v21, 2  ;;  %v9881_v27 = vld [vmem:[#allocation2 + $0x30] sm:$0xff] }
 0x2cb   : > { %v3773_v22 = vsel %vm9470_vm15, %v3764_v63, %v3772_v52  ;;  %v3612_v6 = vpack.c.bf16 %v3556_v51, %v3556_v51  ;;  %v3229_v45 = vadd.f32 %v3161_v10, %v2965_v23  ;;  %7582 = vmatmul.msk.bf16.gmra.mxu2 %vm573_vm1, %v2373_v53  ;;  %7666 = vmatmul.msk.bf16.gmra.mxu0 %vm573_vm1, %v3034_v47  ;;  %v9876_v10 = vld [vmem:[%s11414_s2] ss:$0 sm:$0xff]  ;;  %v2770_v18 = vrot.slane %v2768_v55, 3  ;;  %v8275_v23 = vld [vmem:[#allocation2 + $0x28] sm:$0xff] }
 0x2cc   : > { %4047 = vst.msk [vmem:[#allocation2 + $0x3c] sm:$0xf] %vm3578_vm5, %v3773_v22  ;;  %7624 = vmatmul.msk.bf16.gmra.mxu3 %vm573_vm1, %v2763_v17  ;;  %7753 = vmatmul.msk.bf16.gmra.mxu1 %vm4372_vm8, %v4263_v58  ;;  %v9871_v31 = vsel %vm1949_vm4, %v11521_v48, %v5689_v25  ;;  %v2338_v47 = vpack.c.b16 %v2319_v24, %v2319_v24  ;;  %v8274_v17 = vld [vmem:[#allocation2 + $0x20] sm:$0xff]  ;;  %v5691_v58 = vrot.slane %v9816_v57, 2  ;;  %v3774_v24 = vrot.slane %v3772_v52, 4 }
 0x2cd   : > { %11522 = vst [vmem:[#allocation3_spill] sm:$0xff] %v9871_v31  ;;  %v3776_v4 = vshrl.u32 %v3612_v6, 16  ;;  %v3779_v33 = vshll.u32 %v3612_v6, 16  ;;  %v3269_v53 = vadd.f32 %v9876_v10, %v3229_v45  ;;  %v9879_v51 = vor.u32 %v5352_v43, %v5349_v61  ;;  %v3440_v45 = vpop.permute.xlu0 %3439 }
 0x2ce   : > { %v2503_v63 = vpop.f32.mrf.mxu2  ;;  %v9893_v55 = vsel %vm1949_vm4, %v5689_v25, %v5691_v58  ;;  %v11443_v52 = vrot.slane %v9881_v27, 3 }
 0x2cf   : > { %v3778_v22 = vrot.slane %v3776_v4, 6  ;;  %v3781_v6 = vrot.slane %v3779_v33, 7  ;;  %v3305_v48 = vmax.f32 %v3269_v53, 0.0  ;;  %v2569_v35 = vadd.f32 %v2503_v63, %v9163_v3  ;;  %v2900_v31 = vpop.f32.mrf.mxu3  ;;  %11524 = vst [vmem:[#allocation28_spill] sm:$0xff] %v9893_v55 }
 0x2d0   : > { %v3166_v28 = vpop.f32.mrf.mxu0  ;;  %v9888_v21 = vsel %vm1552_vm3, %v9807_v46, %v9879_v51  ;;  %v6685_v33 = vrot.slane %v8274_v17, 3  ;;  %v2374_v53 = vrot.slane %v2338_v47, 2  ;;  %v2771_v3 = vor.u32 %v2770_v18, %v2767_v11 }
 0x2d1   : > { %11523 = vst [vmem:[#allocation27_spill] sm:$0xff] %v9888_v21  ;;  %v3782_v61 = vor.u32 %v3781_v6, %v3778_v22  ;;  %v3557_v43 = vmul.f32 %v3440_v45, %v3305_v48  ;;  %v2966_v4 = vadd.f32 %v2900_v31, %v2569_v35  ;;  %v6687_v63 = vrot.slane %v8275_v23, 3 }
 0x2d2   : > { %v3035_v35 = vrot.slane %v9827_v49, 3  ;;  %v11526_v31 = vrot.slane %v9662_v60, 3  ;;  %v11530_v60 = vrot.slane %v9739_v16, 2  ;;  %v2772_v22 = vsel %vm2602_vm7, %v9794_v41, %v2771_v3 }
 0x2d3   : > { %v3783_v46 = vsel %vm9470_vm15, %v3774_v24, %v3782_v61  ;;  %v3613_v21 = vpack.c.bf16 %v3557_v43, %v3557_v43  ;;  %v3230_v9 = vadd.f32 %v3164_v42, %v2966_v4  ;;  %v9900_v54 = vld [vmem:[#allocation2 + $0x38] sm:$0xff]  ;;  %v9912_v39 = vsel %vm2999_vm6, %v6685_v33, %v6687_v63 }
 0x2d4   : > { %v9902_v25 = vld [vmem:[#allocation2 + $0x38] sm:$0xff]  ;;  %4048 = vst.msk [vmem:[#allocation2 + $0x40] sm:$0xf] %vm3578_vm5, %v3783_v46  ;;  %v9909_v47 = vsel %vm2999_vm6, %v11526_v31, %v6685_v33  ;;  %v9917_v12 = vsel %vm2999_vm6, %v6687_v63, %v11443_v52  ;;  %v4268_v18 = vshll.u32 %v9900_v54, 16  ;;  %v2375_v23 = vsel %vm1949_vm4, %v11530_v60, %v2374_v53 }
 0x2d5   : > { %11527 = vst [vmem:[#allocation5_spill] sm:$0xff] %v9909_v47  ;;  %v3786_v42 = vshrl.u32 %v3613_v21, 16  ;;  %v3789_v17 = vshll.u32 %v3613_v21, 16  ;;  %v3270_v11 = vadd.f32 %v9876_v10, %v3230_v9  ;;  %v4264_v6 = vshrl.u32 %v9813_v20, 16  ;;  %v3445_v9 = vpop.permute.xlu1 %3444 }
 0x2d6   : > { %11528 = vst [vmem:[#allocation29_spill] sm:$0xff] %v9912_v39  ;;  %v2505_v49 = vpop.f32.mrf.mxu2  ;;  %v5356_v48 = vshrl.u32 %v9902_v25, 16  ;;  %v3784_v33 = vrot.slane %v3782_v61, 4  ;;  %v11531_v46 = vrot.slane %v9739_v16, 3  ;;  %v9932_v60 = vrot.slane %v4268_v18, 1 }
 0x2d7   : > { %11529 = vst [vmem:[#allocation30_spill] sm:$0xff] %v9917_v12  ;;  %v3788_v45 = vrot.slane %v3786_v42, 6  ;;  %v3791_v24 = vrot.slane %v3789_v17, 7  ;;  %v3306_v43 = vmax.f32 %v3270_v11, 0.0  ;;  %v2570_v21 = vadd.f32 %v2505_v49, %v2181_v26  ;;  %v2902_v4 = vpop.f32.mrf.mxu3 }
 0x2d8   : > { %v3169_v63 = vpop.f32.mrf.mxu0  ;;  %v3036_v31 = vsel %vm2999_vm6, %v11531_v46, %v3035_v35  ;;  %v4266_v53 = vor.u32 %v4264_v6, %v9844_v56  ;;  %v5359_v42 = vshll.u32 %v9902_v25, 16  ;;  %v5358_v17 = vrot.slane %v5356_v48, 1  ;;  %v8307_v56 = vld [vmem:[#allocation2] sm:$0xf0]  ;;  %v8308_v48 = vld [vmem:[#allocation2] sm:$0xe] }
 0x2d9   : > { %v3792_v41 = vor.u32 %v3791_v24, %v3788_v45  ;;  %v3558_v3 = vmul.f32 %v3445_v9, %v3306_v43  ;;  %v2967_v52 = vadd.f32 %v2902_v4, %v2570_v21  ;;  %v11445_v45 = vrot.slane %v9902_v25, 2  ;;  %v3450_v9 = vpop.permute.xlu2 %3449 }
 0x2da   : > { %v4271_v26 = vsel %vm400_vm0, %v4266_v53, %v9932_v60  ;;  %v5361_v35 = vrot.slane %v5359_v42, 2  ;;  %v8309_v46 = vor.u32 %v8308_v48, %v8307_v56 }
 0x2db   : > { %v3793_v61 = vsel %vm9470_vm15, %v3784_v33, %v3792_v41  ;;  %v3614_v11 = vpack.c.bf16 %v3558_v3, %v3558_v3  ;;  %v3231_v16 = vadd.f32 %v3166_v28, %v2967_v52  ;;  %7583 = vmatmul.msk.bf16.gmra.mxu2 %vm573_vm1, %v2375_v23  ;;  %7667 = vmatmul.msk.bf16.gmra.mxu0 %vm573_vm1, %v3036_v31  ;;  %v9948_v23 = vld [vmem:[#allocation2 + $0x38] sm:$0xff]  ;;  %v3794_v3 = vrot.slane %v3792_v41, 4 }
 0x2dc   : > { %4049 = vst.msk [vmem:[#allocation2 + $0x44] sm:$0xf] %vm3578_vm5, %v3793_v61  ;;  %7625 = vmatmul.msk.bf16.gmra.mxu3 %vm573_vm1, %v2772_v22  ;;  %7754 = vmatmul.msk.bf16.gmra.mxu1 %vm4372_vm8, %v4271_v26  ;;  %v9946_v52 = vor.u32 %v5361_v35, %v5358_v17  ;;  %v9961_v53 = vsel %vm1949_vm4, %v5691_v58, %v11445_v45  ;;  %v11444_v17 = vrot.slane %v9948_v23, 3  ;;  %v4682_v58 = vrot.slane %v8309_v46, 1 }
 0x2dd   : > { %v3796_v18 = vshrl.u32 %v3614_v11, 16  ;;  %v3799_v49 = vshll.u32 %v3614_v11, 16  ;;  %v3271_v6 = vadd.f32 %v9876_v10, %v3231_v16  ;;  %11532 = vst [vmem:[#allocation31_spill] sm:$0xff] %v9961_v53  ;;  %v2183_v35 = vadd.f32 %v9208_v40, %v9232_v2  ;;  %v9983_v40 = vld [vmem:[#allocation2 + $0x8] sm:$0xff] }
 0x2de   : > { %v2508_v28 = vpop.f32.mrf.mxu2  ;;  %v9954_v31 = vsel %vm1552_vm3, %v9879_v51, %v9946_v52  ;;  %v11533_v41 = vrot.slane %v9881_v27, 3  ;;  %v11448_v2 = vrot.slane %v9983_v40, 1 }
 0x2df   : > { %v3798_v24 = vrot.slane %v3796_v18, 6  ;;  %v3801_v43 = vrot.slane %v3799_v49, 7  ;;  %v3307_v21 = vmax.f32 %v3271_v6, 0.0  ;;  %v2571_v22 = vadd.f32 %v2508_v28, %v9212_v36  ;;  %v2905_v4 = vpop.f32.mrf.mxu3 }
 0x2e0   : > { %v3171_v33 = vpop.f32.mrf.mxu0  ;;  %v9978_v18 = vsel %vm2999_vm6, %v11533_v41, %v11444_v17 }
 0x2e1   : > { %v3802_v42 = vor.u32 %v3801_v43, %v3798_v24  ;;  %v3559_v26 = vmul.f32 %v3450_v9, %v3307_v21  ;;  %v2968_v36 = vadd.f32 %v2905_v4, %v2571_v22  ;;  %11534 = vst [vmem:[#allocation32_spill] sm:$0xff] %v9978_v18  ;;  %v4272_v24 = vshrl.u32 %v9900_v54, 16 }
 0x2e3   : > { %v3803_v61 = vsel %vm9470_vm15, %v3794_v3, %v3802_v42  ;;  %v3615_v11 = vpack.c.bf16 %v3559_v26, %v3559_v26  ;;  %v3232_v16 = vadd.f32 %v3169_v63, %v2968_v36  ;;  %v9966_v51 = vld [vmem:[#allocation2 + $0x40] sm:$0xff]  ;;  %v3455_v3 = vpop.permute.xlu0 %3454  ;;  %v3804_v26 = vrot.slane %v3802_v42, 4 }
 0x2e4   : > { %v9968_v56 = vld [vmem:[#allocation2 + $0x40] sm:$0xff]  ;;  %4050 = vst.msk [vmem:[#allocation2 + $0x48] sm:$0xf] %vm3578_vm5, %v3803_v61  ;;  %v4276_v48 = vshll.u32 %v9966_v51, 16  ;;  %v4274_v61 = vor.u32 %v4272_v24, %v9932_v60  ;;  %v11535_v42 = vrot.slane %v9582_v32, 1 }
 0x2e5   : > { %v3806_v49 = vshrl.u32 %v3615_v11, 16  ;;  %v3809_v6 = vshll.u32 %v3615_v11, 16  ;;  %v3272_v63 = vadd.f32 %v9876_v10, %v3232_v16  ;;  %v5365_v27 = vshrl.u32 %v9968_v56, 16 }
 0x2e6   : > { %v2510_v28 = vpop.f32.mrf.mxu2  ;;  %v9989_v11 = vrot.slane %v4276_v48, 1  ;;  %v5055_v16 = vrot.slane %v9571_v59, 1  ;;  %v5368_v43 = vshll.u32 %v9968_v56, 16 }
 0x2e7   : > { %v3808_v21 = vrot.slane %v3806_v49, 6  ;;  %v3811_v22 = vrot.slane %v3809_v6, 7  ;;  %v3308_v4 = vmax.f32 %v3272_v63, 0.0  ;;  %v2572_v9 = vadd.f32 %v2510_v28, %v2183_v35  ;;  %v2907_v46 = vpop.f32.mrf.mxu3  ;;  %v8342_v28 = vld [vmem:[#allocation2] sm:$0xff]  }
 0x2e8   : > { %v3174_v36 = vpop.f32.mrf.mxu0  ;;  %v4279_v49 = vsel %vm400_vm0, %v4274_v61, %v9989_v11  ;;  %v4684_v35 = vsel %vm899_vm2, %v4682_v58, %v11448_v2  ;;  %v5057_v60 = vsel %vm899_vm2, %v5055_v16, %v11535_v42  ;;  %v5367_v6 = vrot.slane %v5365_v27, 1  ;;  %v3460_v61 = vpop.permute.xlu1 %3459 }
 0x2e9   : > { %v3812_v41 = vor.u32 %v3811_v22, %v3808_v21  ;;  %v3560_v17 = vmul.f32 %v3455_v3, %v3308_v4  ;;  %v2969_v45 = vadd.f32 %v2907_v46, %v2572_v9  ;;  %v5370_v58 = vrot.slane %v5368_v43, 2  ;;  %v10027_v42 = vpop.f32.mrf.mxu1 }
 0x2ea   : > { %v11447_v22 = vrot.slane %v9968_v56, 2 }
 0x2eb   : > { %v3813_v59 = vsel %vm9470_vm15, %v3804_v26, %v3812_v41  ;;  %v3616_v63 = vpack.c.bf16 %v3560_v17, %v3560_v17  ;;  %v3233_v48 = vadd.f32 %v3171_v33, %v2969_v45  ;;  %7774 = vmatmul.msk.bf16.vlgmr.msrb.gmra.mxu2 %vm4372_vm8, %v8342_v28  ;;  %7902 = vmatmul.msk.bf16.vlgmr.msrb.gmra.mxu0 %vm4372_vm8, %v5057_v60  ;;  %v10012_v33 = vld [vmem:[#allocation2 + $0x40] sm:$0xff]  ;;  %v3814_v60 = vrot.slane %v3812_v41, 4 }
 0x2ec   : > { %4051 = vst.msk [vmem:[#allocation2 + $0x4c] sm:$0xf] %vm3578_vm5, %v3813_v59  ;;  %7755 = vmatmul.msk.bf16.gmra.mxu1 %vm4372_vm8, %v4279_v49  ;;  %7804 = vmatmul.msk.bf16.vlgmr.msrb.gmra.mxu3 %vm4372_vm8, %v4684_v35  ;;  %v10010_v45 = vor.u32 %v5370_v58, %v5367_v6  ;;  %v11536_v49 = vrot.slane %v9902_v25, 2  ;;  %v11538_v41 = vrot.slane %v9948_v23, 3 }
 0x2ed   : > { %v3816_v24 = vshrl.u32 %v3616_v63, 16  ;;  %v3819_v21 = vshll.u32 %v3616_v63, 16  ;;  %v3273_v27 = vadd.f32 %v9876_v10, %v3233_v48  ;;  %v11446_v63 = vrot.slane %v10012_v33, 3 }
 0x2ee   : > { %v2513_v17 = vpop.f32.mrf.mxu2  ;;  %v10018_v43 = vsel %vm1552_vm3, %v9946_v52, %v10010_v45  ;;  %v10025_v35 = vsel %vm1949_vm4, %v11536_v49, %v11447_v22 }
 0x2ef   : > { %v3818_v4 = vrot.slane %v3816_v24, 6  ;;  %v3821_v9 = vrot.slane %v3819_v21, 7  ;;  %v3309_v46 = vmax.f32 %v3273_v27, 0.0  ;;  %v2573_v3 = vadd.f32 %v2513_v17, %v9251_v62  ;;  %v2910_v26 = vpop.f32.mrf.mxu3  ;;  %11537 = vst [vmem:[#allocation33_spill] sm:$0xff] %v10025_v35 }
 0x2f0   : > { %v3176_v16 = vpop.f32.mrf.mxu0  ;;  %v2185_v21 = vadd.f32 %v9247_v44, %v9268_v0  ;;  %v10044_v27 = vsel %vm2999_vm6, %v11538_v41, %v11446_v63 }
 0x2f1   : > { %v3822_v6 = vor.u32 %v3821_v9, %v3818_v4  ;;  %v3561_v62 = vmul.f32 %v3460_v61, %v3309_v46  ;;  %v2970_v59 = vadd.f32 %v2910_v26, %v2573_v3  ;;  %11539 = vst [vmem:[#allocation34_spill] sm:$0xff] %v10044_v27  ;;  %v4280_v3 = vshrl.u32 %v9966_v51, 16  ;;  %v10049_v26 = vld [vmem:[#allocation2 + $0x10] sm:$0xff] }
 0x2f3   : > { %v3823_v48 = vsel %vm9470_vm15, %v3814_v60, %v3822_v6  ;;  %v3617_v52 = vpack.c.bf16 %v3561_v62, %v3561_v62  ;;  %v3234_v28 = vadd.f32 %v3174_v36, %v2970_v59  ;;  %v10032_v58 = vld [vmem:[#allocation2 + $0x48] sm:$0xff]  ;;  %v4282_v41 = vor.u32 %v4280_v3, %v9989_v11 }
 0x2f4   : > { %v10034_v24 = vld [vmem:[#allocation2 + $0x48] sm:$0xff]  ;;  %4052 = vst.msk [vmem:[#allocation2 + $0x50] sm:$0xf] %vm3578_vm5, %v3823_v48  ;;  %v4284_v9 = vshll.u32 %v10032_v58, 16  ;;  %v3465_v48 = vpop.permute.xlu2 %3464  ;;  %v11542_v11 = vrot.slane %v9646_v14, 1 }
 0x2f5   : > { %v3826_v17 = vshrl.u32 %v3617_v52, 16  ;;  %v3829_v4 = vshll.u32 %v3617_v52, 16  ;;  %v3274_v36 = vadd.f32 %v9876_v10, %v3234_v28  ;;  %v5374_v23 = vshrl.u32 %v10034_v24, 16 }
 0x2f6   : > { %v2515_v46 = vpop.f32.mrf.mxu2  ;;  %v3824_v52 = vrot.slane %v3822_v6, 4  ;;  %v10055_v63 = vrot.slane %v4284_v9, 1  ;;  %v10057_v44 = vpop.f32.mrf.mxu1  ;;  %v5377_v0 = vshll.u32 %v10034_v24, 16 }
 0x2f7   : > { %v3828_v61 = vrot.slane %v3826_v17, 6  ;;  %v3831_v49 = vrot.slane %v3829_v4, 7  ;;  %v3310_v60 = vmax.f32 %v3274_v36, 0.0  ;;  %v2574_v62 = vadd.f32 %v2515_v46, %v2185_v21  ;;  %v2912_v59 = vpop.f32.mrf.mxu3 }
 0x2f8   : > { %v3179_v28 = vpop.f32.mrf.mxu0  ;;  %v4287_v17 = vsel %vm400_vm0, %v4282_v41, %v10055_v63  ;;  %v11540_v21 = vrot.slane %v10049_v26, 1  ;;  %v11541_v4 = vrot.slane %v9983_v40, 1  ;;  %v11543_v36 = vrot.slane %v9582_v32, 1  ;;  %v8269_v32 = vld [vmem:[%s11415_s3 + $0x40] sm:$0xff] }
 0x2f9   : > { %v3832_v22 = vor.u32 %v3831_v49, %v3828_v61  ;;  %v3562_v2 = vmul.f32 %v3465_v48, %v3310_v60  ;;  %v2971_v27 = vadd.f32 %v2912_v59, %v2574_v62  ;;  %v5376_v46 = vrot.slane %v5374_v23, 1  ;;  %5545 = vmatpush.bf16.msrb.mxu1 %v8269_v32  ;;  %v10087_v59 = vld [vmem:[#allocation2 + $0x48] sm:$0xff] }
 0x2fa   : > { %v4686_v6 = vsel %vm899_vm2, %v11541_v4, %v11540_v21  ;;  %v5059_v9 = vsel %vm899_vm2, %v11543_v36, %v11542_v11  ;;  %v5379_v23 = vrot.slane %v5377_v0, 2  ;;  %v3470_v4 = vpop.permute.xlu0 %3469  ;;  %v11545_v11 = vrot.slane %v9968_v56, 2 }
 0x2fb   : > { %v3833_v3 = vsel %vm9470_vm15, %v3824_v52, %v3832_v22  ;;  %v3618_v61 = vpack.c.bf16 %v3562_v2, %v3562_v2  ;;  %v3235_v49 = vadd.f32 %v3176_v16, %v2971_v27  ;;  %7775 = vmatmul.msk.bf16.gmra.mxu2 %vm4372_vm8, %v9983_v40  ;;  %7903 = vmatmul.msk.bf16.gmra.mxu0 %vm4372_vm8, %v5059_v9  ;;  %v11450_v16 = vrot.slane %v10034_v24, 2 }
 0x2fc   : > { %4053 = vst.msk [vmem:[#allocation2 + $0x54] sm:$0xf] %vm3578_vm5, %v3833_v3  ;;  %7756 = vmatmul.msk.bf16.gmra.mxu1 %vm4372_vm8, %v4287_v17  ;;  %7805 = vmatmul.msk.bf16.gmra.mxu3 %vm4372_vm8, %v4686_v6  ;;  %v10085_v27 = vor.u32 %v5379_v23, %v5376_v46  ;;  %v3834_v9 = vrot.slane %v3832_v22, 4  ;;  %v11547_v22 = vrot.slane %v10012_v33, 3 }
 0x2fd   : > { %v3836_v60 = vshrl.u32 %v3618_v61, 16  ;;  %v3839_v62 = vshll.u32 %v3618_v61, 16  ;;  %v3275_v2 = vadd.f32 %v9876_v10, %v3235_v49  ;;  %v10100_v36 = vsel %vm1949_vm4, %v11545_v11, %v11450_v16 }
 0x2fe   : > { %v2518_v40 = vpop.f32.mrf.mxu2  ;;  %v10093_v6 = vsel %vm1552_vm3, %v10010_v45, %v10085_v27  ;;  %11546 = vst [vmem:[#allocation36_spill] sm:$0xff] %v10100_v36  ;;  %v11449_v49 = vrot.slane %v10087_v59, 3 }
 0x2ff   : > { %v3838_v48 = vrot.slane %v3836_v60, 6  ;;  %v3841_v52 = vrot.slane %v3839_v62, 7  ;;  %v3311_v41 = vmax.f32 %v3275_v2, 0.0  ;;  %v2575_v17 = vadd.f32 %v2518_v40, %v9281_v34  ;;  %v2915_v21 = vpop.f32.mrf.mxu3  ;;  %11544 = vst [vmem:[#allocation35_spill] sm:$0xff] %v10093_v6  ;;  %v10102_v34 = vpop.f32.mrf.mxu1 }
 0x300   : > { %v3181_v0 = vpop.f32.mrf.mxu0  ;;  %v2187_v2 = vadd.f32 %v9277_v15, %v9293_v30  ;;  %v10119_v40 = vsel %vm2999_vm6, %v11547_v22, %v11449_v49 }
 0x301   : > { %v3842_v46 = vor.u32 %v3841_v52, %v3838_v48  ;;  %v3563_v3 = vmul.f32 %v3470_v4, %v3311_v41  ;;  %v2972_v61 = vadd.f32 %v2915_v21, %v2575_v17  ;;  %11548 = vst [vmem:[#allocation37_spill] sm:$0xff] %v10119_v40  ;;  %v4288_v21 = vshrl.u32 %v10032_v58, 16  ;;  %v10124_v4 = vld [vmem:[#allocation2 + $0x18] sm:$0xff] }
 0x303   : > { %v3843_v32 = vsel %vm9470_vm15, %v3834_v9, %v3842_v46  ;;  %v3619_v45 = vpack.c.bf16 %v3563_v3, %v3563_v3  ;;  %v3236_v23 = vadd.f32 %v3179_v28, %v2972_v61  ;;  %v10107_v60 = vld [vmem:[#allocation2 + $0x50] sm:$0xff]  ;;  %v4290_v49 = vor.u32 %v4288_v21, %v10055_v63 }
 0x304   : > { %v10109_v62 = vld [vmem:[#allocation2 + $0x50] sm:$0xff]  ;;  %4054 = vst.msk [vmem:[#allocation2 + $0x58] sm:$0xf] %vm3578_vm5, %v3843_v32  ;;  %v4292_v41 = vshll.u32 %v10107_v60, 16  ;;  %v11551_v63 = vrot.slane %v9720_v8, 1 }
 0x305   : > { %v3846_v48 = vshrl.u32 %v3619_v45, 16  ;;  %v3849_v52 = vshll.u32 %v3619_v45, 16  ;;  %v3276_v28 = vadd.f32 %v9876_v10, %v3236_v23  ;;  %v5383_v33 = vshrl.u32 %v10109_v62, 16  ;;  %v3475_v45 = vpop.permute.xlu1 %3474 }
 0x306   : > { %v2520_v17 = vpop.f32.mrf.mxu2  ;;  %v3844_v23 = vrot.slane %v3842_v46, 4  ;;  %v10130_v16 = vrot.slane %v4292_v41, 1  ;;  %v5386_v30 = vshll.u32 %v10109_v62, 16 }
 0x307   : > { %v3848_v11 = vrot.slane %v3846_v48, 6  ;;  %v3851_v9 = vrot.slane %v3849_v52, 7  ;;  %v3312_v3 = vmax.f32 %v3276_v28, 0.0  ;;  %v2576_v61 = vadd.f32 %v2520_v17, %v2187_v2  ;;  %v2917_v32 = vpop.f32.mrf.mxu3  ;;  %v10132_v15 = vpop.f32.mrf.mxu1 }
 0x308   : > { %v3184_v22 = vpop.f32.mrf.mxu0  ;;  %v4295_v48 = vsel %vm400_vm0, %v4290_v49, %v10130_v16  ;;  %v11549_v2 = vrot.slane %v10124_v4, 1  ;;  %v11550_v52 = vrot.slane %v10049_v26, 1  ;;  %v11552_v28 = vrot.slane %v9646_v14, 1 }
 0x309   : > { %v3852_v40 = vor.u32 %v3851_v9, %v3848_v11  ;;  %v3564_v18 = vmul.f32 %v3475_v45, %v3312_v3  ;;  %v2973_v12 = vadd.f32 %v2917_v32, %v2576_v61  ;;  %v5385_v17 = vrot.slane %v5383_v33, 1 }
 0x30a   : > { %v4688_v46 = vsel %vm899_vm2, %v11550_v52, %v11549_v2  ;;  %v5061_v41 = vsel %vm899_vm2, %v11552_v28, %v11551_v63  ;;  %v5388_v14 = vrot.slane %v5386_v30, 2  ;;  %v11452_v61 = vrot.slane %v10109_v62, 2  ;;  %v3480_v2 = vpop.permute.xlu2 %3479 }
 0x30b   : > { %v3853_v21 = vsel %vm9470_vm15, %v3844_v23, %v3852_v40  ;;  %v3620_v11 = vpack.c.bf16 %v3564_v18, %v3564_v18  ;;  %v3237_v9 = vadd.f32 %v3181_v0, %v2973_v12  ;;  %7776 = vmatmul.msk.bf16.gmra.mxu2 %vm4372_vm8, %v10049_v26  ;;  %7904 = vmatmul.msk.bf16.gmra.mxu0 %vm4372_vm8, %v5061_v41  ;;  %v10159_v0 = vld [vmem:[#allocation2 + $0x50] sm:$0xff]  ;;  %v3854_v28 = vrot.slane %v3852_v40, 4 }
 0x30c   : > { %4055 = vst.msk [vmem:[#allocation2 + $0x5c] sm:$0xf] %vm3578_vm5, %v3853_v21  ;;  %7757 = vmatmul.msk.bf16.gmra.mxu1 %vm4372_vm8, %v4295_v48  ;;  %7806 = vmatmul.msk.bf16.gmra.mxu3 %vm4372_vm8, %v4688_v46  ;;  %v10157_v12 = vor.u32 %v5388_v14, %v5385_v17  ;;  %v11554_v46 = vrot.slane %v10034_v24, 2  ;;  %v11557_v40 = vrot.slane %v10087_v59, 3 }
 0x30d   : > { %v3856_v49 = vshrl.u32 %v3620_v11, 16  ;;  %v3859_v3 = vshll.u32 %v3620_v11, 16  ;;  %v3277_v33 = vadd.f32 %v9876_v10, %v3237_v9  ;;  %v11451_v11 = vrot.slane %v10159_v0, 3 }
 0x30e   : > { %v2523_v18 = vpop.f32.mrf.mxu2  ;;  %v10165_v30 = vsel %vm1552_vm3, %v10085_v27, %v10157_v12  ;;  %v10172_v63 = vsel %vm1949_vm4, %v11554_v46, %v11452_v61 }
 0x30f   : > { %v3858_v26 = vrot.slane %v3856_v49, 6  ;;  %v3861_v32 = vrot.slane %v3859_v3, 7  ;;  %v3313_v45 = vmax.f32 %v3277_v33, 0.0  ;;  %v2577_v23 = vadd.f32 %v2523_v18, %v9302_v7  ;;  %v2920_v48 = vpop.f32.mrf.mxu3  ;;  %11553 = vst [vmem:[#allocation38_spill] sm:$0xff] %v10165_v30  ;;  %v10174_v7 = vpop.f32.mrf.mxu1  ;;  %v11556_v33 = vld [vmem:[#allocation6_spill] sm:$0xff] }
 0x310   : > { %v3186_v52 = vpop.f32.mrf.mxu0  ;;  %11555 = vst [vmem:[#allocation39_spill] sm:$0xff] %v10172_v63  ;;  %v2189_v18 = vadd.f32 %v11556_v33, %v9314_v38 }
 0x311   : > { %v3862_v41 = vor.u32 %v3861_v32, %v3858_v26  ;;  %v3565_v17 = vmul.f32 %v3480_v2, %v3313_v45  ;;  %v2974_v21 = vadd.f32 %v2920_v48, %v2577_v23  ;;  %v10191_v26 = vsel %vm2999_vm6, %v11557_v40, %v11451_v11  ;;  %v3485_v40 = vpop.permute.xlu0 %3484 }
 0x312   : > { %11558 = vst [vmem:[#allocation6_spill] sm:$0xff] %v10191_v26  ;;  %v4296_v2 = vshrl.u32 %v10107_v60, 16 }
 0x313   : > { %v3863_v9 = vsel %vm9470_vm15, %v3854_v28, %v3862_v41  ;;  %v3621_v27 = vpack.c.bf16 %v3565_v17, %v3565_v17  ;;  %v3238_v14 = vadd.f32 %v3184_v22, %v2974_v21  ;;  %v10179_v49 = vld [vmem:[#allocation2 + $0x58] sm:$0xff] }
 0x314   : > { %v10181_v3 = vld [vmem:[#allocation2 + $0x58] sm:$0xff]  ;;  %4056 = vst.msk [vmem:[#allocation2 + $0x60] sm:$0xf] %vm3578_vm5, %v3863_v9  ;;  %v4300_v23 = vshll.u32 %v10179_v49, 16 }
 0x315   : > { %v3866_v32 = vshrl.u32 %v3621_v27, 16  ;;  %v3869_v45 = vshll.u32 %v3621_v27, 16  ;;  %v3278_v22 = vadd.f32 %v9876_v10, %v3238_v14  ;;  %v5392_v28 = vshrl.u32 %v10181_v3, 16 }
 0x316   : > { %v2525_v48 = vpop.f32.mrf.mxu2  ;;  %v3864_v27 = vrot.slane %v3862_v41, 4  ;;  %v4298_v14 = vor.u32 %v4296_v2, %v10130_v16  ;;  %v10200_v61 = vrot.slane %v4300_v23, 1  ;;  %v5395_v46 = vshll.u32 %v10181_v3, 16 }
 0x317   : > { %v3868_v17 = vrot.slane %v3866_v32, 6  ;;  %v3871_v59 = vrot.slane %v3869_v45, 7  ;;  %v3314_v21 = vmax.f32 %v3278_v22, 0.0  ;;  %v2578_v9 = vadd.f32 %v2525_v48, %v2189_v18  ;;  %v2922_v33 = vpop.f32.mrf.mxu3  ;;  %v10202_v38 = vpop.f32.mrf.mxu1 }
 0x318   : > { %v3189_v11 = vpop.f32.mrf.mxu0  ;;  %v4303_v32 = vsel %vm400_vm0, %v4298_v14, %v10200_v61  ;;  %v11559_v18 = vrot.slane %v9676_v13, 1  ;;  %v11560_v45 = vrot.slane %v10124_v4, 1  ;;  %v11561_v16 = vrot.slane %v9781_v1, 1 }
 0x319   : > { %v3872_v26 = vor.u32 %v3871_v59, %v3868_v17  ;;  %v3566_v39 = vmul.f32 %v3485_v40, %v3314_v21  ;;  %v2975_v47 = vadd.f32 %v2922_v33, %v2578_v9  ;;  %v11562_v22 = vrot.slane %v9720_v8, 1 }
 0x31a   : > { %v4690_v41 = vsel %vm899_vm2, %v11560_v45, %v11559_v18  ;;  %v5394_v48 = vrot.slane %v5392_v28, 1  ;;  %v5397_v8 = vrot.slane %v5395_v46, 2  ;;  %v11454_v33 = vrot.slane %v10181_v3, 2  ;;  %v3490_v18 = vpop.permute.xlu1 %3489 }
 0x31b   : > { %v5063_v23 = vsel %vm899_vm2, %v11562_v22, %v11561_v16  ;;  %v3873_v2 = vsel %vm9470_vm15, %v3864_v27, %v3872_v26  ;;  %v3622_v17 = vpack.c.bf16 %v3566_v39, %v3566_v39  ;;  %v3239_v59 = vadd.f32 %v3186_v52, %v2975_v47  ;;  %7777 = vmatmul.msk.bf16.gmra.mxu2 %vm4372_vm8, %v10124_v4  ;;  %v10229_v52 = vld [vmem:[#allocation2 + $0x58] sm:$0xff] }
 0x31c   : > { %7905 = vmatmul.msk.bf16.gmra.mxu0 %vm4372_vm8, %v5063_v23  ;;  %4057 = vst.msk [vmem:[#allocation2 + $0x64] sm:$0xf] %vm3578_vm5, %v3873_v2  ;;  %7758 = vmatmul.msk.bf16.gmra.mxu1 %vm4372_vm8, %v4303_v32  ;;  %v10227_v47 = vor.u32 %v5397_v8, %v5394_v48  ;;  %v3874_v22 = vrot.slane %v3872_v26, 4  ;;  %v11567_v26 = vrot.slane %v10159_v0, 3 }
 0x31d   : > { %7807 = vmatmul.msk.bf16.gmra.mxu3 %vm4372_vm8, %v4690_v41  ;;  %v3876_v21 = vshrl.u32 %v3622_v17, 16  ;;  %v3879_v9 = vshll.u32 %v3622_v17, 16  ;;  %v3279_v28 = vadd.f32 %v9876_v10, %v3239_v59  ;;  %v11564_v41 = vrot.slane %v10109_v62, 2 }
 0x31e   : > { %v2528_v39 = vpop.f32.mrf.mxu2  ;;  %v10235_v46 = vsel %vm1552_vm3, %v10157_v12, %v10227_v47  ;;  %v11453_v17 = vrot.slane %v10229_v52, 3 }
 0x31f   : > { %v3878_v4 = vrot.slane %v3876_v21, 6  ;;  %v3881_v40 = vrot.slane %v3879_v9, 7  ;;  %v3315_v27 = vmax.f32 %v3279_v28, 0.0  ;;  %v2579_v14 = vadd.f32 %v2528_v39, %v9323_v19  ;;  %v2925_v32 = vpop.f32.mrf.mxu3  ;;  %11563 = vst [vmem:[#allocation40_spill] sm:$0xff] %v10235_v46  ;;  %v10244_v19 = vpop.f32.mrf.mxu1  ;;  %v11566_v28 = vld [vmem:[#allocation7_spill] sm:$0xff] }
 0x320   : > { %v3191_v45 = vpop.f32.mrf.mxu0  ;;  %v10242_v16 = vsel %vm1949_vm4, %v11564_v41, %v11454_v33  ;;  %v2191_v39 = vadd.f32 %v11566_v28, %v9332_v5 }
 0x321   : > { %11565 = vst [vmem:[#allocation41_spill] sm:$0xff] %v10242_v16  ;;  %v3882_v23 = vor.u32 %v3881_v40, %v3878_v4  ;;  %v3567_v48 = vmul.f32 %v3490_v18, %v3315_v27  ;;  %v2976_v2 = vadd.f32 %v2925_v32, %v2579_v14  ;;  %v10261_v4 = vsel %vm2999_vm6, %v11567_v26, %v11453_v17  ;;  %v3495_v26 = vpop.permute.xlu2 %3494 }
 0x322   : > { %11568 = vst [vmem:[#allocation7_spill] sm:$0xff] %v10261_v4  ;;  %v4304_v18 = vshrl.u32 %v10179_v49, 16 }
 0x323   : > { %v3883_v59 = vsel %vm9470_vm15, %v3874_v22, %v3882_v23  ;;  %v3623_v12 = vpack.c.bf16 %v3567_v48, %v3567_v48  ;;  %v3240_v8 = vadd.f32 %v3189_v11, %v2976_v2  ;;  %v10249_v21 = vld [vmem:[#allocation2 + $0x60] sm:$0xff] }
 0x324   : > { %v10251_v9 = vld [vmem:[#allocation2 + $0x60] sm:$0xff]  ;;  %4058 = vst.msk [vmem:[#allocation2 + $0x68] sm:$0xf] %vm3578_vm5, %v3883_v59  ;;  %v4308_v14 = vshll.u32 %v10249_v21, 16 }
 0x325   : > { %v3886_v40 = vshrl.u32 %v3623_v12, 16  ;;  %v3889_v27 = vshll.u32 %v3623_v12, 16  ;;  %v3280_v11 = vadd.f32 %v9876_v10, %v3240_v8  ;;  %v5401_v22 = vshrl.u32 %v10251_v9, 16 }
 0x326   : > { %v2530_v32 = vpop.f32.mrf.mxu2  ;;  %v3884_v12 = vrot.slane %v3882_v23, 4  ;;  %v4306_v8 = vor.u32 %v4304_v18, %v10200_v61  ;;  %v10270_v33 = vrot.slane %v4308_v14, 1  ;;  %v5404_v41 = vshll.u32 %v10251_v9, 16 }
 0x327   : > { %v3888_v48 = vrot.slane %v3886_v40, 6  ;;  %v3891_v0 = vrot.slane %v3889_v27, 7  ;;  %v3316_v2 = vmax.f32 %v3280_v11, 0.0  ;;  %v2580_v59 = vadd.f32 %v2530_v32, %v2191_v39  ;;  %v2927_v28 = vpop.f32.mrf.mxu3 }
 0x328   : > { %v3194_v17 = vpop.f32.mrf.mxu0  ;;  %v4311_v40 = vsel %vm400_vm0, %v4306_v8, %v10270_v33  ;;  %v11569_v39 = vrot.slane %v9745_v50, 1  ;;  %v11570_v27 = vrot.slane %v9676_v13, 1  ;;  %v11571_v61 = vrot.slane %v9816_v57, 1 }
 0x329   : > { %v3892_v4 = vor.u32 %v3891_v0, %v3888_v48  ;;  %v3568_v16 = vmul.f32 %v3495_v26, %v3316_v2  ;;  %v2977_v63 = vadd.f32 %v2927_v28, %v2580_v59  ;;  %v10272_v5 = vpop.f32.mrf.mxu1  ;;  %v11572_v11 = vrot.slane %v9781_v1, 1  ;;  %v8345_v2 = vld [vmem:[#allocation2 + $0x20] sm:$0xff] }
 0x32a   : > { %v4692_v23 = vsel %vm899_vm2, %v11570_v27, %v11569_v39  ;;  %v5403_v32 = vrot.slane %v5401_v22, 1  ;;  %v5406_v13 = vrot.slane %v5404_v41, 2  ;;  %v11456_v28 = vrot.slane %v10251_v9, 2  ;;  %v3500_v27 = vpop.permute.xlu0 %3499 }
 0x32b   : > { %v5065_v14 = vsel %vm899_vm2, %v11572_v11, %v11571_v61  ;;  %v3893_v18 = vsel %vm9470_vm15, %v3884_v12, %v3892_v4  ;;  %v3624_v48 = vpack.c.bf16 %v3568_v16, %v3568_v16  ;;  %v3241_v0 = vadd.f32 %v3191_v45, %v2977_v63  ;;  %7778 = vmatmul.msk.bf16.gmra.mxu2 %vm4372_vm8, %v8345_v2  ;;  %v10298_v45 = vld [vmem:[#allocation2 + $0x60] sm:$0xff] }
 0x32c   : > { %7906 = vmatmul.msk.bf16.gmra.mxu0 %vm4372_vm8, %v5065_v14  ;;  %4059 = vst.msk [vmem:[#allocation2 + $0x6c] sm:$0xf] %vm3578_vm5, %v3893_v18  ;;  %7759 = vmatmul.msk.bf16.gmra.mxu1 %vm4372_vm8, %v4311_v40  ;;  %v10296_v63 = vor.u32 %v5406_v13, %v5403_v32  ;;  %v11574_v61 = vrot.slane %v10181_v3, 2  ;;  %v3894_v14 = vrot.slane %v3892_v4, 4  ;;  %v11578_v4 = vrot.slane %v10229_v52, 3 }
 0x32d   : > { %7808 = vmatmul.msk.bf16.gmra.mxu3 %vm4372_vm8, %v4692_v23  ;;  %v3896_v1 = vshrl.u32 %v3624_v48, 16  ;;  %v3899_v59 = vshll.u32 %v3624_v48, 16  ;;  %v3281_v22 = vadd.f32 %v9876_v10, %v3241_v0  ;;  %v11455_v0 = vrot.slane %v10298_v45, 3 }
 0x32e   : > { %v2533_v16 = vpop.f32.mrf.mxu2  ;;  %v10304_v41 = vsel %vm1552_vm3, %v10227_v47, %v10296_v63  ;;  %v10311_v11 = vsel %vm1949_vm4, %v11574_v61, %v11456_v28 }
 0x32f   : > { %v3898_v26 = vrot.slane %v3896_v1, 6  ;;  %v3901_v12 = vrot.slane %v3899_v59, 7  ;;  %v3317_v8 = vmax.f32 %v3281_v22, 0.0  ;;  %v2581_v39 = vadd.f32 %v2533_v16, %v9338_v37  ;;  %v2930_v40 = vpop.f32.mrf.mxu3  ;;  %11573 = vst [vmem:[#allocation42_spill] sm:$0xff] %v10304_v41  ;;  %v11576_v22 = vld [vmem:[#allocation9_spill] sm:$0xff]  ;;  %v11577_v16 = vld [vmem:[#allocation8_spill] sm:$0xff] }
 0x330   : > { %v3196_v23 = vpop.f32.mrf.mxu0  ;;  %11575 = vst [vmem:[#allocation43_spill] sm:$0xff] %v10311_v11  ;;  %v2193_v61 = vadd.f32 %v11577_v16, %v11576_v22 }
 0x331   : > { %v3902_v32 = vor.u32 %v3901_v12, %v3898_v26  ;;  %v3569_v18 = vmul.f32 %v3500_v27, %v3317_v8  ;;  %v2978_v48 = vadd.f32 %v2930_v40, %v2581_v39  ;;  %v10313_v37 = vpop.f32.mrf.mxu1  ;;  %v10330_v26 = vsel %vm2999_vm6, %v11578_v4, %v11455_v0  ;;  %v3505_v0 = vpop.permute.xlu1 %3504 }
 0x332   : > { %11579 = vst [vmem:[#allocation9_spill] sm:$0xff] %v10330_v26  ;;  %v4312_v27 = vshrl.u32 %v10249_v21, 16 }
 0x333   : > { %v3903_v2 = vsel %vm9470_vm15, %v3894_v14, %v3902_v32  ;;  %v3625_v47 = vpack.c.bf16 %v3569_v18, %v3569_v18  ;;  %v3242_v13 = vadd.f32 %v3194_v17, %v2978_v48  ;;  %v10318_v1 = vld [vmem:[#allocation2 + $0x68] sm:$0xff] }
 0x334   : > { %v10320_v59 = vld [vmem:[#allocation2 + $0x68] sm:$0xff]  ;;  %4060 = vst.msk [vmem:[#allocation2 + $0x70] sm:$0xf] %vm3578_vm5, %v3903_v2  ;;  %v4316_v39 = vshll.u32 %v10318_v1, 16 }
 0x335   : > { %v3906_v12 = vshrl.u32 %v3625_v47, 16  ;;  %v3909_v8 = vshll.u32 %v3625_v47, 16  ;;  %v3282_v17 = vadd.f32 %v9876_v10, %v3242_v13  ;;  %v5410_v48 = vshrl.u32 %v10320_v59, 16 }
 0x336   : > { %v2535_v40 = vpop.f32.mrf.mxu2  ;;  %v3904_v47 = vrot.slane %v3902_v32, 4  ;;  %v4314_v13 = vor.u32 %v4312_v27, %v10270_v33  ;;  %v10339_v26 = vrot.slane %v4316_v39, 1  ;;  %v5413_v18 = vshll.u32 %v10320_v59, 16 }
 0x337   : > { %v3908_v2 = vrot.slane %v3906_v12, 6  ;;  %v3911_v52 = vrot.slane %v3909_v8, 7  ;;  %v3318_v22 = vmax.f32 %v3282_v17, 0.0  ;;  %v2582_v16 = vadd.f32 %v2535_v40, %v2193_v61  ;;  %v2932_v4 = vpop.f32.mrf.mxu3 }
 0x338   : > { %v3199_v28 = vpop.f32.mrf.mxu0  ;;  %v4319_v12 = vsel %vm400_vm0, %v4314_v13, %v10339_v26  ;;  %v11580_v61 = vrot.slane %v9813_v20, 1  ;;  %v11581_v8 = vrot.slane %v9745_v50, 1  ;;  %v11582_v33 = vrot.slane %v9902_v25, 1 }
 0x339   : > { %v3912_v11 = vor.u32 %v3911_v52, %v3908_v2  ;;  %v3570_v36 = vmul.f32 %v3505_v0, %v3318_v22  ;;  %v2979_v35 = vadd.f32 %v2932_v4, %v2582_v16  ;;  %v10341_v14 = vpop.f32.mrf.mxu1  ;;  %v11583_v17 = vrot.slane %v9816_v57, 1  ;;  %v8346_v52 = vld [vmem:[#allocation2 + $0x28] sm:$0xff] }
 0x33a   : > { %v4694_v32 = vsel %vm899_vm2, %v11581_v8, %v11580_v61  ;;  %v5412_v39 = vrot.slane %v5410_v48, 1  ;;  %v5415_v50 = vrot.slane %v5413_v18, 2  ;;  %v11458_v16 = vrot.slane %v10320_v59, 2  ;;  %v11584_v61 = vld [vmem:[#allocation11_spill] sm:$0xff] }
 0x33b   : > { %v5067_v0 = vsel %vm899_vm2, %v11583_v17, %v11582_v33  ;;  %v3913_v40 = vsel %vm9470_vm15, %v3904_v47, %v3912_v11  ;;  %v3626_v27 = vpack.c.bf16 %v3570_v36, %v3570_v36  ;;  %v3243_v2 = vadd.f32 %v3196_v23, %v2979_v35  ;;  %7779 = vmatmul.msk.bf16.gmra.mxu2 %vm4372_vm8, %v8346_v52  ;;  %v10367_v23 = vld [vmem:[#allocation2 + $0x68] sm:$0xff]  ;;  %v3510_v33 = vpop.permute.xlu2 %3509 }
 0x33c   : > { %7907 = vmatmul.msk.bf16.gmra.mxu0 %vm4372_vm8, %v5067_v0  ;;  %4061 = vst.msk [vmem:[#allocation2 + $0x74] sm:$0xf] %vm3578_vm5, %v3913_v40  ;;  %7760 = vmatmul.msk.bf16.gmra.mxu1 %vm4372_vm8, %v4319_v12  ;;  %v10365_v35 = vor.u32 %v5415_v50, %v5412_v39  ;;  %v3914_v0 = vrot.slane %v3912_v11, 4  ;;  %v11457_v52 = vrot.slane %v10367_v23, 3  ;;  %v11590_v11 = vrot.slane %v10298_v45, 3 }
 0x33d   : > { %7809 = vmatmul.msk.bf16.gmra.mxu3 %vm4372_vm8, %v4694_v32  ;;  %v3916_v57 = vshrl.u32 %v3626_v27, 16  ;;  %v3919_v22 = vshll.u32 %v3626_v27, 16  ;;  %v3283_v48 = vadd.f32 %v9876_v10, %v3243_v2  ;;  %v11586_v10 = vrot.slane %v10251_v9, 2 }
 0x33e   : > { %v2538_v36 = vpop.f32.mrf.mxu2  ;;  %v10373_v18 = vsel %vm1552_vm3, %v10296_v63, %v10365_v35 }
 0x33f   : > { %v3918_v4 = vrot.slane %v3916_v57, 6  ;;  %v3921_v47 = vrot.slane %v3919_v22, 7  ;;  %v3319_v13 = vmax.f32 %v3283_v48, 0.0  ;;  %v2583_v8 = vadd.f32 %v2538_v36, %v11584_v61  ;;  %v2935_v12 = vpop.f32.mrf.mxu3  ;;  %11585 = vst [vmem:[#allocation8_spill] sm:$0xff] %v10373_v18  ;;  %v11588_v36 = vld [vmem:[#allocation12_spill] sm:$0xff]  ;;  %v11589_v61 = vld [vmem:[#allocation10_spill] sm:$0xff] }
 0x340   : > { %v3201_v32 = vpop.f32.mrf.mxu0  ;;  %v10380_v17 = vsel %vm1949_vm4, %v11586_v10, %v11458_v16  ;;  %v2195_v10 = vadd.f32 %v11589_v61, %v11588_v36 }
 0x341   : > { %11587 = vst [vmem:[#allocation11_spill] sm:$0xff] %v10380_v17  ;;  %v3922_v39 = vor.u32 %v3921_v47, %v3918_v4  ;;  %v3571_v40 = vmul.f32 %v3510_v33, %v3319_v13  ;;  %v2980_v27 = vadd.f32 %v2935_v12, %v2583_v8  ;;  %v10382_v2 = vpop.f32.mrf.mxu1  ;;  %v10399_v4 = vsel %vm2999_vm6, %v11590_v11, %v11457_v52  ;;  %v3515_v52 = vpop.permute.xlu0 %3514 }
 0x342   : > { %11591 = vst [vmem:[#allocation12_spill] sm:$0xff] %v10399_v4 }
 0x343   : > { %v3923_v50 = vsel %vm9470_vm15, %v3914_v0, %v3922_v39  ;;  %v3627_v63 = vpack.c.bf16 %v3571_v40, %v3571_v40  ;;  %v3244_v57 = vadd.f32 %v3199_v28, %v2980_v27  ;;  %v10387_v22 = vld [vmem:[#allocation2 + $0x70] sm:$0xff]  ;;  %v10404_v28 = vld [vmem:[%s11414_s2] ss:$0 sm:$0xff]  ;;  %v4320_v0 = vshrl.u32 %v10318_v1, 16 }
 0x344   : > { %v10389_v48 = vld [vmem:[#allocation2 + $0x70] sm:$0xff]  ;;  %4062 = vst.msk [vmem:[#allocation2 + $0x78] sm:$0xf] %vm3578_vm5, %v3923_v50  ;;  %v4324_v12 = vshll.u32 %v10387_v22, 16  ;;  %v3924_v16 = vrot.slane %v3922_v39, 4 }
 0x345   : > { %v3926_v47 = vshrl.u32 %v3627_v63, 16  ;;  %v3929_v13 = vshll.u32 %v3627_v63, 16  ;;  %v3284_v8 = vadd.f32 %v10404_v28, %v3244_v57  ;;  %v5419_v27 = vshrl.u32 %v10389_v48, 16 }
 0x346   : > { %v2540_v33 = vpop.f32.mrf.mxu2  ;;  %v4322_v57 = vor.u32 %v4320_v0, %v10339_v26  ;;  %v10413_v17 = vrot.slane %v4324_v12, 1  ;;  %v5422_v45 = vshll.u32 %v10389_v48, 16  ;;  %v11594_v26 = vrot.slane %v9968_v56, 1 }
 0x347   : > { %v3928_v50 = vrot.slane %v3926_v47, 6  ;;  %v3931_v63 = vrot.slane %v3929_v13, 7  ;;  %v3320_v36 = vmax.f32 %v3284_v8, 0.0  ;;  %v2584_v61 = vadd.f32 %v2540_v33, %v2195_v10  ;;  %v2937_v11 = vpop.f32.mrf.mxu3 }
 0x348   : > { %v3204_v4 = vpop.f32.mrf.mxu0  ;;  %v4327_v47 = vsel %vm400_vm0, %v4322_v57, %v10413_v17  ;;  %v11592_v10 = vrot.slane %v9900_v54, 1  ;;  %v11593_v13 = vrot.slane %v9813_v20, 1  ;;  %v11595_v8 = vrot.slane %v9902_v25, 1 }
 0x349   : > { %v3932_v53 = vor.u32 %v3931_v63, %v3928_v50  ;;  %v3572_v18 = vmul.f32 %v3515_v52, %v3320_v36  ;;  %v2981_v55 = vadd.f32 %v2937_v11, %v2584_v61  ;;  %v10415_v40 = vpop.f32.mrf.mxu1  ;;  %v5421_v12 = vrot.slane %v5419_v27, 1  ;;  %v8348_v63 = vld [vmem:[#allocation2 + $0x30] sm:$0xff] }
 0x34a   : > { %v4696_v39 = vsel %vm899_vm2, %v11593_v13, %v11592_v10  ;;  %v5069_v52 = vsel %vm899_vm2, %v11595_v8, %v11594_v26  ;;  %v5424_v20 = vrot.slane %v5422_v45, 2  ;;  %v11596_v10 = vld [vmem:[#allocation13_spill] sm:$0xff]  ;;  %v3520_v26 = vpop.permute.xlu1 %3519  ;;  %v11598_v8 = vrot.slane %v10320_v59, 2 }
 0x34b   : > { %v3933_v33 = vsel %vm9470_vm15, %v3924_v16, %v3932_v53  ;;  %v3628_v0 = vpack.c.bf16 %v3572_v18, %v3572_v18  ;;  %v3245_v50 = vadd.f32 %v3201_v32, %v2981_v55  ;;  %7780 = vmatmul.msk.bf16.gmra.mxu2 %vm4372_vm8, %v8348_v63  ;;  %v11459_v16 = vrot.slane %v10389_v48, 2  ;;  %v10441_v32 = vld [vmem:[#allocation2 + $0x70] sm:$0xff] }
 0x34c   : > { %7908 = vmatmul.msk.bf16.gmra.mxu0 %vm4372_vm8, %v5069_v52  ;;  %4063 = vst.msk [vmem:[#allocation2 + $0x7c] sm:$0xf] %vm3578_vm5, %v3933_v33  ;;  %7761 = vmatmul.msk.bf16.gmra.mxu1 %vm4372_vm8, %v4327_v47  ;;  %v10439_v55 = vor.u32 %v5424_v20, %v5421_v12  ;;  %v3934_v12 = vrot.slane %v3932_v53, 4  ;;  %v11460_v20 = vrot.slane %v10441_v32, 3  ;;  %v11602_v53 = vrot.slane %v10367_v23, 3 }
 0x34d   : > { %7810 = vmatmul.msk.bf16.gmra.mxu3 %vm4372_vm8, %v4696_v39  ;;  %v3936_v25 = vshrl.u32 %v3628_v0, 16  ;;  %v3939_v36 = vshll.u32 %v3628_v0, 16  ;;  %v3285_v27 = vadd.f32 %v10404_v28, %v3245_v50  ;;  %v10454_v52 = vsel %vm1949_vm4, %v11598_v8, %v11459_v16  ;;  %v11601_v8 = vld [vmem:[#allocation14_spill] sm:$0xff] }
 0x34e   : > { %v2543_v18 = vpop.f32.mrf.mxu2  ;;  %v10447_v45 = vsel %vm1552_vm3, %v10365_v35, %v10439_v55  ;;  %11599 = vst [vmem:[#allocation13_spill] sm:$0xff] %v10454_v52 }
 0x34f   : > { %v3938_v61 = vrot.slane %v3936_v25, 6  ;;  %v3941_v11 = vrot.slane %v3939_v36, 7  ;;  %v3321_v57 = vmax.f32 %v3285_v27, 0.0  ;;  %v2585_v13 = vadd.f32 %v2543_v18, %v11596_v10  ;;  %v2940_v47 = vpop.f32.mrf.mxu3  ;;  %11597 = vst [vmem:[#allocation10_spill] sm:$0xff] %v10447_v45  ;;  %v11600_v10 = vld [vmem:[#allocation16_spill] sm:$0xff] }
 0x350   : > { %v3206_v39 = vpop.f32.mrf.mxu0  ;;  %v2197_v16 = vadd.f32 %v11601_v8, %v11600_v10 }
 0x351   : > { %v3942_v33 = vor.u32 %v3941_v11, %v3938_v61  ;;  %v3573_v0 = vmul.f32 %v3520_v26, %v3321_v57  ;;  %v2982_v50 = vadd.f32 %v2940_v47, %v2585_v13  ;;  %v10456_v63 = vpop.f32.mrf.mxu1  ;;  %v10473_v61 = vsel %vm2999_vm6, %v11602_v53, %v11460_v20  ;;  %v3525_v20 = vpop.permute.xlu2 %3524 }
 0x352   : > { %11603 = vst [vmem:[#allocation16_spill] sm:$0xff] %v10473_v61  ;;  %v4328_v26 = vshrl.u32 %v10387_v22, 16 }
 0x353   : > { %v3943_v25 = vsel %vm9470_vm15, %v3934_v12, %v3942_v33  ;;  %v3629_v35 = vpack.c.bf16 %v3573_v0, %v3573_v0  ;;  %v3246_v36 = vadd.f32 %v3204_v4, %v2982_v50  ;;  %v10461_v27 = vld [vmem:[#allocation2 + $0x78] sm:$0xff] }
 0x354   : > { %v10463_v18 = vld [vmem:[#allocation2 + $0x78] sm:$0xff]  ;;  %4064 = vst.msk [vmem:[#allocation2 + $0x80] sm:$0xf] %vm3578_vm5, %v3943_v25  ;;  %v4332_v13 = vshll.u32 %v10461_v27, 16 }
 0x355   : > { %v3946_v11 = vshrl.u32 %v3629_v35, 16  ;;  %v3949_v57 = vshll.u32 %v3629_v35, 16  ;;  %v3286_v4 = vadd.f32 %v10404_v28, %v3246_v36  ;;  %v5428_v50 = vshrl.u32 %v10463_v18, 16 }
 0x356   : > { %v2545_v47 = vpop.f32.mrf.mxu2  ;;  %v3944_v35 = vrot.slane %v3942_v33, 4  ;;  %v4330_v36 = vor.u32 %v4328_v26, %v10413_v17  ;;  %v10482_v52 = vrot.slane %v4332_v13, 1  ;;  %v5431_v0 = vshll.u32 %v10463_v18, 16 }
 0x357   : > { %v3948_v25 = vrot.slane %v3946_v11, 6  ;;  %v3951_v23 = vrot.slane %v3949_v57, 7  ;;  %v3322_v10 = vmax.f32 %v3286_v4, 0.0  ;;  %v2586_v8 = vadd.f32 %v2545_v47, %v2197_v16  ;;  %v2942_v53 = vpop.f32.mrf.mxu3 }
 0x358   : > { %v3209_v61 = vpop.f32.mrf.mxu0  ;;  %v4335_v11 = vsel %vm400_vm0, %v4330_v36, %v10482_v52  ;;  %v11604_v16 = vrot.slane %v9966_v51, 1  ;;  %v11605_v57 = vrot.slane %v9900_v54, 1  ;;  %v11606_v17 = vrot.slane %v10034_v24, 1  ;;  %v11608_v36 = vld [vmem:[#allocation17_spill] sm:$0xff] }
 0x359   : > { %v3952_v45 = vor.u32 %v3951_v23, %v3948_v25  ;;  %v3574_v41 = vmul.f32 %v3525_v20, %v3322_v10  ;;  %v2983_v46 = vadd.f32 %v2942_v53, %v2586_v8  ;;  %v10484_v12 = vpop.f32.mrf.mxu1  ;;  %v11607_v4 = vrot.slane %v9968_v56, 1  ;;  %v8349_v23 = vld [vmem:[#allocation2 + $0x38] sm:$0xff] }
 0x35a   : > { %v4698_v33 = vsel %vm899_vm2, %v11605_v57, %v11604_v16  ;;  %v5430_v13 = vrot.slane %v5428_v50, 1  ;;  %v5433_v54 = vrot.slane %v5431_v0, 2 }
 0x35b   : > { %v5071_v20 = vsel %vm899_vm2, %v11607_v4, %v11606_v17  ;;  %v3953_v47 = vsel %vm9470_vm15, %v3944_v35, %v3952_v45  ;;  %v3630_v26 = vpack.c.bf16 %v3574_v41, %v3574_v41  ;;  %v3247_v25 = vadd.f32 %v3206_v39, %v2983_v46  ;;  %7781 = vmatmul.msk.bf16.gmra.mxu2 %vm4372_vm8, %v8349_v23  ;;  %v10509_v46 = vld [vmem:[#allocation2 + $0x78] sm:$0xff]  ;;  %v3530_v17 = vpop.permute.xlu0 %3529 }
 0x35c   : > { %7909 = vmatmul.msk.bf16.gmra.mxu0 %vm4372_vm8, %v5071_v20  ;;  %4065 = vst.msk [vmem:[#allocation2 + $0x84] sm:$0xf] %vm3578_vm5, %v3953_v47  ;;  %7762 = vmatmul.msk.bf16.gmra.mxu1 %vm4372_vm8, %v4335_v11  ;;  %v10507_v53 = vor.u32 %v5433_v54, %v5430_v13 }
 0x35d   : > { %7811 = vmatmul.msk.bf16.gmra.mxu3 %vm4372_vm8, %v4698_v33  ;;  %v3956_v56 = vshrl.u32 %v3630_v26, 16  ;;  %v3959_v10 = vshll.u32 %v3630_v26, 16  ;;  %v3287_v50 = vadd.f32 %v10404_v28, %v3247_v25  ;;  %v3954_v33 = vrot.slane %v3952_v45, 4 }
 0x35e   : > { %v2548_v8 = vpop.f32.mrf.mxu2  ;;  %v10515_v0 = vsel %vm1552_vm3, %v10439_v55, %v10507_v53  ;;  %v11462_v26 = vrot.slane %v10463_v18, 2  ;;  %v11461_v25 = vrot.slane %v10509_v46, 3  ;;  %v11610_v55 = vld [vmem:[#allocation18_spill] sm:$0xff] }
 0x35f   : > { %v3958_v41 = vrot.slane %v3956_v56, 6  ;;  %v3961_v39 = vrot.slane %v3959_v10, 7  ;;  %v3323_v35 = vmax.f32 %v3287_v50, 0.0  ;;  %v2587_v16 = vadd.f32 %v2548_v8, %v11608_v36  ;;  %v2945_v57 = vpop.f32.mrf.mxu3  ;;  %11609 = vst [vmem:[#allocation14_spill] sm:$0xff] %v10515_v0 }
 0x360   : > { %v3211_v11 = vpop.f32.mrf.mxu0  ;;  %v2199_v45 = vadd.f32 %v10027_v42, %v11610_v55  ;;  %v11611_v8 = vrot.slane %v10389_v48, 2 }
 0x361   : > { %v3962_v4 = vor.u32 %v3961_v39, %v3958_v41  ;;  %v3575_v20 = vmul.f32 %v3530_v17, %v3323_v35  ;;  %v2984_v13 = vadd.f32 %v2945_v57, %v2587_v16  ;;  %v10517_v47 = vpop.f32.mrf.mxu1  ;;  %v4336_v17 = vshrl.u32 %v10461_v27, 16 }
 0x362   : > { %v10535_v41 = vsel %vm1949_vm4, %v11611_v8, %v11462_v26 }
 0x363   : > { %v3963_v23 = vsel %vm9470_vm15, %v3954_v33, %v3962_v4  ;;  %v3631_v54 = vpack.c.bf16 %v3575_v20, %v3575_v20  ;;  %v3248_v56 = vadd.f32 %v3209_v61, %v2984_v13  ;;  %v10523_v10 = vld [vmem:[#allocation2 + $0x80] sm:$0xff]  ;;  %11612 = vst [vmem:[#allocation17_spill] sm:$0xff] %v10535_v41  ;;  %v11613_v61 = vrot.slane %v10441_v32, 3 }
 0x364   : > { %v10525_v50 = vld [vmem:[#allocation2 + $0x80] sm:$0xff]  ;;  %4066 = vst.msk [vmem:[#allocation2 + $0x88] sm:$0xf] %vm3578_vm5, %v3963_v23  ;;  %v4340_v16 = vshll.u32 %v10523_v10, 16 }
 0x365   : > { %v10542_v39 = vsel %vm2999_vm6, %v11613_v61, %v11461_v25  ;;  %v3966_v35 = vshrl.u32 %v3631_v54, 16  ;;  %v3969_v36 = vshll.u32 %v3631_v54, 16  ;;  %v3288_v42 = vadd.f32 %v10404_v28, %v3248_v56  ;;  %v3535_v25 = vpop.permute.xlu1 %3534 }
 0x366   : > { %11614 = vst [vmem:[#allocation18_spill] sm:$0xff] %v10542_v39  ;;  %v2550_v57 = vpop.f32.mrf.mxu2  ;;  %v5437_v13 = vshrl.u32 %v10525_v50, 16  ;;  %v3964_v54 = vrot.slane %v3962_v4, 4  ;;  %v4338_v56 = vor.u32 %v4336_v17, %v10482_v52  ;;  %v4342_v39 = vrot.slane %v4340_v16, 1 }
 0x367   : > { %v3968_v23 = vrot.slane %v3966_v35, 6  ;;  %v3971_v32 = vrot.slane %v3969_v36, 7  ;;  %v3324_v55 = vmax.f32 %v3288_v42, 0.0  ;;  %v2588_v8 = vadd.f32 %v2550_v57, %v2199_v45  ;;  %v2947_v61 = vpop.f32.mrf.mxu3 }
 0x368   : > { %v5167_v26 = vpop.f32.mrf.mxu0  ;;  %v5440_v20 = vshll.u32 %v10525_v50, 16  ;;  %v4343_v33 = vsel %vm400_vm0, %v4338_v56, %v4342_v39  ;;  %v11615_v35 = vrot.slane %v10032_v58, 1  ;;  %v11616_v45 = vrot.slane %v9966_v51, 1  ;;  %v3540_v56 = vpop.permute.xlu2 %3539 }
 0x369   : > { %v3972_v41 = vor.u32 %v3971_v32, %v3968_v23  ;;  %v3576_v0 = vmul.f32 %v3535_v25, %v3324_v55  ;;  %v2985_v30 = vadd.f32 %v2947_v61, %v2588_v8  ;;  %v10551_v6 = vpop.f32.mrf.mxu1  ;;  %v11617_v4 = vrot.slane %v10109_v62, 1  ;;  %v8350_v23 = vld [vmem:[#allocation2 + $0x40] sm:$0xff] }
 0x36a   : > { %v4700_v36 = vsel %vm899_vm2, %v11616_v45, %v11615_v35  ;;  %v11618_v52 = vrot.slane %v10034_v24, 1  ;;  %v5439_v25 = vrot.slane %v5437_v13, 1  ;;  %v5442_v51 = vrot.slane %v5440_v20, 2 }
 0x36b   : > { %v3973_v16 = vsel %vm9470_vm15, %v3964_v54, %v3972_v41  ;;  %v3632_v57 = vpack.c.bf16 %v3576_v0, %v3576_v0  ;;  %v3249_v17 = vadd.f32 %v3211_v11, %v2985_v30  ;;  %7782 = vmatmul.msk.bf16.gmra.mxu2 %vm4372_vm8, %v8350_v23  ;;  %v3974_v20 = vrot.slane %v3972_v41, 4 }
 0x36c   : > { %v5073_v42 = vsel %vm899_vm2, %v11618_v52, %v11617_v4  ;;  %4067 = vst.msk [vmem:[#allocation2 + $0x8c] sm:$0xf] %vm3578_vm5, %v3973_v16  ;;  %7763 = vmatmul.msk.bf16.gmra.mxu1 %vm4372_vm8, %v4343_v33  ;;  %v10573_v8 = vor.u32 %v5442_v51, %v5439_v25  ;;  %v8272_v52 = vld [vmem:[%s11415_s3 + $0x58] sm:$0xff]  ;;  %v11619_v23 = vrot.slane %v10463_v18, 2 }
 0x36d   : > { %7910 = vmatmul.msk.bf16.gmra.mxu0 %vm4372_vm8, %v5073_v42  ;;  %7812 = vmatmul.msk.bf16.gmra.mxu3 %vm4372_vm8, %v4700_v36  ;;  %v3976_v24 = vshrl.u32 %v3632_v57, 16  ;;  %v3979_v32 = vshll.u32 %v3632_v57, 16  ;;  %v3289_v13 = vadd.f32 %v10404_v28, %v3249_v17  ;;  %v11463_v42 = vrot.slane %v10525_v50, 2 }
 0x36e   : > { %v4583_v55 = vpop.f32.mrf.mxu2  ;;  %v10579_v33 = vsel %vm1552_vm3, %v10507_v53, %v10573_v8  ;;  %5791 = vmatpush.bf16.msra.mxu2 %v8272_v52  ;;  %v4344_v17 = vshrl.u32 %v10523_v10, 16 }
 0x36f   : > { %v3978_v30 = vrot.slane %v3976_v24, 6  ;;  %v3981_v11 = vrot.slane %v3979_v32, 7  ;;  %v3325_v0 = vmax.f32 %v3289_v13, 0.0  ;;  %v4584_v61 = vadd.f32 %v4583_v55, %v10057_v44  ;;  %v4794_v54 = vpop.f32.mrf.mxu3  ;;  %v8291_v44 = vld [vmem:[%s11415_s3 + $0x68] sm:$0xff] }
 0x370   : > { %v5169_v35 = vpop.f32.mrf.mxu0  ;;  %6164 = vmatpush.bf16.msra.mxu3 %v8291_v44  ;;  %v10605_v51 = vsel %vm1949_vm4, %v11619_v23, %v11463_v42 }
 0x371   : > { %v3982_v45 = vor.u32 %v3981_v11, %v3978_v30  ;;  %v3577_v36 = vmul.f32 %v3540_v56, %v3325_v0  ;;  %v4884_v28 = vadd.f32 %v4794_v54, %v4584_v61  ;;  %v10581_v4 = vpop.f32.mrf.mxu1  ;;  %11620 = vst [vmem:[#allocation44_spill] sm:$0xff] %v10605_v51  ;;  %v8286_v54 = vld [vmem:[#allocation2 + $0x80] sm:$0xff]  ;;  %v8293_v11 = vld [vmem:[%s11415_s3 + $0x78] sm:$0xff] }
 0x372   : > { %6544 = vmatpush.bf16.msra.mxu0 %v8293_v11 }
 0x373   : > { %v3983_v53 = vsel %vm9470_vm15, %v3974_v20, %v3982_v45  ;;  %v3633_v25 = vpack.c.bf16 %v3577_v36, %v3577_v36  ;;  %v10592_v41 = vld [vmem:[#allocation2 + $0x88] sm:$0xff]  ;;  %v10596_v57 = vadd.f32 %v5167_v26, %v4884_v28  ;;  %v4346_v26 = vor.u32 %v4344_v17, %v4342_v39 }
 0x374   : > { %v10594_v16 = vld [vmem:[#allocation2 + $0x88] sm:$0xff]  ;;  %4068 = vst.msk [vmem:[#allocation2 + $0x90] sm:$0xf] %vm3578_vm5, %v3983_v53  ;;  %v4348_v13 = vshll.u32 %v10592_v41, 16  ;;  %v3984_v23 = vrot.slane %v3982_v45, 4 }
 0x375   : > { %v3986_v24 = vshrl.u32 %v3633_v25, 16  ;;  %v3989_v32 = vshll.u32 %v3633_v25, 16  ;;  %v5446_v0 = vshrl.u32 %v10594_v16, 16  ;;  %v5449_v61 = vshll.u32 %v10594_v16, 16 }
 0x376   : > { %v4585_v30 = vpop.f32.mrf.mxu2  ;;  %v4350_v52 = vrot.slane %v4348_v13, 1 }
 0x377   : > { %v3988_v56 = vrot.slane %v3986_v24, 6  ;;  %v3991_v20 = vrot.slane %v3989_v32, 7  ;;  %v4586_v36 = vadd.f32 %v4585_v30, %v10102_v34  ;;  %v4796_v28 = vpop.f32.mrf.mxu3  ;;  %v5448_v53 = vrot.slane %v5446_v0, 1  ;;  %v4070_v24 = vld [vmem:[#allocation2 + $0x98] sm:$0x3] }
 0x378   : > { %v5172_v44 = vpop.f32.mrf.mxu0  ;;  %v5451_v25 = vrot.slane %v5449_v61, 2  ;;  %v4351_v17 = vsel %vm400_vm0, %v4346_v26, %v4350_v52  ;;  %v11621_v32 = vrot.slane %v10181_v3, 1  ;;  %v11622_v34 = vrot.slane %v10109_v62, 1 }
 0x379   : > { %v3992_v42 = vor.u32 %v3991_v20, %v3988_v56  ;;  %v4885_v55 = vadd.f32 %v4796_v28, %v4586_v36  ;;  %v10613_v39 = vpop.f32.mrf.mxu1  ;;  %v6709_v0 = vrot.slane %v8286_v54, 3  ;;  %v8351_v56 = vld [vmem:[#allocation2 + $0x48] sm:$0xff]  ;;  %v11623_v26 = vrot.slane %v10107_v60, 1 }
 0x37a   : > { %v5075_v13 = vsel %vm899_vm2, %v11622_v34, %v11621_v32  ;;  %v5452_v30 = vor.u32 %v5451_v25, %v5448_v53  ;;  %v11624_v20 = vrot.slane %v10032_v58, 1 }
 0x37b   : > { %v3993_v45 = vsel %vm9470_vm15, %v3984_v23, %v3992_v42  ;;  %v3994_v61 = vrot.slane %v3992_v42, 4  ;;  %7783 = vmatmul.msk.bf16.gmra.mxu2 %vm4372_vm8, %v8351_v56  ;;  %v4113_v62 = vld [vmem:[#allocation2 + $0x90] sm:$0x1]  ;;  %v10633_v28 = vadd.f32 %v5169_v35, %v4885_v55  ;;  %v8295_v42 = vld [vmem:[%s11415_s3 + $0x88] sm:$0xff]  ;;  %v11626_v35 = vrot.slane %v10509_v46, 3 }
 0x37c   : > { %v4702_v36 = vsel %vm899_vm2, %v11624_v20, %v11623_v26  ;;  %4069 = vst.msk [vmem:[#allocation2 + $0x94] sm:$0xf] %vm3578_vm5, %v3993_v45  ;;  %7764 = vmatmul.msk.bf16.gmra.mxu1 %vm4372_vm8, %v4351_v17  ;;  %v4192_v29 = vunpack.c.l.b16 %v4113_v62  ;;  %v10643_v58 = vsel %vm1552_vm3, %v10573_v8, %v5452_v30  ;;  %v10655_v8 = vld [vmem:[#allocation2 + $0x88] sm:$0xff]  ;;  %v4352_v62 = vshrl.u32 %v10592_v41, 16 }
 0x37d   : > { %7911 = vmatmul.msk.bf16.gmra.mxu0 %vm4372_vm8, %v5075_v13  ;;  %7813 = vmatmul.msk.bf16.gmra.mxu3 %vm4372_vm8, %v4702_v36  ;;  %v4071_v53 = vsel %vm9384_vm11, %v3994_v61, %v4070_v24  ;;  %v10650_v55 = vsel %vm2999_vm6, %v11626_v35, %v6709_v0  ;;  %v5713_v61 = vrot.slane %v10594_v16, 2  ;;  %v11464_v56 = vrot.slane %v10655_v8, 3 }
 0x37e   : > { %11627 = vst [vmem:[#allocation15_spill] sm:$0xff] %v10650_v55  ;;  %v4588_v25 = vpop.f32.mrf.mxu2  ;;  %6791 = vmatpush.bf16.msra.mxu1 %v8295_v42  ;;  %v10653_v32 = vpack.c.b16 %v4192_v29, %v4192_v29  ;;  %v5076_v29 = vrot.slane %v10251_v9, 1  ;;  %v11628_v42 = vrot.slane %v10525_v50, 2  ;;  %v4354_v9 = vor.u32 %v4352_v62, %v4350_v52 }
 0x37f   : > { %4072 = vst [vmem:[#allocation2 + $0x98] sm:$0x3] %v4071_v53  ;;  %v4589_v23 = vadd.f32 %v4588_v25, %v10132_v15  ;;  %v4799_v17 = vpop.f32.mrf.mxu3  ;;  %v4703_v15 = vrot.slane %v10179_v49, 1  ;;  %v10679_v54 = vsel %vm2999_vm6, %v6709_v0, %v11464_v56  ;;  %v11632_v0 = vrot.slane %v10181_v3, 1 }
 0x380   : > { %v5174_v34 = vpop.f32.mrf.mxu0  ;;  %v4356_v11 = vshll.u32 %v10653_v32, 16  ;;  %11630 = vst [vmem:[#allocation46_spill] sm:$0xff] %v10679_v54 }
 0x381   : > { %v4886_v13 = vadd.f32 %v4799_v17, %v4589_v23  ;;  %v10657_v45 = vpop.f32.mrf.mxu1  ;;  %v5077_v56 = vsel %vm899_vm2, %v11632_v0, %v5076_v29 }
 0x382   : > { %v4358_v35 = vrot.slane %v4356_v11, 1  ;;  %v8352_v11 = vld [vmem:[#allocation2 + $0x50] sm:$0xff] }
 0x383   : > { %v10660_v46 = vld [vmem:[#allocation2 + $0x90] sm:$0xff]  ;;  %v10662_v24 = vadd.f32 %v5172_v44, %v4886_v13  ;;  %v10674_v44 = vsel %vm1949_vm4, %v11628_v42, %v5713_v61  ;;  %v11631_v42 = vrot.slane %v10107_v60, 1 }
 0x384   : > { %v5455_v26 = vshrl.u32 %v10660_v46, 16  ;;  %v5458_v20 = vshll.u32 %v10660_v46, 16  ;;  %11629 = vst [vmem:[#allocation45_spill] sm:$0xff] %v10674_v44 }
 0x385   : > { %v4704_v44 = vsel %vm899_vm2, %v11631_v42, %v4703_v15 }
 0x386   : > { %v4590_v36 = vpop.f32.mrf.mxu2  ;;  %v5457_v25 = vrot.slane %v5455_v26, 1  ;;  %v5460_v23 = vrot.slane %v5458_v20, 2  ;;  %v5293_v60 = vld [vmem:[#allocation2 + $0x98] sm:$0x3] }
 0x387   : > { %v4591_v49 = vadd.f32 %v4590_v36, %v10174_v7  ;;  %v4801_v53 = vpop.f32.mrf.mxu3  ;;  %v4359_v7 = vsel %vm400_vm0, %v4354_v9, %v4358_v35  ;;  %v5300_v62 = vunpack.c.l.b16 %v5293_v60  ;;  %v8289_v42 = vld [vmem:[#allocation2 + $0x98] sm:$0xff] }
 0x388   : > { %v5177_v17 = vpop.f32.mrf.mxu0  ;;  %v10684_v51 = vor.u32 %v5460_v23, %v5457_v25  ;;  %v5715_v23 = vrot.slane %v10660_v46, 2 }
 0x389   : > { %v4887_v13 = vadd.f32 %v4801_v53, %v4591_v49  ;;  %v10682_v55 = vpop.f32.mrf.mxu1  ;;  %v6293_v49 = vld [vmem:[#allocation2 + $0xa0] sm:$0x7] }
 0x38a   : > { %v10699_v52 = vsel %vm1552_vm3, %v5452_v30, %v10684_v51  ;;  %v10708_v30 = vpack.c.b16 %v5300_v62, %v5300_v62 }
 0x38b   : > { %7784 = vmatmul.msk.bf16.gmra.mxu2 %vm4372_vm8, %v8352_v11  ;;  %v10695_v26 = vadd.f32 %v5174_v34, %v4887_v13  ;;  %v6300_v34 = vunpack.c.l.b16 %v6293_v49  ;;  %v8288_v13 = vld [vmem:[#allocation2 + $0x90] sm:$0xff]  ;;  %v6715_v49 = vrot.slane %v8289_v42, 3 }
 0x38c   : > { %7765 = vmatmul.msk.bf16.gmra.mxu1 %vm4372_vm8, %v4359_v7  ;;  %v5717_v60 = vrot.slane %v10708_v30, 2  ;;  %v6713_v62 = vrot.slane %v8288_v13, 3 }
 0x38d   : > { %7912 = vmatmul.msk.bf16.gmra.mxu0 %vm4372_vm8, %v5077_v56  ;;  %7814 = vmatmul.msk.bf16.gmra.mxu3 %vm4372_vm8, %v4704_v44  ;;  %v10712_v44 = vsel %vm1949_vm4, %v5713_v61, %v5715_v23  ;;  %v10715_v0 = vpack.c.b16 %v6300_v34, %v6300_v34  ;;  %v8353_v34 = vld [vmem:[#allocation2 + $0x58] sm:$0xff] }
 0x38e   : > { %v4593_v3 = vpop.f32.mrf.mxu2  ;;  %11633 = vst [vmem:[#allocation47_spill] sm:$0xff] %v10712_v44  ;;  %v10723_v61 = vsel %vm1949_vm4, %v5715_v23, %v5717_v60  ;;  %v10741_v13 = vsel %vm2999_vm6, %v6713_v62, %v6715_v49 }
 0x38f   : > { %v4594_v20 = vadd.f32 %v4593_v3, %v10202_v38  ;;  %v4804_v36 = vpop.f32.mrf.mxu3  ;;  %v5078_v38 = vrot.slane %v10320_v59, 1  ;;  %11634 = vst [vmem:[#allocation48_spill] sm:$0xff] %v10715_v0 }
 0x390   : > { %v5179_v53 = vpop.f32.mrf.mxu0  ;;  %11635 = vst [vmem:[#allocation49_spill] sm:$0xff] %v10723_v61 }
 0x391   : > { %v4888_v35 = vadd.f32 %v4804_v36, %v4594_v20  ;;  %v10704_v56 = vpop.f32.mrf.mxu1  ;;  %v5079_v59 = vsel %vm899_vm2, %v5076_v29, %v5078_v38  ;;  %v11638_v29 = vld [vmem:[#allocation20_spill] sm:$0xff] }
 0x392   : > { %11639 = vst [vmem:[#allocation20_spill] sm:$0xff] %v10741_v13 }
 0x393   : > { %v10706_v25 = vadd.f32 %v5177_v17, %v4888_v35  ;;  %v4705_v17 = vrot.slane %v10249_v21, 1  ;;  %v6717_v35 = vrot.slane %v10715_v0, 3 }
 0x395   : > { %v10744_v42 = vsel %vm2999_vm6, %v6715_v49, %v6717_v35 }
 0x396   : > { %v4595_v9 = vpop.f32.mrf.mxu2  ;;  %11640 = vst [vmem:[#allocation51_spill] sm:$0xff] %v10744_v42 }
 0x397   : > { %v4596_v7 = vadd.f32 %v4595_v9, %v10244_v19  ;;  %v4806_v11 = vpop.f32.mrf.mxu3  ;;  %v4706_v19 = vsel %vm899_vm2, %v4703_v15, %v4705_v17 }
 0x399   : > { %v5182_v3 = vpop.f32.mrf.mxu0  ;;  %v4889_v20 = vadd.f32 %v4806_v11, %v4596_v7  ;;  %v10720_v36 = vpop.f32.mrf.mxu1  ;;  %v11636_v7 = vrot.slane %v10655_v8, 3 }
 0x39b   : > { %7785 = vmatmul.msk.bf16.gmra.mxu2 %vm4372_vm8, %v8353_v34  ;;  %v10730_v9 = vadd.f32 %v5179_v53, %v4889_v20  ;;  %v10735_v23 = vsel %vm2999_vm6, %v11636_v7, %v6713_v62 }
 0x39c   : > { %11637 = vst [vmem:[#allocation50_spill] sm:$0xff] %v10735_v23  ;;  %7932 = vmatmul.msk.bf16.vlgmr.msrb.gmra.mxu1 %vm4372_vm8, %v11638_v29  ;;  %v4707_v29 = vrot.slane %v10318_v1, 1 }
 0x39d   : > { %7913 = vmatmul.msk.bf16.gmra.mxu0 %vm4372_vm8, %v5079_v59  ;;  %7815 = vmatmul.msk.bf16.gmra.mxu3 %vm4372_vm8, %v4706_v19  ;;  %v5080_v19 = vrot.slane %v10389_v48, 1 }
 0x39e   : > { %v4598_v15 = vpop.f32.mrf.mxu2 }
 0x39f   : > { %v4599_v53 = vadd.f32 %v4598_v15, %v10272_v5  ;;  %v5081_v5 = vsel %vm899_vm2, %v5078_v38, %v5080_v19 }
 0x3a0   : > { %v4809_v11 = vpop.f32.mrf.mxu3 }
 0x3a1   : > { %v5184_v60 = vpop.f32.mrf.mxu0  ;;  %v4890_v8 = vadd.f32 %v4809_v11, %v4599_v53  ;;  %v10747_v20 = vpop.f32.mrf.mxu1 }
 0x3a3   : > { %v10749_v59 = vadd.f32 %v5182_v3, %v4890_v8  ;;  %v4708_v3 = vsel %vm899_vm2, %v4705_v17, %v4707_v29 }
 0x3a6   : > { %v4600_v34 = vpop.f32.mrf.mxu2 }
 0x3a7   : > { %v4601_v7 = vadd.f32 %v4600_v34, %v10313_v37  ;;  %v11641_v37 = vld [vmem:[#allocation22_spill] sm:$0xff] }
 0x3a8   : > { %v4811_v62 = vpop.f32.mrf.mxu3 }
 0x3a9   : > { %v5187_v49 = vpop.f32.mrf.mxu0  ;;  %v4891_v35 = vadd.f32 %v4811_v62, %v4601_v7  ;;  %v10754_v42 = vpop.f32.mrf.mxu1  ;;  %v5082_v7 = vrot.slane %v10463_v18, 1 }
 0x3ab   : > { %7786 = vmatmul.msk.bf16.gmra.mxu2 %vm4372_vm8, %v10249_v21  ;;  %v10761_v15 = vadd.f32 %v5184_v60, %v4891_v35  ;;  %v4709_v35 = vrot.slane %v10387_v22, 1 }
 0x3ac   : > { %7933 = vmatmul.msk.bf16.gmra.mxu1 %vm4372_vm8, %v11641_v37 }
 0x3ad   : > { %7914 = vmatmul.msk.bf16.gmra.mxu0 %vm4372_vm8, %v5081_v5  ;;  %7816 = vmatmul.msk.bf16.gmra.mxu3 %vm4372_vm8, %v4708_v3 }
 0x3ae   : > { %v4603_v48 = vpop.f32.mrf.mxu2 }
 0x3af   : > { %v4604_v53 = vadd.f32 %v4603_v48, %v10341_v14  ;;  %v5083_v14 = vsel %vm899_vm2, %v5080_v19, %v5082_v7 }
 0x3b0   : > { %v4814_v11 = vpop.f32.mrf.mxu3 }
 0x3b1   : > { %v5189_v8 = vpop.f32.mrf.mxu0  ;;  %v4892_v38 = vadd.f32 %v4814_v11, %v4604_v53  ;;  %v10767_v34 = vpop.f32.mrf.mxu1 }
 0x3b3   : > { %v10769_v21 = vadd.f32 %v5187_v49, %v4892_v38  ;;  %v4710_v49 = vsel %vm899_vm2, %v4707_v29, %v4709_v35 }
 0x3b6   : > { %v4605_v17 = vpop.f32.mrf.mxu2 }
 0x3b7   : > { %v4606_v60 = vadd.f32 %v4605_v17, %v10382_v2  ;;  %v11642_v2 = vld [vmem:[#allocation25_spill] sm:$0xff] }
 0x3b8   : > { %v4816_v62 = vpop.f32.mrf.mxu3 }
 0x3b9   : > { %v5192_v5 = vpop.f32.mrf.mxu0  ;;  %v4893_v3 = vadd.f32 %v4816_v62, %v4606_v60  ;;  %v10774_v37 = vpop.f32.mrf.mxu1  ;;  %v5084_v60 = vrot.slane %v10525_v50, 1 }
 0x3bb   : > { %7787 = vmatmul.msk.bf16.gmra.mxu2 %vm4372_vm8, %v10318_v1  ;;  %v10781_v48 = vadd.f32 %v5189_v8, %v4893_v3  ;;  %v4711_v3 = vrot.slane %v10461_v27, 1 }
 0x3bc   : > { %7934 = vmatmul.msk.bf16.gmra.mxu1 %vm4372_vm8, %v11642_v2 }
 0x3bd   : > { %7915 = vmatmul.msk.bf16.gmra.mxu0 %vm4372_vm8, %v5083_v14  ;;  %7817 = vmatmul.msk.bf16.gmra.mxu3 %vm4372_vm8, %v4710_v49 }
 0x3be   : > { %v4608_v18 = vpop.f32.mrf.mxu2 }
 0x3bf   : > { %v4609_v53 = vadd.f32 %v4608_v18, %v10415_v40  ;;  %v5085_v40 = vsel %vm899_vm2, %v5082_v7, %v5084_v60 }
 0x3c0   : > { %v4819_v11 = vpop.f32.mrf.mxu3 }
 0x3c1   : > { %v5194_v38 = vpop.f32.mrf.mxu0  ;;  %v4894_v19 = vadd.f32 %v4819_v11, %v4609_v53  ;;  %v10787_v17 = vpop.f32.mrf.mxu1 }
 0x3c3   : > { %v10789_v1 = vadd.f32 %v5192_v5, %v4894_v19  ;;  %v4712_v5 = vsel %vm899_vm2, %v4709_v35, %v4711_v3 }
 0x3c6   : > { %v4610_v29 = vpop.f32.mrf.mxu2 }
 0x3c7   : > { %v4611_v8 = vadd.f32 %v4610_v29, %v10456_v63  ;;  %v11643_v63 = vld [vmem:[#allocation4_spill] sm:$0xff] }
 0x3c8   : > { %v4821_v62 = vpop.f32.mrf.mxu3 }
 0x3c9   : > { %v5197_v14 = vpop.f32.mrf.mxu0  ;;  %v4895_v49 = vadd.f32 %v4821_v62, %v4611_v8  ;;  %v10794_v2 = vpop.f32.mrf.mxu1  ;;  %v5086_v8 = vrot.slane %v10594_v16, 1 }
 0x3cb   : > { %7788 = vmatmul.msk.bf16.gmra.mxu2 %vm4372_vm8, %v10387_v22  ;;  %v10801_v18 = vadd.f32 %v5194_v38, %v4895_v49  ;;  %v4713_v49 = vrot.slane %v10523_v10, 1 }
 0x3cc   : > { %7935 = vmatmul.msk.bf16.gmra.mxu1 %vm4372_vm8, %v11643_v63 }
 0x3cd   : > { %7916 = vmatmul.msk.bf16.gmra.mxu0 %vm4372_vm8, %v5085_v40  ;;  %7818 = vmatmul.msk.bf16.gmra.mxu3 %vm4372_vm8, %v4712_v5 }
 0x3ce   : > { %v4613_v50 = vpop.f32.mrf.mxu2 }
 0x3cf   : > { %v4614_v53 = vadd.f32 %v4613_v50, %v10484_v12  ;;  %v5087_v12 = vsel %vm899_vm2, %v5084_v60, %v5086_v8 }
 0x3d0   : > { %v4824_v11 = vpop.f32.mrf.mxu3 }
 0x3d1   : > { %v5199_v19 = vpop.f32.mrf.mxu0  ;;  %v4896_v7 = vadd.f32 %v4824_v11, %v4614_v53  ;;  %v10807_v29 = vpop.f32.mrf.mxu1 }
 0x3d3   : > { %v10809_v22 = vadd.f32 %v5197_v14, %v4896_v7  ;;  %v4714_v14 = vsel %vm899_vm2, %v4711_v3, %v4713_v49 }
 0x3d6   : > { %v4615_v35 = vpop.f32.mrf.mxu2 }
 0x3d7   : > { %v4616_v38 = vadd.f32 %v4615_v35, %v10517_v47  ;;  %v11644_v47 = vld [vmem:[#allocation27_spill] sm:$0xff] }
 0x3d8   : > { %v4826_v62 = vpop.f32.mrf.mxu3 }
 0x3d9   : > { %v5202_v40 = vpop.f32.mrf.mxu0  ;;  %v4897_v5 = vadd.f32 %v4826_v62, %v4616_v38  ;;  %v10814_v63 = vpop.f32.mrf.mxu1  ;;  %v5088_v38 = vrot.slane %v10660_v46, 1 }
 0x3db   : > { %7789 = vmatmul.msk.bf16.gmra.mxu2 %vm4372_vm8, %v10461_v27  ;;  %v10821_v50 = vadd.f32 %v5199_v19, %v4897_v5  ;;  %v4715_v5 = vrot.slane %v10592_v41, 1 }
 0x3dc   : > { %7936 = vmatmul.msk.bf16.gmra.mxu1 %vm4372_vm8, %v11644_v47 }
 0x3dd   : > { %7917 = vmatmul.msk.bf16.gmra.mxu0 %vm4372_vm8, %v5087_v12  ;;  %7819 = vmatmul.msk.bf16.gmra.mxu3 %vm4372_vm8, %v4714_v14  ;;  %v4716_v46 = vsel %vm899_vm2, %v4713_v49, %v4715_v5 }
 0x3de   : > { %v4618_v16 = vpop.f32.mrf.mxu2 }
 0x3df   : > { %v4619_v53 = vadd.f32 %v4618_v16, %v10551_v6  ;;  %v8271_v6 = vld [vmem:[%s11415_s3 + $0x50] sm:$0xff]  ;;  %v5089_v16 = vsel %vm899_vm2, %v5086_v8, %v5088_v38 }
 0x3e0   : > { %v4829_v11 = vpop.f32.mrf.mxu3  ;;  %5792 = vmatpush.bf16.msra.mxu2 %v8271_v6  ;;  %v4717_v6 = vrot.slane %v10653_v32, 1  ;;  %v11645_v32 = vld [vmem:[#allocation21_spill] sm:$0xff] }
 0x3e1   : > { %v5204_v7 = vpop.f32.mrf.mxu0  ;;  %v4898_v60 = vadd.f32 %v4829_v11, %v4619_v53  ;;  %v10827_v35 = vpop.f32.mrf.mxu1  ;;  %v4956_v53 = vld [vmem:[#allocation2 + $0x98] sm:$0x1] }
 0x3e3   : > { %v10829_v27 = vadd.f32 %v5202_v40, %v4898_v60  ;;  %v8290_v40 = vld [vmem:[%s11415_s3 + $0x60] sm:$0xff]  ;;  %v5035_v60 = vunpack.c.l.b16 %v4956_v53 }
 0x3e4   : > { %6165 = vmatpush.bf16.msra.mxu3 %v8290_v40  ;;  %v5920_v40 = vld [vmem:[#allocation2 + $0x10] sm:$0xc] }
 0x3e6   : > { %v4620_v3 = vpop.f32.mrf.mxu2 }
 0x3e7   : > { %v4621_v19 = vadd.f32 %v4620_v3, %v10581_v4  ;;  %v8292_v4 = vld [vmem:[%s11415_s3 + $0x70] sm:$0xff] }
 0x3e8   : > { %v4831_v62 = vpop.f32.mrf.mxu3  ;;  %6545 = vmatpush.bf16.msra.mxu0 %v8292_v4 }
 0x3e9   : > { %v4899_v14 = vadd.f32 %v4831_v62, %v4621_v19  ;;  %v10834_v47 = vpop.f32.mrf.mxu1 }
 0x3ea   : > { %v5207_v12 = vpop.f32.mrf.mxu0 }
 0x3eb   : > { %7790 = vmatmul.msk.bf16.gmra.mxu2 %vm4372_vm8, %v10523_v10  ;;  %v10850_v11 = vadd.f32 %v5204_v7, %v4899_v14 }
 0x3ec   : > { %7937 = vmatmul.msk.bf16.gmra.mxu1 %vm4372_vm8, %v9954_v31 }
 0x3ed   : > { %7918 = vmatmul.msk.bf16.gmra.mxu0 %vm4372_vm8, %v5089_v16  ;;  %7820 = vmatmul.msk.bf16.gmra.mxu3 %vm4372_vm8, %v4716_v46  ;;  %v5054_v16 = vpack.c.b16 %v5035_v60, %v5035_v60 }
 0x3ee   : > { %v4623_v8 = vpop.f32.mrf.mxu2 }
 0x3ef   : > { %v4624_v3 = vadd.f32 %v4623_v8, %v10613_v39  ;;  %v5090_v46 = vrot.slane %v5054_v16, 1  ;;  %v5999_v8 = vunpack.c.l.b16 %v5920_v40 }
 0x3f0   : > { %v4834_v10 = vpop.f32.mrf.mxu3 }
 0x3f1   : > { %v4900_v49 = vadd.f32 %v4834_v10, %v4624_v3  ;;  %v10856_v62 = vpop.f32.mrf.mxu1  ;;  %v5091_v39 = vsel %vm899_vm2, %v5088_v38, %v5090_v46  ;;  %v8354_v38 = vld [vmem:[#allocation2 + $0x18] sm:$0xff] }
 0x3f2   : > { %v5209_v19 = vpop.f32.mrf.mxu0  ;;  %v6311_v10 = vshrl.u32 %v8354_v38, 16  ;;  %v6056_v54 = vrot.slane %v8354_v38, 2 }
 0x3f3   : > { %v10858_v7 = vadd.f32 %v5207_v12, %v4900_v49  ;;  %v4718_v12 = vsel %vm899_vm2, %v4715_v5, %v4717_v6  ;;  %v6314_v49 = vshll.u32 %v8354_v38, 16 }
 0x3f4   : > { %v6313_v6 = vrot.slane %v6311_v10, 2  ;;  %v11647_v10 = vld [vmem:[#allocation19_spill] sm:$0xff] }
 0x3f5   : > { %v6316_v40 = vrot.slane %v6314_v49, 3 }
 0x3f6   : > { %v4625_v14 = vpop.f32.mrf.mxu2 }
 0x3f7   : > { %v4626_v13 = vadd.f32 %v4625_v14, %v10657_v45  ;;  %v11646_v45 = vunpack.c.l.b16 %v11645_v32 }
 0x3f8   : > { %v4836_v31 = vpop.f32.mrf.mxu3 }
 0x3f9   : > { %v4901_v4 = vadd.f32 %v4836_v31, %v4626_v13  ;;  %v10862_v23 = vpop.f32.mrf.mxu1  ;;  %v6036_v13 = vpack.c.b16 %v11646_v45, %v5999_v8 }
 0x3fa   : > { %v5212_v53 = vpop.f32.mrf.mxu0 }
 0x3fb   : > { %7791 = vmatmul.msk.bf16.gmra.mxu2 %vm4372_vm8, %v10592_v41  ;;  %v10869_v60 = vadd.f32 %v5209_v19, %v4901_v4  ;;  %v6303_v14 = vshrl.u32 %v6036_v13, 16  ;;  %v6306_v46 = vshll.u32 %v6036_v13, 16 }
 0x3fc   : > { %7938 = vmatmul.msk.bf16.gmra.mxu1 %vm4372_vm8, %v10018_v43 }
 0x3fd   : > { %7919 = vmatmul.msk.bf16.gmra.mxu0 %vm4372_vm8, %v5091_v39  ;;  %7821 = vmatmul.msk.bf16.gmra.mxu3 %vm4372_vm8, %v4718_v12  ;;  %v6305_v43 = vrot.slane %v6303_v14, 2  ;;  %v6308_v39 = vrot.slane %v6306_v46, 3  ;;  %v6317_v12 = vor.u32 %v6316_v40, %v6313_v6  ;;  %v8355_v14 = vld [vmem:[#allocation2 + $0x20] sm:$0xff] }
 0x3fe   : > { %v4628_v3 = vpop.f32.mrf.mxu2  ;;  %v6320_v46 = vshrl.u32 %v8355_v14, 16 }
 0x3ff   : > { %v4629_v41 = vadd.f32 %v4628_v3, %v10682_v55  ;;  %v6309_v3 = vor.u32 %v6308_v39, %v6305_v43 }
 0x400   : > { %v4839_v16 = vpop.f32.mrf.mxu3  ;;  %v6322_v39 = vrot.slane %v6320_v46, 2 }
 0x401   : > { %v4902_v19 = vadd.f32 %v4839_v16, %v4629_v41  ;;  %v10877_v31 = vpop.f32.mrf.mxu1  ;;  %v6055_v41 = vrot.slane %v6036_v13, 2  ;;  %v6318_v16 = vsel %vm2602_vm7, %v6309_v3, %v6317_v12  ;;  %v8294_v13 = vld [vmem:[%s11415_s3 + $0x80] sm:$0xff] }
 0x402   : > { %v5214_v5 = vpop.f32.mrf.mxu0  ;;  %6792 = vmatpush.bf16.msra.mxu1 %v8294_v13 }
 0x403   : > { %v10879_v4 = vadd.f32 %v5212_v53, %v4902_v19  ;;  %v6057_v53 = vsel %vm1949_vm4, %v6055_v41, %v6056_v54  ;;  %v6323_v19 = vshll.u32 %v8355_v14, 16 }
 0x406   : > { %v4630_v8 = vpop.f32.mrf.mxu2 }
 0x407   : > { %v4631_v32 = vadd.f32 %v4630_v8, %v10704_v56  ;;  %v11648_v56 = vld [vmem:[#allocation35_spill] sm:$0xff]  ;;  %v6325_v8 = vrot.slane %v6323_v19, 3 }
 0x408   : > { %v4841_v45 = vpop.f32.mrf.mxu3  ;;  %v8356_v19 = vld [vmem:[#allocation2 + $0x28] sm:$0xff] }
 0x409   : > { %v4903_v61 = vadd.f32 %v4841_v45, %v4631_v32  ;;  %v10882_v0 = vpop.f32.mrf.mxu1  ;;  %v6326_v3 = vor.u32 %v6325_v8, %v6322_v39 }
 0x40a   : > { %v5217_v55 = vpop.f32.mrf.mxu0 }
 0x40b   : > { %7962 = vmatmul.msk.bf16.vlgmr.msra.gmra.mxu2 %vm4372_vm8, %v11647_v10  ;;  %v10889_v49 = vadd.f32 %v5214_v5, %v4903_v61  ;;  %v6058_v10 = vrot.slane %v8355_v14, 2 }
 0x40c   : > { %7939 = vmatmul.msk.bf16.gmra.mxu1 %vm4372_vm8, %v11648_v56 }
 0x40d   : > { %8090 = vmatmul.msk.bf16.vlgmr.msra.gmra.mxu0 %vm4372_vm8, %v6318_v16  ;;  %8060 = vmatmul.msk.bf16.vlgmr.msra.gmra.mxu3 %vm4372_vm8, %v6057_v53 }
 0x40e   : > { %v4633_v38 = vpop.f32.mrf.mxu2 }
 0x40f   : > { %v4634_v6 = vadd.f32 %v4633_v38, %v10720_v36  ;;  %v6327_v38 = vsel %vm2602_vm7, %v6317_v12, %v6326_v3 }
 0x410   : > { %v4844_v40 = vpop.f32.mrf.mxu3 }
 0x411   : > { %v4904_v61 = vadd.f32 %v4844_v40, %v4634_v6  ;;  %v10898_v5 = vpop.f32.mrf.mxu1  ;;  %v11649_v6 = vld [vmem:[#allocation23_spill] sm:$0xff]  ;;  %v6332_v40 = vshll.u32 %v8356_v19, 16 }
 0x412   : > { %v5219_v43 = vpop.f32.mrf.mxu0 }
 0x413   : > { %v10900_v32 = vadd.f32 %v5217_v55, %v4904_v61  ;;  %v6059_v55 = vsel %vm1949_vm4, %v6056_v54, %v6058_v10 }
 0x416   : > { %v4635_v45 = vpop.f32.mrf.mxu2 }
 0x417   : > { %v4636_v41 = vadd.f32 %v4635_v45, %v10747_v20  ;;  %v11650_v20 = vld [vmem:[#allocation38_spill] sm:$0xff] }
 0x418   : > { %v4846_v16 = vpop.f32.mrf.mxu3 }
 0x419   : > { %v4905_v56 = vadd.f32 %v4846_v16, %v4636_v41  ;;  %v5547_v13 = vpop.f32.mrf.mxu1  ;;  %v6334_v41 = vrot.slane %v6332_v40, 3 }
 0x41a   : > { %v5222_v53 = vpop.f32.mrf.mxu0  ;;  %v10904_v36 = vadd.f32 %v5547_v13, %v10596_v57  ;;  %v6329_v57 = vshrl.u32 %v8356_v19, 16 }
 0x41b   : > { %7963 = vmatmul.msk.bf16.gmra.mxu2 %vm4372_vm8, %v11649_v6  ;;  %v10911_v46 = vadd.f32 %v5219_v43, %v4905_v56 }
 0x41c   : > { %7940 = vmatmul.msk.bf16.gmra.mxu1 %vm4372_vm8, %v11650_v20  ;;  %v6331_v43 = vrot.slane %v6329_v57, 2  ;;  %v11653_v57 = vld [vmem:[#allocation40_spill] sm:$0xff] }
 0x41d   : > { %8091 = vmatmul.msk.bf16.gmra.mxu0 %vm4372_vm8, %v6327_v38  ;;  %8061 = vmatmul.msk.bf16.gmra.mxu3 %vm4372_vm8, %v6059_v55  ;;  %v6060_v55 = vrot.slane %v8356_v19, 2  ;;  %v8357_v19 = vld [vmem:[#allocation2 + $0x30] sm:$0xff] }
 0x41e   : > { %v4638_v14 = vpop.f32.mrf.mxu2  ;;  %v6335_v13 = vor.u32 %v6334_v41, %v6331_v43  ;;  %v6338_v40 = vshrl.u32 %v8357_v19, 16 }
 0x41f   : > { %v4639_v12 = vadd.f32 %v4638_v14, %v10754_v42 }
 0x420   : > { %v4849_v61 = vpop.f32.mrf.mxu3 }
 0x421   : > { %v4906_v8 = vadd.f32 %v4849_v61, %v4639_v12  ;;  %v5549_v45 = vpop.f32.mrf.mxu1  ;;  %v6336_v12 = vsel %vm2602_vm7, %v6326_v3, %v6335_v13  ;;  %v6341_v61 = vshll.u32 %v8357_v19, 16 }
 0x422   : > { %v5224_v39 = vpop.f32.mrf.mxu0  ;;  %v10918_v54 = vadd.f32 %v5549_v45, %v10633_v28  ;;  %v11652_v28 = vld [vmem:[#allocation26_spill] sm:$0xff] }
 0x423   : > { %v10920_v16 = vadd.f32 %v5222_v53, %v4906_v8  ;;  %v6061_v53 = vsel %vm1949_vm4, %v6058_v10, %v6060_v55  ;;  %v6340_v10 = vrot.slane %v6338_v40, 2 }
 0x425   : > { %11651 = vst [vmem:[#allocation22_spill] sm:$0xff] %v10920_v16 }
 0x426   : > { %v4640_v56 = vpop.f32.mrf.mxu2 }
 0x427   : > { %v4641_v38 = vadd.f32 %v4640_v56, %v10767_v34  ;;  %v6343_v56 = vrot.slane %v6341_v61, 3 }
 0x428   : > { %v4851_v6 = vpop.f32.mrf.mxu3 }
 0x429   : > { %v4907_v44 = vadd.f32 %v4851_v6, %v4641_v38  ;;  %v5552_v42 = vpop.f32.mrf.mxu1  ;;  %v6344_v6 = vor.u32 %v6343_v56, %v6340_v10 }
 0x42a   : > { %v5227_v20 = vpop.f32.mrf.mxu0  ;;  %v10924_v14 = vadd.f32 %v5552_v42, %v10662_v24 }
 0x42b   : > { %7964 = vmatmul.msk.bf16.gmra.mxu2 %vm4372_vm8, %v11652_v28  ;;  %v6062_v28 = vrot.slane %v8357_v19, 2 }
 0x42c   : > { %7941 = vmatmul.msk.bf16.gmra.mxu1 %vm4372_vm8, %v11653_v57  ;;  %v10939_v57 = vadd.f32 %v5224_v39, %v4907_v44  ;;  %v8358_v39 = vld [vmem:[#allocation2 + $0x38] sm:$0xff] }
 0x42d   : > { %8092 = vmatmul.msk.bf16.gmra.mxu0 %vm4372_vm8, %v6336_v12  ;;  %8062 = vmatmul.msk.bf16.gmra.mxu3 %vm4372_vm8, %v6061_v53  ;;  %v6063_v40 = vsel %vm1949_vm4, %v6060_v55, %v6062_v28  ;;  %v6347_v19 = vshrl.u32 %v8358_v39, 16  ;;  %v6350_v61 = vshll.u32 %v8358_v39, 16 }
 0x42e   : > { %v4643_v34 = vpop.f32.mrf.mxu2  ;;  %11654 = vst [vmem:[#allocation25_spill] sm:$0xff] %v10939_v57 }
 0x42f   : > { %v4644_v24 = vadd.f32 %v4643_v34, %v10774_v37 }
 0x430   : > { %v4854_v8 = vpop.f32.mrf.mxu3 }
 0x431   : > { %v4908_v45 = vadd.f32 %v4854_v8, %v4644_v24  ;;  %v5554_v43 = vpop.f32.mrf.mxu1  ;;  %v6345_v24 = vsel %vm2602_vm7, %v6335_v13, %v6344_v6 }
 0x432   : > { %v5229_v3 = vpop.f32.mrf.mxu0  ;;  %v10936_v41 = vadd.f32 %v5554_v43, %v10695_v26  ;;  %v11655_v26 = vld [vmem:[#allocation3_spill] sm:$0xff] }
 0x433   : > { %v10953_v43 = vadd.f32 %v5227_v20, %v4908_v45 }
 0x436   : > { %v4645_v38 = vpop.f32.mrf.mxu2 }
 0x437   : > { %v4646_v42 = vadd.f32 %v4645_v38, %v10787_v17  ;;  %v11656_v17 = vld [vmem:[#allocation42_spill] sm:$0xff]  ;;  %v6349_v38 = vrot.slane %v6347_v19, 2 }
 0x438   : > { %v4856_v12 = vpop.f32.mrf.mxu3 }
 0x439   : > { %v4909_v16 = vadd.f32 %v4856_v12, %v4646_v42  ;;  %v5557_v37 = vpop.f32.mrf.mxu1  ;;  %v6352_v42 = vrot.slane %v6350_v61, 3 }
 0x43a   : > { %v5232_v53 = vpop.f32.mrf.mxu0  ;;  %v10942_v34 = vadd.f32 %v5557_v37, %v10706_v25 }
 0x43b   : > { %7965 = vmatmul.msk.bf16.gmra.mxu2 %vm4372_vm8, %v11655_v26  ;;  %v6353_v37 = vor.u32 %v6352_v42, %v6349_v38  ;;  %v10959_v57 = vadd.f32 %v5229_v3, %v4909_v16  ;;  %v8359_v3 = vld [vmem:[#allocation2 + $0x40] sm:$0xff] }
 0x43c   : > { %7942 = vmatmul.msk.bf16.gmra.mxu1 %vm4372_vm8, %v11656_v17  ;;  %v6359_v61 = vshll.u32 %v8359_v3, 16 }
 0x43d   : > { %8093 = vmatmul.msk.bf16.gmra.mxu0 %vm4372_vm8, %v6345_v24  ;;  %8063 = vmatmul.msk.bf16.gmra.mxu3 %vm4372_vm8, %v6063_v40  ;;  %v6064_v40 = vrot.slane %v8358_v39, 2  ;;  %v6354_v45 = vsel %vm2602_vm7, %v6344_v6, %v6353_v37  ;;  %v6356_v39 = vshrl.u32 %v8359_v3, 16 }
 0x43e   : > { %v4648_v44 = vpop.f32.mrf.mxu2 }
 0x43f   : > { %v4649_v25 = vadd.f32 %v4648_v44, %v10794_v2  ;;  %v6065_v19 = vsel %vm1949_vm4, %v6062_v28, %v6064_v40  ;;  %v6358_v42 = vrot.slane %v6356_v39, 2 }
 0x440   : > { %v4859_v8 = vpop.f32.mrf.mxu3 }
 0x441   : > { %v4910_v10 = vadd.f32 %v4859_v8, %v4649_v25  ;;  %v5559_v56 = vpop.f32.mrf.mxu1 }
 0x442   : > { %v5234_v13 = vpop.f32.mrf.mxu0  ;;  %v10956_v55 = vadd.f32 %v5559_v56, %v10730_v9  ;;  %v11657_v9 = vld [vmem:[#allocation28_spill] sm:$0xff] }
 0x443   : > { %v10973_v8 = vadd.f32 %v5232_v53, %v4910_v10 }
 0x446   : > { %v4650_v12 = vpop.f32.mrf.mxu2 }
 0x447   : > { %v4651_v24 = vadd.f32 %v4650_v12, %v10807_v29  ;;  %v11658_v29 = vld [vmem:[#allocation8_spill] sm:$0xff]  ;;  %v6361_v12 = vrot.slane %v6359_v61, 3 }
 0x448   : > { %v4861_v26 = vpop.f32.mrf.mxu3 }
 0x449   : > { %v4911_v2 = vadd.f32 %v4861_v26, %v4651_v24  ;;  %v5562_v44 = vpop.f32.mrf.mxu1  ;;  %v6362_v26 = vor.u32 %v6361_v12, %v6358_v42 }
 0x44a   : > { %v5237_v17 = vpop.f32.mrf.mxu0  ;;  %v10962_v20 = vadd.f32 %v5562_v44, %v10749_v59 }
 0x44b   : > { %7966 = vmatmul.msk.bf16.gmra.mxu2 %vm4372_vm8, %v11657_v9  ;;  %v6066_v9 = vrot.slane %v8359_v3, 2  ;;  %v6363_v10 = vsel %vm2602_vm7, %v6353_v37, %v6362_v26 }
 0x44c   : > { %7943 = vmatmul.msk.bf16.gmra.mxu1 %vm4372_vm8, %v11658_v29  ;;  %v10979_v29 = vadd.f32 %v5234_v13, %v4911_v2  ;;  %v8360_v2 = vld [vmem:[#allocation2 + $0x48] sm:$0xff] }
 0x44d   : > { %8094 = vmatmul.msk.bf16.gmra.mxu0 %vm4372_vm8, %v6354_v45  ;;  %8064 = vmatmul.msk.bf16.gmra.mxu3 %vm4372_vm8, %v6065_v19  ;;  %v6067_v39 = vsel %vm1949_vm4, %v6064_v40, %v6066_v9  ;;  %v6365_v3 = vshrl.u32 %v8360_v2, 16  ;;  %v6368_v61 = vshll.u32 %v8360_v2, 16 }
 0x44e   : > { %v4653_v16 = vpop.f32.mrf.mxu2 }
 0x44f   : > { %v4654_v59 = vadd.f32 %v4653_v16, %v10814_v63  ;;  %v6367_v12 = vrot.slane %v6365_v3, 2 }
 0x450   : > { %v4864_v25 = vpop.f32.mrf.mxu3 }
 0x451   : > { %v4912_v56 = vadd.f32 %v4864_v25, %v4654_v59  ;;  %v5564_v38 = vpop.f32.mrf.mxu1 }
 0x452   : > { %v5239_v6 = vpop.f32.mrf.mxu0  ;;  %v10976_v28 = vadd.f32 %v5564_v38, %v10761_v15  ;;  %v11659_v15 = vld [vmem:[#allocation31_spill] sm:$0xff] }
 0x453   : > { %v10993_v25 = vadd.f32 %v5237_v17, %v4912_v56 }
 0x456   : > { %v4655_v24 = vpop.f32.mrf.mxu2 }
 0x457   : > { %v4656_v44 = vadd.f32 %v4655_v24, %v10827_v35  ;;  %v11660_v35 = vld [vmem:[#allocation10_spill] sm:$0xff]  ;;  %v6370_v24 = vrot.slane %v6368_v61, 3 }
 0x458   : > { %v4866_v45 = vpop.f32.mrf.mxu3 }
 0x459   : > { %v4913_v63 = vadd.f32 %v4866_v45, %v4656_v44  ;;  %v5567_v16 = vpop.f32.mrf.mxu1  ;;  %v6371_v45 = vor.u32 %v6370_v24, %v6367_v12 }
 0x45a   : > { %v5242_v19 = vpop.f32.mrf.mxu0  ;;  %v10982_v53 = vadd.f32 %v5567_v16, %v10769_v21 }
 0x45b   : > { %7967 = vmatmul.msk.bf16.gmra.mxu2 %vm4372_vm8, %v11659_v15  ;;  %v6068_v15 = vrot.slane %v8360_v2, 2  ;;  %v6372_v56 = vsel %vm2602_vm7, %v6362_v26, %v6371_v45 }
 0x45c   : > { %7944 = vmatmul.msk.bf16.gmra.mxu1 %vm4372_vm8, %v11660_v35  ;;  %v10999_v35 = vadd.f32 %v5239_v6, %v4913_v63  ;;  %v8361_v63 = vld [vmem:[#allocation2 + $0x50] sm:$0xff] }
 0x45d   : > { %8095 = vmatmul.msk.bf16.gmra.mxu0 %vm4372_vm8, %v6363_v10  ;;  %8065 = vmatmul.msk.bf16.gmra.mxu3 %vm4372_vm8, %v6067_v39  ;;  %v6069_v3 = vsel %vm1949_vm4, %v6066_v9, %v6068_v15  ;;  %v6374_v2 = vshrl.u32 %v8361_v63, 16  ;;  %v6377_v61 = vshll.u32 %v8361_v63, 16 }
 0x45e   : > { %v4658_v13 = vpop.f32.mrf.mxu2 }
 0x45f   : > { %v4659_v21 = vadd.f32 %v4658_v13, %v10834_v47  ;;  %v6376_v24 = vrot.slane %v6374_v2, 2 }
 0x460   : > { %v4869_v59 = vpop.f32.mrf.mxu3 }
 0x461   : > { %v4914_v38 = vadd.f32 %v4869_v59, %v4659_v21  ;;  %v5569_v42 = vpop.f32.mrf.mxu1 }
 0x462   : > { %v5244_v37 = vpop.f32.mrf.mxu0  ;;  %v10996_v40 = vadd.f32 %v5569_v42, %v10781_v48  ;;  %v11661_v48 = vld [vmem:[#allocation33_spill] sm:$0xff] }
 0x463   : > { %v11013_v59 = vadd.f32 %v5242_v19, %v4914_v38 }
 0x466   : > { %v4660_v44 = vpop.f32.mrf.mxu2 }
 0x467   : > { %v4661_v16 = vadd.f32 %v4660_v44, %v10856_v62  ;;  %v11662_v62 = vld [vmem:[#allocation14_spill] sm:$0xff]  ;;  %v6379_v44 = vrot.slane %v6377_v61, 3 }
 0x468   : > { %v4871_v10 = vpop.f32.mrf.mxu3 }
 0x469   : > { %v4915_v47 = vadd.f32 %v4871_v10, %v4661_v16  ;;  %v5572_v13 = vpop.f32.mrf.mxu1  ;;  %v6380_v10 = vor.u32 %v6379_v44, %v6376_v24 }
 0x46a   : > { %v5247_v39 = vpop.f32.mrf.mxu0  ;;  %v11002_v17 = vadd.f32 %v5572_v13, %v10789_v1 }
 0x46b   : > { %7968 = vmatmul.msk.bf16.gmra.mxu2 %vm4372_vm8, %v11661_v48  ;;  %v6070_v48 = vrot.slane %v8361_v63, 2  ;;  %v6381_v38 = vsel %vm2602_vm7, %v6371_v45, %v6380_v10 }
 0x46c   : > { %7945 = vmatmul.msk.bf16.gmra.mxu1 %vm4372_vm8, %v11662_v62  ;;  %v11019_v62 = vadd.f32 %v5244_v37, %v4915_v47  ;;  %v8362_v37 = vld [vmem:[#allocation2 + $0x58] sm:$0xff] }
 0x46d   : > { %8096 = vmatmul.msk.bf16.gmra.mxu0 %vm4372_vm8, %v6372_v56  ;;  %8066 = vmatmul.msk.bf16.gmra.mxu3 %vm4372_vm8, %v6069_v3  ;;  %v6071_v2 = vsel %vm1949_vm4, %v6068_v15, %v6070_v48  ;;  %v6383_v47 = vshrl.u32 %v8362_v37, 16  ;;  %v6386_v63 = vshll.u32 %v8362_v37, 16 }
 0x46e   : > { %v4663_v6 = vpop.f32.mrf.mxu2 }
 0x46f   : > { %v4664_v1 = vadd.f32 %v4663_v6, %v10862_v23  ;;  %v6385_v24 = vrot.slane %v6383_v47, 2  ;;  %v6388_v44 = vrot.slane %v6386_v63, 3 }
 0x470   : > { %v4874_v21 = vpop.f32.mrf.mxu3 }
 0x471   : > { %v4916_v42 = vadd.f32 %v4874_v21, %v4664_v1  ;;  %v5574_v12 = vpop.f32.mrf.mxu1 }
 0x472   : > { %v5249_v26 = vpop.f32.mrf.mxu0  ;;  %v11016_v9 = vadd.f32 %v5574_v12, %v10801_v18  ;;  %v11663_v18 = vld [vmem:[#allocation36_spill] sm:$0xff] }
 0x473   : > { %v11033_v1 = vadd.f32 %v5247_v39, %v4916_v42 }
 0x476   : > { %v4665_v16 = vpop.f32.mrf.mxu2 }
 0x477   : > { %v4666_v13 = vadd.f32 %v4665_v16, %v10877_v31  ;;  %v6389_v16 = vor.u32 %v6388_v44, %v6385_v24 }
 0x478   : > { %v4876_v56 = vpop.f32.mrf.mxu3 }
 0x479   : > { %v4917_v23 = vadd.f32 %v4876_v56, %v4666_v13  ;;  %v5577_v6 = vpop.f32.mrf.mxu1  ;;  %v6390_v42 = vsel %vm2602_vm7, %v6380_v10, %v6389_v16 }
 0x47a   : > { %v5252_v3 = vpop.f32.mrf.mxu0  ;;  %v11022_v19 = vadd.f32 %v5577_v6, %v10809_v22  ;;  %v6072_v6 = vrot.slane %v8362_v37, 2 }
 0x47b   : > { %7969 = vmatmul.msk.bf16.gmra.mxu2 %vm4372_vm8, %v11663_v18 }
 0x47c   : > { %7946 = vmatmul.msk.bf16.gmra.mxu1 %vm4372_vm8, %v10579_v33 }
 0x47d   : > { %8097 = vmatmul.msk.bf16.gmra.mxu0 %vm4372_vm8, %v6381_v38  ;;  %8067 = vmatmul.msk.bf16.gmra.mxu3 %vm4372_vm8, %v6071_v2  ;;  %v11039_v38 = vadd.f32 %v5249_v26, %v4917_v23  ;;  %v8363_v26 = vld [vmem:[#allocation2 + $0x60] sm:$0xff] }
 0x47e   : > { %v4668_v31 = vpop.f32.mrf.mxu2  ;;  %v6392_v23 = vshrl.u32 %v8363_v26, 16  ;;  %v6395_v37 = vshll.u32 %v8363_v26, 16 }
 0x47f   : > { %v4669_v22 = vadd.f32 %v4668_v31, %v10882_v0  ;;  %v6073_v31 = vsel %vm1949_vm4, %v6070_v48, %v6072_v6 }
 0x480   : > { %v4879_v61 = vpop.f32.mrf.mxu3 }
 0x481   : > { %v4918_v21 = vadd.f32 %v4879_v61, %v4669_v22  ;;  %v5579_v12 = vpop.f32.mrf.mxu1  ;;  %v6394_v61 = vrot.slane %v6392_v23, 2  ;;  %v5467_v23 = vshll.u32 %v10708_v30, 16 }
 0x482   : > { %v5254_v45 = vpop.f32.mrf.mxu0  ;;  %v11036_v15 = vadd.f32 %v5579_v12, %v10821_v50  ;;  %v11664_v50 = vld [vmem:[#allocation39_spill] sm:$0xff]  ;;  %v6397_v12 = vrot.slane %v6395_v37, 3 }
 0x483   : > { %v11053_v10 = vadd.f32 %v5252_v3, %v4918_v21 }
 0x484   : > { %v6398_v44 = vor.u32 %v6397_v12, %v6394_v61  ;;  %v5469_v12 = vrot.slane %v5467_v23, 2 }
 0x486   : > { %v4670_v33 = vpop.f32.mrf.mxu2  ;;  %v6399_v21 = vsel %vm2602_vm7, %v6389_v16, %v6398_v44 }
 0x487   : > { %v4671_v13 = vadd.f32 %v4670_v33, %v10898_v5 }
 0x488   : > { %v4881_v56 = vpop.f32.mrf.mxu3 }
 0x489   : > { %v4919_v0 = vadd.f32 %v4881_v56, %v4671_v13  ;;  %v5582_v18 = vpop.f32.mrf.mxu1  ;;  %v6074_v56 = vrot.slane %v8363_v26, 2  ;;  %v5464_v26 = vshrl.u32 %v10708_v30, 16 }
 0x48a   : > { %v6547_v2 = vpop.f32.mrf.mxu0  ;;  %v11042_v39 = vadd.f32 %v5582_v18, %v10829_v27 }
 0x48b   : > { %7970 = vmatmul.msk.bf16.gmra.mxu2 %vm4372_vm8, %v11664_v50  ;;  %v11059_v18 = vadd.f32 %v5254_v45, %v4919_v0  ;;  %v6075_v50 = vsel %vm1949_vm4, %v6072_v6, %v6074_v56  ;;  %v8364_v0 = vld [vmem:[#allocation2 + $0x68] sm:$0xff]  ;;  %v5466_v61 = vrot.slane %v5464_v26, 1 }
 0x48c   : > { %7947 = vmatmul.msk.bf16.gmra.mxu1 %vm4372_vm8, %v10643_v58 }
 0x48d   : > { %8098 = vmatmul.msk.bf16.gmra.mxu0 %vm4372_vm8, %v6390_v42  ;;  %8068 = vmatmul.msk.bf16.gmra.mxu3 %vm4372_vm8, %v6073_v31  ;;  %v6401_v31 = vshrl.u32 %v8364_v0, 16 }
 0x48e   : > { %v5794_v5 = vpop.f32.mrf.mxu2 }
 0x48f   : > { %v5884_v27 = vadd.f32 %v5794_v5, %v10904_v36 }
 0x490   : > { %v6167_v47 = vpop.f32.mrf.mxu3 }
 0x491   : > { %v6257_v63 = vadd.f32 %v6167_v47, %v5884_v27  ;;  %v5584_v22 = vpop.f32.mrf.mxu1  ;;  %v6403_v47 = vrot.slane %v6401_v31, 2  ;;  %v11666_v31 = vld [vmem:[#allocation43_spill] sm:$0xff] }
 0x492   : > { %v11056_v48 = vadd.f32 %v5584_v22, %v10850_v11  ;;  %v6549_v24 = vpop.f32.mrf.mxu0  ;;  %v11665_v11 = vld [vmem:[#allocation41_spill] sm:$0xff] }
 0x493   : > { %v11075_v6 = vadd.f32 %v6547_v2, %v6257_v63 }
 0x496   : > { %v5796_v58 = vpop.f32.mrf.mxu2 }
 0x497   : > { %v5885_v33 = vadd.f32 %v5796_v58, %v10918_v54 }
 0x498   : > { %v6169_v13 = vpop.f32.mrf.mxu3 }
 0x499   : > { %v6258_v36 = vadd.f32 %v6169_v13, %v5885_v33  ;;  %v5587_v42 = vpop.f32.mrf.mxu1 }
 0x49a   : > { %v11062_v3 = vadd.f32 %v5587_v42, %v10858_v7  ;;  %v6552_v54 = vpop.f32.mrf.mxu0  ;;  %v6404_v7 = vshll.u32 %v8364_v0, 16 }
 0x49b   : > { %7971 = vmatmul.msk.bf16.gmra.mxu2 %vm4372_vm8, %v11665_v11  ;;  %v6076_v11 = vrot.slane %v8364_v0, 2  ;;  %v11081_v30 = vadd.f32 %v6549_v24, %v6258_v36  ;;  %v8365_v36 = vld [vmem:[#allocation2 + $0x70] sm:$0xff] }
 0x49c   : > { %7948 = vmatmul.msk.bf16.gmra.mxu1 %vm4372_vm8, %v10699_v52  ;;  %v6406_v22 = vrot.slane %v6404_v7, 3  ;;  %v6413_v0 = vshll.u32 %v8365_v36, 16 }
 0x49d   : > { %8099 = vmatmul.msk.bf16.gmra.mxu0 %vm4372_vm8, %v6399_v21  ;;  %8069 = vmatmul.msk.bf16.gmra.mxu3 %vm4372_vm8, %v6075_v50  ;;  %v5470_v21 = vor.u32 %v5469_v12, %v5466_v61 }
 0x49e   : > { %v5799_v45 = vpop.f32.mrf.mxu2  ;;  %v6407_v33 = vor.u32 %v6406_v22, %v6403_v47 }
 0x49f   : > { %v5886_v5 = vadd.f32 %v5799_v45, %v10924_v14  ;;  %v5471_v45 = vsel %vm1552_vm3, %v10684_v51, %v5470_v21 }
 0x4a0   : > { %v6172_v16 = vpop.f32.mrf.mxu3 }
 0x4a1   : > { %v6259_v37 = vadd.f32 %v6172_v16, %v5886_v5  ;;  %v5589_v27 = vpop.f32.mrf.mxu1 }
 0x4a2   : > { %v11078_v52 = vadd.f32 %v5589_v27, %v10869_v60  ;;  %v6554_v13 = vpop.f32.mrf.mxu0  ;;  %v6408_v60 = vsel %vm2602_vm7, %v6398_v44, %v6407_v33  ;;  %v6415_v27 = vrot.slane %v6413_v0, 3 }
 0x4a3   : > { %v11096_v5 = vadd.f32 %v6552_v54, %v6259_v37 }
 0x4a6   : > { %v5801_v58 = vpop.f32.mrf.mxu2 }
 0x4a7   : > { %v5887_v14 = vadd.f32 %v5801_v58, %v10936_v41  ;;  %v6077_v41 = vsel %vm1949_vm4, %v6074_v56, %v6076_v11  ;;  %v6078_v58 = vrot.slane %v8365_v36, 2 }
 0x4a8   : > { %v6174_v42 = vpop.f32.mrf.mxu3 }
 0x4a9   : > { %v6260_v2 = vadd.f32 %v6174_v42, %v5887_v14  ;;  %v5592_v63 = vpop.f32.mrf.mxu1 }
 0x4aa   : > { %v11084_v50 = vadd.f32 %v5592_v63, %v10879_v4  ;;  %v6410_v4 = vshrl.u32 %v8365_v36, 16  ;;  %v6557_v51 = vpop.f32.mrf.mxu0  ;;  %v6079_v63 = vsel %vm1949_vm4, %v6076_v11, %v6078_v58 }
 0x4ab   : > { %7972 = vmatmul.msk.bf16.gmra.mxu2 %vm4372_vm8, %v11666_v31  ;;  %v11102_v14 = vadd.f32 %v6554_v13, %v6260_v2  ;;  %v8366_v2 = vld [vmem:[#allocation2 + $0x78] sm:$0xff] }
 0x4ac   : > { %7949 = vmatmul.msk.bf16.gmra.mxu1 %vm4372_vm8, %v5471_v45  ;;  %v6412_v23 = vrot.slane %v6410_v4, 2 }
 0x4ad   : > { %8100 = vmatmul.msk.bf16.gmra.mxu0 %vm4372_vm8, %v6408_v60  ;;  %8070 = vmatmul.msk.bf16.gmra.mxu3 %vm4372_vm8, %v6077_v41  ;;  %v6419_v60 = vshrl.u32 %v8366_v2, 16 }
 0x4ae   : > { %v5804_v24 = vpop.f32.mrf.mxu2  ;;  %v6416_v22 = vor.u32 %v6415_v27, %v6412_v23  ;;  %v6080_v27 = vrot.slane %v8366_v2, 2 }
 0x4af   : > { %v5888_v44 = vadd.f32 %v5804_v24, %v10942_v34  ;;  %v6421_v36 = vrot.slane %v6419_v60, 2 }
 0x4b0   : > { %v6177_v7 = vpop.f32.mrf.mxu3  ;;  %v6417_v37 = vsel %vm2602_vm7, %v6407_v33, %v6416_v22 }
 0x4b1   : > { %v6261_v16 = vadd.f32 %v6177_v7, %v5888_v44  ;;  %v5594_v26 = vpop.f32.mrf.mxu1 }
 0x4b2   : > { %v11099_v56 = vadd.f32 %v5594_v26, %v10889_v49  ;;  %v6559_v21 = vpop.f32.mrf.mxu0  ;;  %v11667_v49 = vld [vmem:[#allocation11_spill] sm:$0xff] }
 0x4b3   : > { %v11116_v31 = vadd.f32 %v6557_v51, %v6261_v16  ;;  %v11669_v51 = vld [vmem:[#allocation22_spill] sm:$0xff] }
 0x4b6   : > { %v5806_v47 = vpop.f32.mrf.mxu2 }
 0x4b7   : > { %v5889_v61 = vadd.f32 %v5806_v47, %v10956_v55  ;;  %v11668_v55 = vld [vmem:[#allocation24_spill] sm:$0xff] }
 0x4b8   : > { %v6179_v12 = vpop.f32.mrf.mxu3 }
 0x4b9   : > { %v6262_v34 = vadd.f32 %v6179_v12, %v5889_v61  ;;  %v5597_v42 = vpop.f32.mrf.mxu1 }
 0x4ba   : > { %v11105_v54 = vadd.f32 %v5597_v42, %v10900_v32  ;;  %v6422_v32 = vshll.u32 %v8366_v2, 16  ;;  %v6562_v0 = vpop.f32.mrf.mxu0  ;;  %v6081_v42 = vsel %vm1949_vm4, %v6078_v58, %v6080_v27  ;;  %v11672_v58 = vld [vmem:[#allocation25_spill] sm:$0xff] }
 0x4bb   : > { %7973 = vmatmul.msk.bf16.gmra.mxu2 %vm4372_vm8, %v11667_v49  ;;  %v11122_v47 = vadd.f32 %v6559_v21, %v6262_v34 }
 0x4bc   : > { %8120 = vmatmul.msk.bf16.vlgmr.msra.gmra.mxu1 %vm4372_vm8, %v11668_v55  ;;  %v6424_v4 = vrot.slane %v6422_v32, 3 }
 0x4bd   : > { %8101 = vmatmul.msk.bf16.gmra.mxu0 %vm4372_vm8, %v6417_v37  ;;  %8071 = vmatmul.msk.bf16.gmra.mxu3 %vm4372_vm8, %v6079_v63  ;;  %v8367_v37 = vld [vmem:[#allocation2 + $0x80] sm:$0xff] }
 0x4be   : > { %v5809_v13 = vpop.f32.mrf.mxu2  ;;  %v6425_v7 = vor.u32 %v6424_v4, %v6421_v36  ;;  %v6428_v21 = vshrl.u32 %v8367_v37, 16  ;;  %v6431_v49 = vshll.u32 %v8367_v37, 16 }
 0x4bf   : > { %v5890_v45 = vadd.f32 %v5809_v13, %v10962_v20 }
 0x4c0   : > { %v6182_v33 = vpop.f32.mrf.mxu3  ;;  %v6426_v12 = vsel %vm2602_vm7, %v6416_v22, %v6425_v7 }
 0x4c1   : > { %v6263_v41 = vadd.f32 %v6182_v33, %v5890_v45  ;;  %v5599_v24 = vpop.f32.mrf.mxu1  ;;  %v6430_v45 = vrot.slane %v6428_v21, 2  ;;  %v6433_v33 = vrot.slane %v6431_v49, 3 }
 0x4c2   : > { %v11119_v11 = vadd.f32 %v5599_v24, %v10911_v46  ;;  %v11670_v46 = vld [vmem:[#allocation13_spill] sm:$0xff]  ;;  %v6564_v63 = vpop.f32.mrf.mxu0 }
 0x4c3   : > { %v11136_v13 = vadd.f32 %v6562_v0, %v6263_v41  ;;  %v6434_v36 = vor.u32 %v6433_v33, %v6430_v45 }
 0x4c5   : > { %v6435_v0 = vsel %vm2602_vm7, %v6425_v7, %v6434_v36 }
 0x4c6   : > { %v5811_v44 = vpop.f32.mrf.mxu2 }
 0x4c7   : > { %v5891_v26 = vadd.f32 %v5811_v44, %v10976_v28  ;;  %v11671_v28 = vld [vmem:[#allocation5_spill] sm:$0xff] }
 0x4c8   : > { %v6184_v23 = vpop.f32.mrf.mxu3 }
 0x4c9   : > { %v6264_v20 = vadd.f32 %v6184_v23, %v5891_v26  ;;  %v5602_v61 = vpop.f32.mrf.mxu1  ;;  %v6082_v26 = vrot.slane %v8367_v37, 2 }
 0x4ca   : > { %v11125_v16 = vadd.f32 %v5602_v61, %v11669_v51  ;;  %v6567_v61 = vpop.f32.mrf.mxu0 }
 0x4cb   : > { %7974 = vmatmul.msk.bf16.gmra.mxu2 %vm4372_vm8, %v11670_v46  ;;  %v11142_v23 = vadd.f32 %v6564_v63, %v6264_v20  ;;  %v6083_v46 = vsel %vm1949_vm4, %v6080_v27, %v6082_v26 }
 0x4cc   : > { %8121 = vmatmul.msk.bf16.gmra.mxu1 %vm4372_vm8, %v11671_v28 }
 0x4cd   : > { %8102 = vmatmul.msk.bf16.gmra.mxu0 %vm4372_vm8, %v6426_v12  ;;  %8072 = vmatmul.msk.bf16.gmra.mxu3 %vm4372_vm8, %v6081_v42  ;;  %v11673_v12 = vld [vmem:[#allocation17_spill] sm:$0xff]  ;;  %v8368_v42 = vld [vmem:[#allocation2 + $0x88] sm:$0xff] }
 0x4ce   : > { %v5814_v34 = vpop.f32.mrf.mxu2  ;;  %v6437_v28 = vshrl.u32 %v8368_v42, 16  ;;  %v6084_v33 = vrot.slane %v8368_v42, 2 }
 0x4cf   : > { %v5892_v55 = vadd.f32 %v5814_v34, %v10982_v53  ;;  %v6440_v34 = vshll.u32 %v8368_v42, 16 }
 0x4d0   : > { %v6187_v22 = vpop.f32.mrf.mxu3  ;;  %v6439_v63 = vrot.slane %v6437_v28, 2 }
 0x4d1   : > { %v6265_v2 = vadd.f32 %v6187_v22, %v5892_v55  ;;  %v5604_v60 = vpop.f32.mrf.mxu1  ;;  %v6442_v55 = vrot.slane %v6440_v34, 3 }
 0x4d2   : > { %v11139_v32 = vadd.f32 %v5604_v60, %v11672_v58  ;;  %v6569_v22 = vpop.f32.mrf.mxu0 }
 0x4d3   : > { %v11156_v7 = vadd.f32 %v6567_v61, %v6265_v2  ;;  %v6443_v58 = vor.u32 %v6442_v55, %v6439_v63  ;;  %v11677_v55 = vld [vmem:[#allocation45_spill] sm:$0xff] }
 0x4d5   : > { %v6444_v61 = vsel %vm2602_vm7, %v6434_v36, %v6443_v58 }
 0x4d6   : > { %v5816_v24 = vpop.f32.mrf.mxu2 }
 0x4d7   : > { %v5893_v4 = vadd.f32 %v5816_v24, %v10996_v40  ;;  %v11674_v40 = vld [vmem:[#allocation29_spill] sm:$0xff] }
 0x4d8   : > { %v6189_v44 = vpop.f32.mrf.mxu3 }
 0x4d9   : > { %v6266_v53 = vadd.f32 %v6189_v44, %v5893_v4  ;;  %v5607_v51 = vpop.f32.mrf.mxu1 }
 0x4da   : > { %v11145_v41 = vadd.f32 %v5607_v51, %v10953_v43  ;;  %v6085_v51 = vsel %vm1949_vm4, %v6082_v26, %v6084_v33 }
 0x4db   : > { %7975 = vmatmul.msk.bf16.gmra.mxu2 %vm4372_vm8, %v11673_v12  ;;  %v11162_v4 = vadd.f32 %v6569_v22, %v6266_v53  ;;  %v6572_v53 = vpop.f32.mrf.mxu0  ;;  %v8370_v22 = vld [vmem:[#allocation2 + $0x98] sm:$0xff] }
 0x4dc   : > { %8122 = vmatmul.msk.bf16.gmra.mxu1 %vm4372_vm8, %v11674_v40 }
 0x4dd   : > { %8103 = vmatmul.msk.bf16.gmra.mxu0 %vm4372_vm8, %v6435_v0  ;;  %8073 = vmatmul.msk.bf16.gmra.mxu3 %vm4372_vm8, %v6083_v46  ;;  %v8369_v0 = vld [vmem:[#allocation2 + $0x90] sm:$0xff] }
 0x4de   : > { %v5819_v20 = vpop.f32.mrf.mxu2  ;;  %v6446_v12 = vshrl.u32 %v8369_v0, 16  ;;  %v6449_v46 = vshll.u32 %v8369_v0, 16  ;;  %v6086_v34 = vrot.slane %v8369_v0, 2  ;;  %v5956_v0 = vld [vmem:[#allocation2 + $0xa0] sm:$0x3] }
 0x4df   : > { %v5894_v43 = vadd.f32 %v5819_v20, %v11002_v17 }
 0x4e0   : > { %v6192_v37 = vpop.f32.mrf.mxu3  ;;  %v6448_v20 = vrot.slane %v6446_v12, 2  ;;  %v6451_v42 = vrot.slane %v6449_v46, 3  ;;  %v11681_v12 = vld [vmem:[#allocation48_spill] sm:$0xff] }
 0x4e1   : > { %v6267_v21 = vadd.f32 %v6192_v37, %v5894_v43  ;;  %v5609_v49 = vpop.f32.mrf.mxu1  ;;  %v6464_v46 = vshrl.u32 %v11681_v12, 16 }
 0x4e2   : > { %v11159_v27 = vadd.f32 %v5609_v49, %v10959_v57  ;;  %v11675_v57 = vld [vmem:[#allocation44_spill] sm:$0xff]  ;;  %v6452_v26 = vor.u32 %v6451_v42, %v6448_v20 }
 0x4e3   : > { %v6574_v28 = vpop.f32.mrf.mxu0 }
 0x4e4   : > { %v6453_v63 = vsel %vm2602_vm7, %v6443_v58, %v6452_v26 }
 0x4e6   : > { %v5821_v60 = vpop.f32.mrf.mxu2 }
 0x4e7   : > { %v5895_v45 = vadd.f32 %v5821_v60, %v11016_v9  ;;  %v11676_v9 = vld [vmem:[#allocation30_spill] sm:$0xff]  ;;  %v6455_v60 = vshrl.u32 %v8370_v22, 16 }
 0x4e8   : > { %v6194_v24 = vpop.f32.mrf.mxu3 }
 0x4e9   : > { %v6268_v17 = vadd.f32 %v6194_v24, %v5895_v45  ;;  %v5612_v44 = vpop.f32.mrf.mxu1  ;;  %v6458_v45 = vshll.u32 %v8370_v22, 16  ;;  %v6457_v58 = vrot.slane %v6455_v60, 2 }
 0x4ea   : > { %v11165_v2 = vadd.f32 %v5612_v44, %v10973_v8  ;;  %v11175_v8 = vadd.f32 %v6572_v53, %v6267_v21  ;;  %v6087_v21 = vsel %vm1949_vm4, %v6084_v33, %v6086_v34 }
 0x4eb   : > { %7976 = vmatmul.msk.bf16.gmra.mxu2 %vm4372_vm8, %v11675_v57  ;;  %v11180_v43 = vadd.f32 %v6574_v28, %v6268_v17  ;;  %v6460_v17 = vrot.slane %v6458_v45, 3 }
 0x4ec   : > { %8123 = vmatmul.msk.bf16.gmra.mxu1 %vm4372_vm8, %v11676_v9  ;;  %v11679_v9 = vld [vmem:[#allocation47_spill] sm:$0xff] }
 0x4ed   : > { %8104 = vmatmul.msk.bf16.gmra.mxu0 %vm4372_vm8, %v6444_v61  ;;  %8074 = vmatmul.msk.bf16.gmra.mxu3 %vm4372_vm8, %v6085_v51  ;;  %v6461_v44 = vor.u32 %v6460_v17, %v6457_v58  ;;  %v6088_v61 = vrot.slane %v8370_v22, 2  ;;  %v11682_v22 = vld [vmem:[#allocation49_spill] sm:$0xff]  ;;  %v11684_v17 = vld [vmem:[#allocation6_spill] sm:$0xff] }
 0x4ef   : > { %v6462_v51 = vsel %vm2602_vm7, %v6452_v26, %v6461_v44  ;;  %v6089_v53 = vsel %vm1949_vm4, %v6086_v34, %v6088_v61  ;;  %v6466_v26 = vrot.slane %v6464_v46, 2 }
 0x4f1   : > { %v5614_v40 = vpop.f32.mrf.mxu1 }
 0x4f2   : > { %v11178_v36 = vadd.f32 %v5614_v40, %v10979_v29  ;;  %v11678_v29 = vld [vmem:[#allocation32_spill] sm:$0xff]  ;;  %v6035_v40 = vunpack.c.l.b16 %v5956_v0 }
 0x4f4   : > { %v6054_v34 = vpack.c.b16 %v6035_v40, %v6035_v40  ;;  %v11686_v40 = vld [vmem:[#allocation9_spill] sm:$0xff] }
 0x4f9   : > { %v5617_v37 = vpop.f32.mrf.mxu1 }
 0x4fa   : > { %v11183_v49 = vadd.f32 %v5617_v37, %v10993_v25 }
 0x4fb   : > { %7977 = vmatmul.msk.bf16.gmra.mxu2 %vm4372_vm8, %v11677_v55 }
 0x4fc   : > { %8124 = vmatmul.msk.bf16.gmra.mxu1 %vm4372_vm8, %v11678_v29 }
 0x4fd   : > { %8105 = vmatmul.msk.bf16.gmra.mxu0 %vm4372_vm8, %v6453_v63  ;;  %8075 = vmatmul.msk.bf16.gmra.mxu3 %vm4372_vm8, %v6087_v21  ;;  %v6090_v63 = vrot.slane %v6054_v34, 2 }
 0x4ff   : > { %v6091_v60 = vsel %vm1949_vm4, %v6088_v61, %v6090_v63 }
 0x501   : > { %v5619_v24 = vpop.f32.mrf.mxu1 }
 0x502   : > { %v11194_v25 = vadd.f32 %v5619_v24, %v10999_v35  ;;  %v11680_v35 = vld [vmem:[#allocation34_spill] sm:$0xff] }
 0x509   : > { %v5622_v57 = vpop.f32.mrf.mxu1 }
 0x50a   : > { %v11197_v33 = vadd.f32 %v5622_v57, %v11013_v59  ;;  %v6467_v59 = vshll.u32 %v11681_v12, 16  ;;  %v11237_v57 = vld [vmem:[%s11416_s4] ss:$0 sm:$0xff] }
 0x50b   : > { %7978 = vmatmul.msk.bf16.gmra.mxu2 %vm4372_vm8, %v11679_v9 }
 0x50c   : > { %8125 = vmatmul.msk.bf16.gmra.mxu1 %vm4372_vm8, %v11680_v35  ;;  %v6469_v28 = vrot.slane %v6467_v59, 3 }
 0x50d   : > { %8106 = vmatmul.msk.bf16.gmra.mxu0 %vm4372_vm8, %v6462_v51  ;;  %8076 = vmatmul.msk.bf16.gmra.mxu3 %vm4372_vm8, %v6089_v53 }
 0x50e   : > { %v6470_v37 = vor.u32 %v6469_v28, %v6466_v26 }
 0x510   : > { %v6471_v29 = vsel %vm2602_vm7, %v6461_v44, %v6470_v37 }
 0x511   : > { %v5624_v20 = vpop.f32.mrf.mxu1 }
 0x512   : > { %v11210_v42 = vadd.f32 %v5624_v20, %v11019_v62  ;;  %v11683_v62 = vld [vmem:[#allocation37_spill] sm:$0xff] }
 0x519   : > { %v5627_v55 = vpop.f32.mrf.mxu1 }
 0x51a   : > { %v11213_v21 = vadd.f32 %v5627_v55, %v11033_v1  ;;  %v11687_v55 = vld [vmem:[#allocation12_spill] sm:$0xff] }
 0x51b   : > { %7979 = vmatmul.msk.bf16.gmra.mxu2 %vm4372_vm8, %v11682_v22  ;;  %v5824_v22 = vpop.f32.mrf.mxu2 }
 0x51c   : > { %8126 = vmatmul.msk.bf16.gmra.mxu1 %vm4372_vm8, %v11683_v62 }
 0x51d   : > { %8107 = vmatmul.msk.bf16.gmra.mxu0 %vm4372_vm8, %v6471_v29  ;;  %8077 = vmatmul.msk.bf16.gmra.mxu3 %vm4372_vm8, %v6091_v60 }
 0x521   : > { %v5629_v45 = vpop.f32.mrf.mxu1 }
 0x522   : > { %v11224_v24 = vadd.f32 %v5629_v45, %v11039_v38  ;;  %v6197_v45 = vpop.f32.mrf.mxu3 }
 0x529   : > { %v5632_v1 = vpop.f32.mrf.mxu1 }
 0x52a   : > { %v11227_v58 = vadd.f32 %v5632_v1, %v11053_v10  ;;  %v11685_v10 = vld [vmem:[#allocation7_spill] sm:$0xff] }
 0x52c   : > { %8127 = vmatmul.msk.bf16.gmra.mxu1 %vm4372_vm8, %v11684_v17  ;;  %v6577_v17 = vpop.f32.mrf.mxu0 }
 0x531   : > { %v5634_v44 = vpop.f32.mrf.mxu1 }
 0x532   : > { %v11232_v61 = vadd.f32 %v5634_v44, %v11059_v18 }
 0x539   : > { %v6794_v51 = vpop.f32.mrf.mxu1 }
 0x53a   : > { %v6884_v38 = vadd.f32 %v6794_v51, %v11075_v6 }
 0x53c   : > { %v6924_v9 = vadd.f32 %v11237_v57, %v6884_v38  ;;  %8128 = vmatmul.msk.bf16.gmra.mxu1 %vm4372_vm8, %v11685_v10 }
 0x53e   : > { %v6960_v18 = vmax.f32 %v6924_v9, 0.0  ;;  %v11688_v9 = vld [vmem:[#allocation16_spill] sm:$0xff] }
 0x540   : > { %6996 = vst.msk [vmem:[%s11247_s26] sm:$0xff] %vm4372_vm8, %v6960_v18  ;;  %v6199_v18 = vpop.f32.mrf.mxu3 }
 0x541   : > { %v6796_v53 = vpop.f32.mrf.mxu1 }
 0x542   : > { %v6885_v6 = vadd.f32 %v6796_v53, %v11081_v30  ;;  %v6579_v53 = vpop.f32.mrf.mxu0 }
 0x544   : > { %v6925_v35 = vadd.f32 %v11237_v57, %v6885_v6 }
 0x546   : > { %v6961_v0 = vmax.f32 %v6925_v35, 0.0 }
 0x548   : > { %6997 = vst.msk [vmem:[%s11247_s26 + $0x8] sm:$0xff] %vm4372_vm8, %v6961_v0 }
 0x549   : > { %v6799_v12 = vpop.f32.mrf.mxu1 }
 0x54a   : > { %v6886_v46 = vadd.f32 %v6799_v12, %v11096_v5 }
 0x54c   : > { %v6926_v59 = vadd.f32 %v11237_v57, %v6886_v46  ;;  %8129 = vmatmul.msk.bf16.gmra.mxu1 %vm4372_vm8, %v11686_v40  ;;  %v6582_v40 = vpop.f32.mrf.mxu0 }
 0x54e   : > { %v6962_v20 = vmax.f32 %v6926_v59, 0.0 }
 0x550   : > { %6998 = vst.msk [vmem:[%s11247_s26 + $0x10] sm:$0xff] %vm4372_vm8, %v6962_v20 }
 0x551   : > { %v6801_v26 = vpop.f32.mrf.mxu1 }
 0x552   : > { %v6887_v30 = vadd.f32 %v6801_v26, %v11102_v14  ;;  %v11689_v26 = vld [vmem:[#allocation18_spill] sm:$0xff] }
 0x554   : > { %v6927_v28 = vadd.f32 %v11237_v57, %v6887_v30 }
 0x556   : > { %v6963_v34 = vmax.f32 %v6927_v28, 0.0 }
 0x558   : > { %6999 = vst.msk [vmem:[%s11247_s26 + $0x18] sm:$0xff] %vm4372_vm8, %v6963_v34 }
 0x559   : > { %v6804_v37 = vpop.f32.mrf.mxu1 }
 0x55a   : > { %v6888_v5 = vadd.f32 %v6804_v37, %v11116_v31  ;;  %v5826_v31 = vpop.f32.mrf.mxu2 }
 0x55c   : > { %v6928_v63 = vadd.f32 %v11237_v57, %v6888_v5  ;;  %8130 = vmatmul.msk.bf16.gmra.mxu1 %vm4372_vm8, %v11687_v55 }
 0x55e   : > { %v6964_v29 = vmax.f32 %v6928_v63, 0.0  ;;  %v6584_v63 = vpop.f32.mrf.mxu0 }
 0x560   : > { %7000 = vst.msk [vmem:[%s11247_s26 + $0x20] sm:$0xff] %vm4372_vm8, %v6964_v29 }
 0x561   : > { %v6806_v14 = vpop.f32.mrf.mxu1 }
 0x562   : > { %v6889_v60 = vadd.f32 %v6806_v14, %v11122_v47  ;;  %v5829_v35 = vpop.f32.mrf.mxu2 }
 0x564   : > { %v6929_v62 = vadd.f32 %v11237_v57, %v6889_v60 }
 0x566   : > { %v6965_v1 = vmax.f32 %v6929_v62, 0.0  ;;  %v11690_v62 = vld [vmem:[#allocation15_spill] sm:$0xff] }
 0x568   : > { %7001 = vst.msk [vmem:[%s11247_s26 + $0x28] sm:$0xff] %vm4372_vm8, %v6965_v1 }
 0x569   : > { %v6809_v44 = vpop.f32.mrf.mxu1 }
 0x56a   : > { %v6890_v51 = vadd.f32 %v6809_v44, %v11136_v13  ;;  %v6202_v13 = vpop.f32.mrf.mxu3  ;;  %v5831_v30 = vpop.f32.mrf.mxu2 }
 0x56c   : > { %v6930_v38 = vadd.f32 %v11237_v57, %v6890_v51  ;;  %8131 = vmatmul.msk.bf16.gmra.mxu1 %vm4372_vm8, %v11688_v9  ;;  %v6587_v51 = vpop.f32.mrf.mxu0 }
 0x56e   : > { %v6966_v10 = vmax.f32 %v6930_v38, 0.0 }
 0x570   : > { %7002 = vst.msk [vmem:[%s11247_s26 + $0x30] sm:$0xff] %vm4372_vm8, %v6966_v10 }
 0x571   : > { %v6811_v47 = vpop.f32.mrf.mxu1 }
 0x572   : > { %v6891_v6 = vadd.f32 %v6811_v47, %v11142_v23  ;;  %v6204_v37 = vpop.f32.mrf.mxu3 }
 0x574   : > { %v6931_v0 = vadd.f32 %v11237_v57, %v6891_v6 }
 0x576   : > { %v6967_v12 = vmax.f32 %v6931_v0, 0.0 }
 0x578   : > { %7003 = vst.msk [vmem:[%s11247_s26 + $0x38] sm:$0xff] %vm4372_vm8, %v6967_v12  ;;  %v5897_v12 = vadd.f32 %v5826_v31, %v11036_v15 }
 0x579   : > { %v6814_v46 = vpop.f32.mrf.mxu1 }
 0x57a   : > { %v6892_v59 = vadd.f32 %v6814_v46, %v11156_v7  ;;  %v5834_v7 = vpop.f32.mrf.mxu2  ;;  %v6207_v1 = vpop.f32.mrf.mxu3 }
 0x57c   : > { %v6932_v20 = vadd.f32 %v11237_v57, %v6892_v59  ;;  %8132 = vmatmul.msk.bf16.gmra.mxu1 %vm4372_vm8, %v11689_v26  ;;  %v6270_v26 = vadd.f32 %v6199_v18, %v5897_v12 }
 0x57e   : > { %v6968_v28 = vmax.f32 %v6932_v20, 0.0  ;;  %v6650_v15 = vadd.f32 %v6579_v53, %v6270_v26 }
 0x580   : > { %7004 = vst.msk [vmem:[%s11247_s26 + $0x40] sm:$0xff] %vm4372_vm8, %v6968_v28 }
 0x581   : > { %v6816_v23 = vpop.f32.mrf.mxu1 }
 0x582   : > { %v6893_v34 = vadd.f32 %v6816_v23, %v11162_v4  ;;  %v5896_v4 = vadd.f32 %v5824_v22, %v11022_v19  ;;  %v5836_v38 = vpop.f32.mrf.mxu2  ;;  %v6209_v0 = vpop.f32.mrf.mxu3  ;;  %v5898_v23 = vadd.f32 %v5829_v35, %v11042_v39 }
 0x583   : > { %v6589_v19 = vpop.f32.mrf.mxu0 }
 0x584   : > { %v6933_v5 = vadd.f32 %v11237_v57, %v6893_v34  ;;  %v6269_v47 = vadd.f32 %v6197_v45, %v5896_v4 }
 0x586   : > { %v6969_v55 = vmax.f32 %v6933_v5, 0.0  ;;  %v6649_v46 = vadd.f32 %v6577_v17, %v6269_v47  ;;  %v6271_v5 = vadd.f32 %v6202_v13, %v5898_v23 }
 0x588   : > { %7005 = vst.msk [vmem:[%s11247_s26 + $0x48] sm:$0xff] %vm4372_vm8, %v6969_v55 }
 0x589   : > { %v6819_v29 = vpop.f32.mrf.mxu1 }
 0x58a   : > { %v6894_v14 = vadd.f32 %v6819_v29, %v11175_v8  ;;  %v5839_v20 = vpop.f32.mrf.mxu2  ;;  %v6212_v31 = vpop.f32.mrf.mxu3 }
 0x58b   : > { %v6592_v55 = vpop.f32.mrf.mxu0 }
 0x58c   : > { %v6934_v60 = vadd.f32 %v11237_v57, %v6894_v14  ;;  %8133 = vmatmul.msk.bf16.gmra.mxu1 %vm4372_vm8, %v11690_v62  ;;  %v6651_v62 = vadd.f32 %v6582_v40, %v6271_v5 }
 0x58e   : > { %v6970_v44 = vmax.f32 %v6934_v60, 0.0  ;;  %v5899_v60 = vadd.f32 %v5831_v30, %v11056_v48 }
 0x590   : > { %7006 = vst.msk [vmem:[%s11247_s26 + $0x50] sm:$0xff] %vm4372_vm8, %v6970_v44  ;;  %v6272_v4 = vadd.f32 %v6204_v37, %v5899_v60 }
 0x591   : > { %v6821_v9 = vpop.f32.mrf.mxu1 }
 0x592   : > { %v6895_v10 = vadd.f32 %v6821_v9, %v11180_v43  ;;  %v11691_v43 = vld [vmem:[#allocation46_spill] sm:$0xff]  ;;  %v5841_v18 = vpop.f32.mrf.mxu2  ;;  %v6214_v35 = vpop.f32.mrf.mxu3  ;;  %v6652_v48 = vadd.f32 %v6584_v63, %v6272_v4  ;;  %v11694_v4 = vld [vmem:[#allocation51_spill] sm:$0xff] }
 0x593   : > { %v11692_v9 = vld [vmem:[#allocation50_spill] sm:$0xff]  ;;  %v6594_v13 = vpop.f32.mrf.mxu0 }
 0x594   : > { %v6935_v8 = vadd.f32 %v11237_v57, %v6895_v10 }
 0x596   : > { %v6971_v6 = vmax.f32 %v6935_v8, 0.0  ;;  %v5900_v8 = vadd.f32 %v5834_v7, %v11062_v3 }
 0x598   : > { %7007 = vst.msk [vmem:[%s11247_s26 + $0x58] sm:$0xff] %vm4372_vm8, %v6971_v6  ;;  %v6273_v6 = vadd.f32 %v6207_v1, %v5900_v8 }
 0x599   : > { %v6824_v59 = vpop.f32.mrf.mxu1 }
 0x59a   : > { %v6896_v22 = vadd.f32 %v6824_v59, %v6649_v46  ;;  %v5844_v47 = vpop.f32.mrf.mxu2  ;;  %v6217_v37 = vpop.f32.mrf.mxu3  ;;  %v5901_v59 = vadd.f32 %v5836_v38, %v11078_v52  ;;  %v6653_v26 = vadd.f32 %v6587_v51, %v6273_v6 }
 0x59c   : > { %v6936_v28 = vadd.f32 %v11237_v57, %v6896_v22  ;;  %8134 = vmatmul.msk.bf16.gmra.mxu1 %vm4372_vm8, %v11691_v43  ;;  %v6597_v22 = vpop.f32.mrf.mxu0  ;;  %v6274_v7 = vadd.f32 %v6209_v0, %v5901_v59 }
 0x59e   : > { %v6972_v45 = vmax.f32 %v6936_v28, 0.0  ;;  %v6654_v52 = vadd.f32 %v6589_v19, %v6274_v7 }
 0x5a0   : > { %7008 = vst.msk [vmem:[%s11247_s26 + $0x60] sm:$0xff] %vm4372_vm8, %v6972_v45  ;;  %v11693_v45 = vld [vmem:[#allocation20_spill] sm:$0xff] }
 0x5a1   : > { %v6826_v34 = vpop.f32.mrf.mxu1 }
 0x5a2   : > { %v6897_v17 = vadd.f32 %v6826_v34, %v6650_v15  ;;  %v5846_v28 = vpop.f32.mrf.mxu2  ;;  %v6219_v23 = vpop.f32.mrf.mxu3  ;;  %v5902_v15 = vadd.f32 %v5839_v20, %v11084_v50 }
 0x5a3   : > { %v5905_v6 = vadd.f32 %v5846_v28, %v11119_v11 }
 0x5a4   : > { %v6937_v29 = vadd.f32 %v11237_v57, %v6897_v17  ;;  %v6599_v34 = vpop.f32.mrf.mxu0  ;;  %v6275_v5 = vadd.f32 %v6212_v31, %v5902_v15 }
 0x5a6   : > { %v6973_v14 = vmax.f32 %v6937_v29, 0.0  ;;  %v6655_v60 = vadd.f32 %v6592_v55, %v6275_v5 }
 0x5a8   : > { %7009 = vst.msk [vmem:[%s11247_s26 + $0x68] sm:$0xff] %vm4372_vm8, %v6973_v14  ;;  %v5903_v14 = vadd.f32 %v5841_v18, %v11099_v56 }
 0x5a9   : > { %v6829_v44 = vpop.f32.mrf.mxu1 }
 0x5aa   : > { %v6898_v39 = vadd.f32 %v6829_v44, %v6651_v62  ;;  %v5849_v17 = vpop.f32.mrf.mxu2  ;;  %v6222_v62 = vpop.f32.mrf.mxu3  ;;  %v6276_v20 = vadd.f32 %v6214_v35, %v5903_v14 }
 0x5ac   : > { %v6938_v53 = vadd.f32 %v11237_v57, %v6898_v39  ;;  %8135 = vmatmul.msk.bf16.gmra.mxu1 %vm4372_vm8, %v11692_v9  ;;  %v6602_v39 = vpop.f32.mrf.mxu0  ;;  %v5904_v9 = vadd.f32 %v5844_v47, %v11105_v54  ;;  %v6656_v56 = vadd.f32 %v6594_v13, %v6276_v20  ;;  %v6278_v47 = vadd.f32 %v6219_v23, %v5905_v6 }
 0x5ae   : > { %v6974_v10 = vmax.f32 %v6938_v53, 0.0  ;;  %v6277_v8 = vadd.f32 %v6217_v37, %v5904_v9  ;;  %v5906_v37 = vadd.f32 %v5849_v17, %v11125_v16 }
 0x5b0   : > { %7010 = vst.msk [vmem:[%s11247_s26 + $0x70] sm:$0xff] %vm4372_vm8, %v6974_v10  ;;  %v6279_v28 = vadd.f32 %v6222_v62, %v5906_v37 }
 0x5b1   : > { %v6831_v30 = vpop.f32.mrf.mxu1 }
 0x5b2   : > { %v6899_v40 = vadd.f32 %v6831_v30, %v6652_v48  ;;  %v5851_v31 = vpop.f32.mrf.mxu2  ;;  %v6224_v10 = vpop.f32.mrf.mxu3  ;;  %v6659_v15 = vadd.f32 %v6602_v39, %v6279_v28 }
 0x5b3   : > { %v5907_v23 = vadd.f32 %v5851_v31, %v11139_v32 }
 0x5b4   : > { %v6939_v12 = vadd.f32 %v11237_v57, %v6899_v40  ;;  %v6604_v48 = vpop.f32.mrf.mxu0 }
 0x5b6   : > { %v6975_v46 = vmax.f32 %v6939_v12, 0.0  ;;  %v6657_v12 = vadd.f32 %v6597_v22, %v6277_v8 }
 0x5b8   : > { %7011 = vst.msk [vmem:[%s11247_s26 + $0x78] sm:$0xff] %vm4372_vm8, %v6975_v46 }
 0x5b9   : > { %v6834_v43 = vpop.f32.mrf.mxu1 }
 0x5ba   : > { %v6900_v3 = vadd.f32 %v6834_v43, %v6653_v26  ;;  %v5854_v40 = vpop.f32.mrf.mxu2  ;;  %v6227_v59 = vpop.f32.mrf.mxu3 }
 0x5bc   : > { %v6940_v63 = vadd.f32 %v11237_v57, %v6900_v3  ;;  %8136 = vmatmul.msk.bf16.gmra.mxu1 %vm4372_vm8, %v11693_v45  ;;  %v6607_v43 = vpop.f32.mrf.mxu0  ;;  %v6658_v3 = vadd.f32 %v6599_v34, %v6278_v47  ;;  %v6280_v34 = vadd.f32 %v6224_v10, %v5907_v23 }
 0x5be   : > { %v6976_v1 = vmax.f32 %v6940_v63, 0.0 }
 0x5c0   : > { %7012 = vst.msk [vmem:[%s11247_s26 + $0x80] sm:$0xff] %vm4372_vm8, %v6976_v1 }
 0x5c1   : > { %v6836_v38 = vpop.f32.mrf.mxu1 }
 0x5c2   : > { %v6901_v51 = vadd.f32 %v6836_v38, %v6654_v52  ;;  %v5856_v7 = vpop.f32.mrf.mxu2  ;;  %v6229_v1 = vpop.f32.mrf.mxu3 }
 0x5c4   : > { %v6941_v0 = vadd.f32 %v11237_v57, %v6901_v51  ;;  %v6609_v16 = vpop.f32.mrf.mxu0 }
 0x5c6   : > { %v6977_v29 = vmax.f32 %v6941_v0, 0.0  ;;  %v5908_v0 = vadd.f32 %v5854_v40, %v11145_v41 }
 0x5c8   : > { %7013 = vst.msk [vmem:[%s11247_s26 + $0x88] sm:$0xff] %vm4372_vm8, %v6977_v29  ;;  %v6660_v29 = vadd.f32 %v6604_v48, %v6280_v34  ;;  %v6281_v62 = vadd.f32 %v6227_v59, %v5908_v0 }
 0x5c9   : > { %v6839_v44 = vpop.f32.mrf.mxu1 }
 0x5ca   : > { %v6902_v50 = vadd.f32 %v6839_v44, %v6655_v60  ;;  %v5859_v51 = vpop.f32.mrf.mxu2  ;;  %v6232_v14 = vpop.f32.mrf.mxu3 }
 0x5cb   : > { %v5910_v8 = vadd.f32 %v5859_v51, %v11165_v2 }
 0x5cc   : > { %v6942_v19 = vadd.f32 %v11237_v57, %v6902_v50  ;;  %8137 = vmatmul.msk.bf16.gmra.mxu1 %vm4372_vm8, %v11694_v4  ;;  %v6612_v44 = vpop.f32.mrf.mxu0  ;;  %v6661_v4 = vadd.f32 %v6607_v43, %v6281_v62 }
 0x5ce   : > { %v6978_v53 = vmax.f32 %v6942_v19, 0.0  ;;  %v5909_v19 = vadd.f32 %v5856_v7, %v11159_v27 }
 0x5d0   : > { %7014 = vst.msk [vmem:[%s11247_s26 + $0x90] sm:$0xff] %vm4372_vm8, %v6978_v53  ;;  %v6282_v9 = vadd.f32 %v6229_v1, %v5909_v19 }
 0x5d1   : > { %v6841_v18 = vpop.f32.mrf.mxu1 }
 0x5d2   : > { %v6903_v55 = vadd.f32 %v6841_v18, %v6656_v56  ;;  %v5861_v20 = vpop.f32.mrf.mxu2  ;;  %v6234_v53 = vpop.f32.mrf.mxu3 }
 0x5d4   : > { %v6943_v35 = vadd.f32 %v11237_v57, %v6903_v55  ;;  %v6614_v18 = vpop.f32.mrf.mxu0 }
 0x5d6   : > { %v6979_v30 = vmax.f32 %v6943_v35, 0.0  ;;  %v6662_v35 = vadd.f32 %v6609_v16, %v6282_v9 }
 0x5d8   : > { %7015 = vst.msk [vmem:[%s11247_s26 + $0x98] sm:$0xff] %vm4372_vm8, %v6979_v30  ;;  %v6283_v30 = vadd.f32 %v6232_v14, %v5910_v8 }
 0x5d9   : > { %v6844_v46 = vpop.f32.mrf.mxu1 }
 0x5da   : > { %v6904_v54 = vadd.f32 %v6844_v46, %v6657_v12  ;;  %v5864_v10 = vpop.f32.mrf.mxu2  ;;  %v6237_v6 = vpop.f32.mrf.mxu3  ;;  %v5911_v46 = vadd.f32 %v5861_v20, %v11178_v36  ;;  %v6663_v47 = vadd.f32 %v6612_v44, %v6283_v30 }
 0x5db   : > { %v5912_v7 = vadd.f32 %v5864_v10, %v11183_v49 }
 0x5dc   : > { %v6944_v13 = vadd.f32 %v11237_v57, %v6904_v54  ;;  %v6617_v54 = vpop.f32.mrf.mxu0 }
 0x5de   : > { %v6980_v26 = vmax.f32 %v6944_v13, 0.0 }
 0x5e0   : > { %7016 = vst.msk [vmem:[%s11247_s26 + $0xa0] sm:$0xff] %vm4372_vm8, %v6980_v26  ;;  %v6284_v26 = vadd.f32 %v6234_v53, %v5911_v46 }
 0x5e1   : > { %v6846_v63 = vpop.f32.mrf.mxu1 }
 0x5e2   : > { %v6905_v11 = vadd.f32 %v6846_v63, %v6658_v3  ;;  %v5866_v13 = vpop.f32.mrf.mxu2  ;;  %v6239_v3 = vpop.f32.mrf.mxu3  ;;  %v6664_v63 = vadd.f32 %v6614_v18, %v6284_v26 }
 0x5e4   : > { %v6945_v22 = vadd.f32 %v11237_v57, %v6905_v11  ;;  %v6619_v36 = vpop.f32.mrf.mxu0 }
 0x5e6   : > { %v6981_v45 = vmax.f32 %v6945_v22, 0.0 }
 0x5e8   : > { %7017 = vst.msk [vmem:[%s11247_s26 + $0xa8] sm:$0xff] %vm4372_vm8, %v6981_v45  ;;  %v6285_v45 = vadd.f32 %v6237_v6, %v5912_v7 }
 0x5e9   : > { %v6849_v52 = vpop.f32.mrf.mxu1 }
 0x5ea   : > { %v6906_v38 = vadd.f32 %v6849_v52, %v6659_v15  ;;  %v5869_v22 = vpop.f32.mrf.mxu2  ;;  %v5913_v15 = vadd.f32 %v5866_v13, %v11194_v25  ;;  %v6665_v52 = vadd.f32 %v6617_v54, %v6285_v45  ;;  %v6242_v16 = vpop.f32.mrf.mxu3 }
 0x5ec   : > { %v6946_v17 = vadd.f32 %v11237_v57, %v6906_v38  ;;  %v6286_v51 = vadd.f32 %v6239_v3, %v5913_v15  ;;  %v6622_v34 = vpop.f32.mrf.mxu0 }
 0x5ee   : > { %v6982_v5 = vmax.f32 %v6946_v17, 0.0  ;;  %v6666_v14 = vadd.f32 %v6619_v36, %v6286_v51 }
 0x5f0   : > { %7018 = vst.msk [vmem:[%s11247_s26 + $0xb0] sm:$0xff] %vm4372_vm8, %v6982_v5 }
 0x5f1   : > { %v6851_v60 = vpop.f32.mrf.mxu1 }
 0x5f2   : > { %v6907_v32 = vadd.f32 %v6851_v60, %v6660_v29  ;;  %v5871_v5 = vpop.f32.mrf.mxu2  ;;  %v5914_v29 = vadd.f32 %v5869_v22, %v11197_v33 }
 0x5f3   : > { %v5915_v19 = vadd.f32 %v5871_v5, %v11210_v42 }
 0x5f4   : > { %v6947_v50 = vadd.f32 %v11237_v57, %v6907_v32  ;;  %v6244_v32 = vpop.f32.mrf.mxu3  ;;  %v6287_v62 = vadd.f32 %v6242_v16, %v5914_v29 }
 0x5f6   : > { %v6983_v39 = vmax.f32 %v6947_v50, 0.0  ;;  %v6624_v50 = vpop.f32.mrf.mxu0 }
 0x5f8   : > { %7019 = vst.msk [vmem:[%s11247_s26 + $0xb8] sm:$0xff] %vm4372_vm8, %v6983_v39 }
 0x5f9   : > { %v6854_v31 = vpop.f32.mrf.mxu1 }
 0x5fa   : > { %v6908_v41 = vadd.f32 %v6854_v31, %v6661_v4  ;;  %v5874_v39 = vpop.f32.mrf.mxu2  ;;  %v6667_v4 = vadd.f32 %v6622_v34, %v6287_v62 }
 0x5fc   : > { %v6948_v56 = vadd.f32 %v11237_v57, %v6908_v41  ;;  %v6288_v41 = vadd.f32 %v6244_v32, %v5915_v19  ;;  %v6247_v9 = vpop.f32.mrf.mxu3 }
 0x5fe   : > { %v6984_v55 = vmax.f32 %v6948_v56, 0.0  ;;  %v6627_v18 = vpop.f32.mrf.mxu0  ;;  %v6668_v10 = vadd.f32 %v6624_v50, %v6288_v41 }
 0x600   : > { %7020 = vst.msk [vmem:[%s11247_s26 + $0xc0] sm:$0xff] %vm4372_vm8, %v6984_v55  ;;  %v5916_v55 = vadd.f32 %v5874_v39, %v11213_v21 }
 0x601   : > { %v6856_v48 = vpop.f32.mrf.mxu1 }
 0x602   : > { %v6909_v27 = vadd.f32 %v6856_v48, %v6662_v35  ;;  %v5876_v8 = vpop.f32.mrf.mxu2  ;;  %v6289_v48 = vadd.f32 %v6247_v9, %v5916_v55 }
 0x603   : > { %v5917_v6 = vadd.f32 %v5876_v8, %v11224_v24 }
 0x604   : > { %v6949_v40 = vadd.f32 %v11237_v57, %v6909_v27 }
 0x606   : > { %v6985_v12 = vmax.f32 %v6949_v40, 0.0  ;;  %v6249_v40 = vpop.f32.mrf.mxu3  ;;  %v6629_v21 = vpop.f32.mrf.mxu0 }
 0x607   : > { %v6290_v13 = vadd.f32 %v6249_v40, %v5917_v6 }
 0x608   : > { %7021 = vst.msk [vmem:[%s11247_s26 + $0xc8] sm:$0xff] %vm4372_vm8, %v6985_v12  ;;  %v6669_v12 = vadd.f32 %v6627_v18, %v6289_v48 }
 0x609   : > { %v6859_v59 = vpop.f32.mrf.mxu1 }
 0x60a   : > { %v6910_v2 = vadd.f32 %v6859_v59, %v6663_v47  ;;  %v5879_v47 = vpop.f32.mrf.mxu2 }
 0x60b   : > { %v5918_v26 = vadd.f32 %v5879_v47, %v11227_v58 }
 0x60c   : > { %v6950_v37 = vadd.f32 %v11237_v57, %v6910_v2 }
 0x60e   : > { %v6986_v43 = vmax.f32 %v6950_v37, 0.0  ;;  %v6670_v37 = vadd.f32 %v6629_v21, %v6290_v13 }
 0x610   : > { %7022 = vst.msk [vmem:[%s11247_s26 + $0xd0] sm:$0xff] %vm4372_vm8, %v6986_v43  ;;  %v6252_v43 = vpop.f32.mrf.mxu3 }
 0x611   : > { %v6861_v11 = vpop.f32.mrf.mxu1  ;;  %v6291_v7 = vadd.f32 %v6252_v43, %v5918_v26 }
 0x612   : > { %v6911_v28 = vadd.f32 %v6861_v11, %v6664_v63  ;;  %v6632_v11 = vpop.f32.mrf.mxu0  ;;  %v5881_v36 = vpop.f32.mrf.mxu2 }
 0x613   : > { %v5919_v22 = vadd.f32 %v5881_v36, %v11232_v61  ;;  %v6671_v45 = vadd.f32 %v6632_v11, %v6291_v7 }
 0x614   : > { %v6951_v1 = vadd.f32 %v11237_v57, %v6911_v28 }
 0x616   : > { %v6987_v23 = vmax.f32 %v6951_v1, 0.0 }
 0x618   : > { %7023 = vst.msk [vmem:[%s11247_s26 + $0xd8] sm:$0xff] %vm4372_vm8, %v6987_v23  ;;  %v6254_v23 = vpop.f32.mrf.mxu3 }
 0x619   : > { %v6864_v38 = vpop.f32.mrf.mxu1  ;;  %v6292_v15 = vadd.f32 %v6254_v23, %v5919_v22 }
 0x61a   : > { %v6912_v49 = vadd.f32 %v6864_v38, %v6665_v52  ;;  %v6634_v38 = vpop.f32.mrf.mxu0 }
 0x61c   : > { %v6952_v17 = vadd.f32 %v11237_v57, %v6912_v49  ;;  %v6672_v49 = vadd.f32 %v6634_v38, %v6292_v15 }
 0x61e   : > { %v6988_v0 = vmax.f32 %v6952_v17, 0.0 }
 0x620   : > { %7024 = vst.msk [vmem:[%s11247_s26 + $0xe0] sm:$0xff] %vm4372_vm8, %v6988_v0 }
 0x621   : > { %v6866_v60 = vpop.f32.mrf.mxu1 }
 0x622   : > { %v6913_v25 = vadd.f32 %v6866_v60, %v6666_v14 }
 0x624   : > { %v6953_v44 = vadd.f32 %v11237_v57, %v6913_v25 }
 0x626   : > { %v6989_v20 = vmax.f32 %v6953_v44, 0.0 }
 0x628   : > { %7025 = vst.msk [vmem:[%s11247_s26 + $0xe8] sm:$0xff] %vm4372_vm8, %v6989_v20 }
 0x629   : > { %v6869_v31 = vpop.f32.mrf.mxu1 }
 0x62a   : > { %v6914_v33 = vadd.f32 %v6869_v31, %v6667_v4 }
 0x62c   : > { %v6954_v53 = vadd.f32 %v11237_v57, %v6914_v33 }
 0x62e   : > { %v6990_v56 = vmax.f32 %v6954_v53, 0.0 }
 0x630   : > { %7026 = vst.msk [vmem:[%s11247_s26 + $0xf0] sm:$0xff] %vm4372_vm8, %v6990_v56 }
 0x631   : > { %v6871_v35 = vpop.f32.mrf.mxu1 }
 0x632   : > { %v6915_v42 = vadd.f32 %v6871_v35, %v6668_v10 }
 0x634   : > { %v6955_v27 = vadd.f32 %v11237_v57, %v6915_v42 }
 0x636   : > { %v6991_v30 = vmax.f32 %v6955_v27, 0.0 }
 0x638   : > { %7027 = vst.msk [vmem:[%s11247_s26 + $0xf8] sm:$0xff] %vm4372_vm8, %v6991_v30 }
 0x639   : > { %v6874_v46 = vpop.f32.mrf.mxu1 }
 0x63a   : > { %v6916_v54 = vadd.f32 %v6874_v46, %v6669_v12 }
 0x63c   : > { %v6956_v59 = vadd.f32 %v11237_v57, %v6916_v54 }
 0x63e   : > { %v6992_v2 = vmax.f32 %v6956_v59, 0.0 }
 0x640   : > { %7028 = vst.msk [vmem:[%s11247_s26 + $0x100] sm:$0xff] %vm4372_vm8, %v6992_v2 }
 0x641   : > { %v6876_v3 = vpop.f32.mrf.mxu1 }
 0x642   : > { %v6917_v24 = vadd.f32 %v6876_v3, %v6670_v37 }
 0x644   : > { %v6957_v63 = vadd.f32 %v11237_v57, %v6917_v24 }
 0x646   : > { %v6993_v28 = vmax.f32 %v6957_v63, 0.0 }
 0x648   : > { %7029 = vst.msk [vmem:[%s11247_s26 + $0x108] sm:$0xff] %vm4372_vm8, %v6993_v28 }
 0x649   : > { %v6879_v58 = vpop.f32.mrf.mxu1 }
 0x64a   : > { %v6918_v1 = vadd.f32 %v6879_v58, %v6671_v45 }
 0x64c   : > { %v6958_v52 = vadd.f32 %v11237_v57, %v6918_v1 }
 0x64e   : > { %v6994_v16 = vmax.f32 %v6958_v52, 0.0 }
 0x650   : > { %7030 = vst.msk [vmem:[%s11247_s26 + $0x110] sm:$0xff] %vm4372_vm8, %v6994_v16 }
 0x651   : > { %v6881_v51 = vpop.f32.mrf.mxu1 }
 0x652   : > { %v6919_v34 = vadd.f32 %v6881_v51, %v6672_v49 }
 0x654   : > { %v6959_v17 = vadd.f32 %v11237_v57, %v6919_v34 }
 0x656   : > { %v6995_v61 = vmax.f32 %v6959_v17, 0.0 }
 0x658   : > { %7031 = vst.msk [vmem:[%s11247_s26 + $0x118] sm:$0xff] %vm4372_vm8, %v6995_v61 }
 0x659 PF: > { %s16_s21 = sadd.s32 1, %s8377_s21  }
 0x65a   : > { %p13_p4 = scmp.ge.s32.totalorder %s16_s21, 4  }
 0x65c   :  { %15 = sbr.rel (!%p13_p4) target bundleno = 1 (0x1), region = 90 }

</bundles_post_ra>
